<compile_context>
chip_gen: v6e
topology: v6e:2x2x1
jax: 0.10.0
libtpu: 0.0.40
codegen_flags: <defaults>
</compile_context>

<pallas_src>
import math

import jax
import jax.numpy as jnp
from jax import lax
from jax.experimental import pallas as pl
from jax.experimental.pallas import tpu as pltpu

EPS = 1e-5


# ----------------------------- Pallas kernels -------------------------------
# Training-mode BN needs global batch statistics, so each BN is a sync point:
#   K1: y1 = x @ w1                         (+ sum / sumsq of y1)
#   K2: a1 = relu(bn1(y1)); y2 = grouped 3x3(a1) via 9 shifted matmuls
#                                           (+ sum / sumsq of y2)
#   K3: a2 = relu(bn2(y2)); y3 = a2 @ w3    (+ sum / sumsq of y3)
#   K4: out = relu(bn3(y3) + x)


def conv1_stats_kernel(x_ref, w1_ref, y1_ref, s1_ref, ss1_ref):
    @pl.when(pl.program_id(0) == 0)
    def _():
        s1_ref[...] = jnp.zeros_like(s1_ref)
        ss1_ref[...] = jnp.zeros_like(ss1_ref)

    y = jnp.dot(x_ref[...].astype(jnp.bfloat16), w1_ref[...],
                preferred_element_type=jnp.float32)
    y1_ref[...] = y
    s1_ref[...] += jnp.sum(y, axis=0, keepdims=True)
    ss1_ref[...] += jnp.sum(y * y, axis=0, keepdims=True)


def conv2_stats_kernel(y1_ref, scale1_ref, shift1_ref, w2_ref,
                       y2_ref, s2_ref, ss2_ref, pad_ref):
    # y1_ref block: (1, H, W, C2); w2_ref: (9, C2, C2) per-tap block-diag weights.
    H, W, C2 = y1_ref.shape[1], y1_ref.shape[2], y1_ref.shape[3]

    @pl.when(pl.program_id(0) == 0)
    def _():
        s2_ref[...] = jnp.zeros_like(s2_ref)
        ss2_ref[...] = jnp.zeros_like(ss2_ref)

    # bn1 (precomputed per-channel scale/shift) + relu for this image.
    a = jnp.maximum(y1_ref[0] * scale1_ref[...] + shift1_ref[...], 0.0)

    # Zero-padded halo in VMEM scratch; 3x3 conv = 9 shifted matmuls (no im2col).
    pad_ref[...] = jnp.zeros_like(pad_ref)
    pad_ref[1:1 + H, 1:1 + W, :] = a

    acc = jnp.zeros((H * W, C2), jnp.float32)
    for dh in range(3):
        for dw in range(3):
            tap = pad_ref[dh:dh + H, dw:dw + W, :].reshape(H * W, C2)
            acc = acc + jnp.dot(tap.astype(jnp.bfloat16),
                                w2_ref[dh * 3 + dw],
                                preferred_element_type=jnp.float32)

    y2_ref[...] = acc
    s2_ref[...] += jnp.sum(acc, axis=0, keepdims=True)
    ss2_ref[...] += jnp.sum(acc * acc, axis=0, keepdims=True)


def conv3_stats_kernel(y2_ref, scale2_ref, shift2_ref, w3_ref,
                       y3_ref, s3_ref, ss3_ref):
    @pl.when(pl.program_id(0) == 0)
    def _():
        s3_ref[...] = jnp.zeros_like(s3_ref)
        ss3_ref[...] = jnp.zeros_like(ss3_ref)

    a = jnp.maximum(y2_ref[...] * scale2_ref[...] + shift2_ref[...], 0.0)
    y = jnp.dot(a.astype(jnp.bfloat16), w3_ref[...],
                preferred_element_type=jnp.float32)
    y3_ref[...] = y
    s3_ref[...] += jnp.sum(y, axis=0, keepdims=True)
    ss3_ref[...] += jnp.sum(y * y, axis=0, keepdims=True)


def bn3_residual_relu_kernel(y3_ref, scale3_ref, shift3_ref, res_ref, o_ref):
    # NOTE: at real channel widths (>=128 lanes) these stores are lane-dense;
    # at the toy C4=64 they are masked (acceptable for toy shapes, see review).
    o_ref[...] = jnp.maximum(
        y3_ref[...] * scale3_ref[...] + shift3_ref[...] + res_ref[...], 0.0)


# ------------------------------ wrapper --------------------------------------

def _affine_from_stats(s, ss, gamma, beta, count):
    # Single-pass batch stats (f32): var = E[y^2] - mean^2 (biased, PyTorch BN).
    mean = s / count
    var = ss / count - mean * mean
    scale = gamma * lax.rsqrt(var + EPS)
    shift = beta - mean * scale
    return scale, shift


def _row_tile(m, max_tile=256):
    t = min(m, max_tile)
    while t > 8 and m % t:
        t -= 8
    assert t % 8 == 0 and m % t == 0, (m, t)
    return t


def bottleneck_forward(x_nchw, params, num_group):
    del num_group  # group structure is baked into params["w2_taps"]
    N, Cin, H, W = x_nchw.shape
    C2 = params["w1"].shape[1]
    C4 = params["w3"].shape[1]
    assert Cin == C4, "downsample=None requires inplanes == planes*4"
    M = N * H * W
    tile_m = _row_tile(M)
    grid_m = M // tile_m

    x_flat = jnp.transpose(x_nchw, (0, 2, 3, 1)).reshape(M, Cin).astype(jnp.float32)

    row_spec = lambda c: pl.BlockSpec((tile_m, c), lambda i: (i, 0))
    chan_spec = lambda c: pl.BlockSpec((1, c), lambda i: (0, 0))   # broadcast / accum
    stat_shape = lambda c: jax.ShapeDtypeStruct((1, c), jnp.float32)

    # ---- K1: conv1 (1x1) + bn1 batch-stat accumulation -----------------------
    y1_flat, s1, ss1 = pl.pallas_call(
        conv1_stats_kernel,
        grid=(grid_m,),
        in_specs=[row_spec(Cin),
                  pl.BlockSpec((Cin, C2), lambda i: (0, 0))],
        out_specs=[row_spec(C2), chan_spec(C2), chan_spec(C2)],
        out_shape=[jax.ShapeDtypeStruct((M, C2), jnp.float32),
                   stat_shape(C2), stat_shape(C2)],
        compiler_params=pltpu.CompilerParams(dimension_semantics=("arbitrary",)),
    )(x_flat, params["w1"])
    scale1, shift1 = _affine_from_stats(s1, ss1, params["g1"], params["b1"], M)

    # ---- K2: bn1 + relu + grouped 3x3 conv (halo scratch, shifted matmuls) ----
    y1_img = y1_flat.reshape(N, H, W, C2)
    y2_flat, s2, ss2 = pl.pallas_call(
        conv2_stats_kernel,
        grid=(N,),
        in_specs=[pl.BlockSpec((1, H, W, C2), lambda n: (n, 0, 0, 0)),
                  chan_spec(C2), chan_spec(C2),
                  pl.BlockSpec((9, C2, C2), lambda n: (0, 0, 0))],
        out_specs=[pl.BlockSpec((H * W, C2), lambda n: (n, 0)),
                   chan_spec(C2), chan_spec(C2)],
        out_shape=[jax.ShapeDtypeStruct((M, C2), jnp.float32),
                   stat_shape(C2), stat_shape(C2)],
        scratch_shapes=[pltpu.VMEM((H + 2, W + 2, C2), jnp.float32)],
        compiler_params=pltpu.CompilerParams(dimension_semantics=("arbitrary",)),
    )(y1_img, scale1, shift1, params["w2_taps"])
    scale2, shift2 = _affine_from_stats(s2, ss2, params["g2"], params["b2"], M)

    # ---- K3: bn2 + relu + conv3 (1x1) + bn3 stat accumulation -----------------
    y3_flat, s3, ss3 = pl.pallas_call(
        conv3_stats_kernel,
        grid=(grid_m,),
        in_specs=[row_spec(C2), chan_spec(C2), chan_spec(C2),
                  pl.BlockSpec((C2, C4), lambda i: (0, 0))],
        out_specs=[row_spec(C4), chan_spec(C4), chan_spec(C4)],
        out_shape=[jax.ShapeDtypeStruct((M, C4), jnp.float32),
                   stat_shape(C4), stat_shape(C4)],
        compiler_params=pltpu.CompilerParams(dimension_semantics=("arbitrary",)),
    )(y2_flat, scale2, shift2, params["w3"])
    scale3, shift3 = _affine_from_stats(s3, ss3, params["g3"], params["b3"], M)

    # ---- K4: bn3 + residual add + relu (no reduction -> parallel axis) --------
    out_flat = pl.pallas_call(
        bn3_residual_relu_kernel,
        grid=(grid_m,),
        in_specs=[row_spec(C4), chan_spec(C4), chan_spec(C4), row_spec(C4)],
        out_specs=row_spec(C4),
        out_shape=jax.ShapeDtypeStruct((M, C4), jnp.float32),
        compiler_params=pltpu.CompilerParams(dimension_semantics=("parallel",)),
    )(y3_flat, scale3, shift3, x_flat)

    return out_flat.reshape(N, H, W, C4).transpose(0, 3, 1, 2)  # back to NCHW


bottleneck_forward = jax.jit(bottleneck_forward, static_argnums=(2,))


# --------------------------- parameter setup ---------------------------------

def init_params(key, inplanes, planes, num_group):
    C2, C4 = planes * 2, planes * 4
    Cg = C2 // num_group
    k1, k2, k3 = jax.random.split(key, 3)

    # PyTorch conv weight layouts (O, I/groups, kh, kw), deterministic init.
    w1_t = jax.random.normal(k1, (C2, inplanes, 1, 1), jnp.float32) / math.sqrt(inplanes)
    w2_t = jax.random.normal(k2, (C2, Cg, 3, 3), jnp.float32) / math.sqrt(Cg * 9)
    w3_t = jax.random.normal(k3, (C4, C2, 1, 1), jnp.float32) / math.sqrt(C2)

    # 1x1 convs -> (Cin, Cout) matmul weights (bf16 for the MXU).
    w1 = w1_t[:, :, 0, 0].T
    w3 = w3_t[:, :, 0, 0].T

    # grouped 3x3 conv -> per-tap block-diagonal (C_in, C_out) matmul weights.
    # Kept dense (Cg << 128 would under-fill the MXU if split per group).
    w2_taps = jnp.zeros((9, C2, C2), jnp.float32)
    for dh in range(3):
        for dw in range(3):
            t = dh * 3 + dw
            for g in range(num_group):
                blk = w2_t[g * Cg:(g + 1) * Cg, :, dh, dw]      # (Cg_out, Cg_in)
                w2_taps = w2_taps.at[t, g * Cg:(g + 1) * Cg,
                                     g * Cg:(g + 1) * Cg].set(blk.T)

    ones = lambda c: jnp.ones((1, c), jnp.float32)
    zeros = lambda c: jnp.zeros((1, c), jnp.float32)
    return {
        "w1": w1.astype(jnp.bfloat16),
        "w2_taps": w2_taps.astype(jnp.bfloat16),
        "w3": w3.astype(jnp.bfloat16),
        "g1": ones(C2), "b1": zeros(C2),
        "g2": ones(C2), "b2": zeros(C2),
        "g3": ones(C4), "b3": zeros(C4),
        # torch-layout f32 weights kept for the pure-JAX reference
        "_w1_t": w1_t, "_w2_t": w2_t, "_w3_t": w3_t,
    }


# ------------------------- pure-JAX reference --------------------------------

def reference_forward(x, params, num_group):
    def bn(y):  # NCHW, training-mode batch stats, gamma=1 beta=0
        m = jnp.mean(y, axis=(0, 2, 3), keepdims=True)
        v = jnp.mean((y - m) ** 2, axis=(0, 2, 3), keepdims=True)
        return (y - m) * lax.rsqrt(v + EPS)

    def conv(y, w, groups, pad):
        return lax.conv_general_dilated(
            y, w, window_strides=(1, 1), padding=pad,
            feature_group_count=groups,
            dimension_numbers=("NCHW", "OIHW", "NCHW"),
            precision=lax.Precision.HIGHEST)

    out = jax.nn.relu(bn(conv(x, params["_w1_t"], 1, "VALID")))
    out = jax.nn.relu(bn(conv(out, params["_w2_t"], num_group, "SAME")))
    out = bn(conv(out, params["_w3_t"], 1, "VALID"))
    return jax.nn.relu(out + x)


# --------------------------------- main ---------------------------------------

if __name__ == "__main__":
    # small ResNeXt bottleneck: planes=16 -> width C2=32, out C4=64, groups=4
    planes, num_group = 16, 4
    inplanes = planes * 4          # identity residual (downsample=None)
    N, H, W = 2, 16, 16

    key = jax.random.PRNGKey(0)
    kx, kp = jax.random.split(key)
    x = jax.random.normal(kx, (N, inplanes, H, W), jnp.float32)
    params = init_params(kp, inplanes, planes, num_group)

    out = jax.block_until_ready(bottleneck_forward(x, params, num_group))
    ref = jax.block_until_ready(reference_forward(x, params, num_group))

    assert out.shape == (N, planes * 4, H, W)
    max_err = float(jnp.max(jnp.abs(out - ref)))
    # bf16 MXU operands vs f32 HIGHEST-precision reference -> looser tolerance
    # than the old all-f32 path (review anticipated this).
    assert jnp.allclose(out, ref, atol=5e-2, rtol=5e-2), max_err
    print("KERNEL_OK")
</pallas_src>

<mosaic_0001>
module attributes {stable_mosaic.version = 11 : i64} {
  func.func @conv1_stats_kernel(%arg0: i32, %arg1: memref<256x64xf32, #tpu.memory_space<vmem>>, %arg2: memref<64x32xbf16, #tpu.memory_space<vmem>>, %arg3: memref<256x32xf32, #tpu.memory_space<vmem>>, %arg4: memref<1x32xf32, #tpu.memory_space<vmem>>, %arg5: memref<1x32xf32, #tpu.memory_space<vmem>>) attributes {dimension_semantics = [#tpu.dimension_semantics<arbitrary>], iteration_bounds = array<i64: 2>, scalar_prefetch = 0 : i64, scratch_operands = 0 : i64, tpu.core_type = #tpu.core_type<tc>, window_params = [{transform_indices = @transform_0, window_bounds = array<i64: 256, 64>}, {pipeline_mode = #tpu.pipeline_mode<synchronous>, transform_indices = @transform_1, window_bounds = array<i64: 64, 32>}, {transform_indices = @transform_2, window_bounds = array<i64: 256, 32>}, {pipeline_mode = #tpu.pipeline_mode<synchronous>, transform_indices = @transform_3, window_bounds = array<i64: 1, 32>}, {pipeline_mode = #tpu.pipeline_mode<synchronous>, transform_indices = @transform_4, window_bounds = array<i64: 1, 32>}]} {
    %c0_i32 = arith.constant 0 : i32
    %0 = arith.cmpi eq, %arg0, %c0_i32 : i32
    %1 = arith.extui %0 : i1 to i32
    %c0_i32_0 = arith.constant 0 : i32
    %2 = arith.cmpi ne, %1, %c0_i32_0 : i32
    scf.if %2 {
      %cst_16 = arith.constant 0.000000e+00 : f32
      %19 = vector.broadcast %cst_16 : f32 to vector<1x32xf32>
      %c0_17 = arith.constant 0 : index
      %c0_18 = arith.constant 0 : index
      %20 = vector.load %arg4[%c0_17, %c0_18] : memref<1x32xf32, #tpu.memory_space<vmem>>, vector<1x32xf32>
      tpu.vector_store %arg4[%c0_17, %c0_18], %19 {strides = array<i32>} : memref<1x32xf32, #tpu.memory_space<vmem>>, vector<1x32xf32>,
      %cst_19 = arith.constant 0.000000e+00 : f32
      %21 = vector.broadcast %cst_19 : f32 to vector<1x32xf32>
      %c0_20 = arith.constant 0 : index
      %c0_21 = arith.constant 0 : index
      %22 = vector.load %arg5[%c0_20, %c0_21] : memref<1x32xf32, #tpu.memory_space<vmem>>, vector<1x32xf32>
      tpu.vector_store %arg5[%c0_20, %c0_21], %21 {strides = array<i32>} : memref<1x32xf32, #tpu.memory_space<vmem>>, vector<1x32xf32>,
    } else {
    }
    %c0 = arith.constant 0 : index
    %c0_1 = arith.constant 0 : index
    %3 = vector.load %arg1[%c0, %c0_1] : memref<256x64xf32, #tpu.memory_space<vmem>>, vector<256x64xf32>
    %4 = arith.truncf %3 : vector<256x64xf32> to vector<256x64xbf16>
    %c0_2 = arith.constant 0 : index
    %c0_3 = arith.constant 0 : index
    %5 = vector.load %arg2[%c0_2, %c0_3] : memref<64x32xbf16, #tpu.memory_space<vmem>>, vector<64x32xbf16>
    %cst = arith.constant dense<0.000000e+00> : vector<256x32xf32>
    %6 = tpu.matmul %4, %5, %cst {dimension_numbers = #tpu.dot_dimension_numbers<[1], [0], [0], [1], [0, 0, 1, 1], [], []>} : vector<256x64xbf16>, vector<64x32xbf16>, vector<256x32xf32> -> vector<256x32xf32>
    %c0_4 = arith.constant 0 : index
    %c0_5 = arith.constant 0 : index
    %7 = vector.load %arg3[%c0_4, %c0_5] : memref<256x32xf32, #tpu.memory_space<vmem>>, vector<256x32xf32>
    tpu.vector_store %arg3[%c0_4, %c0_5], %6 {strides = array<i32>} : memref<256x32xf32, #tpu.memory_space<vmem>>, vector<256x32xf32>,
    %c0_6 = arith.constant 0 : index
    %c0_7 = arith.constant 0 : index
    %8 = vector.load %arg4[%c0_6, %c0_7] : memref<1x32xf32, #tpu.memory_space<vmem>>, vector<1x32xf32>
    %cst_8 = arith.constant dense<0.000000e+00> : vector<32xf32>
    %9 = vector.multi_reduction <add>, %6, %cst_8 [0] : vector<256x32xf32> to vector<32xf32>
    %10 = vector.shape_cast %9 : vector<32xf32> to vector<1x32xf32>
    %11 = arith.addf %8, %10 : vector<1x32xf32>
    %c0_9 = arith.constant 0 : index
    %c0_10 = arith.constant 0 : index
    %12 = vector.load %arg4[%c0_9, %c0_10] : memref<1x32xf32, #tpu.memory_space<vmem>>, vector<1x32xf32>
    tpu.vector_store %arg4[%c0_9, %c0_10], %11 {strides = array<i32>} : memref<1x32xf32, #tpu.memory_space<vmem>>, vector<1x32xf32>,
    %c0_11 = arith.constant 0 : index
    %c0_12 = arith.constant 0 : index
    %13 = vector.load %arg5[%c0_11, %c0_12] : memref<1x32xf32, #tpu.memory_space<vmem>>, vector<1x32xf32>
    %14 = arith.mulf %6, %6 : vector<256x32xf32>
    %cst_13 = arith.constant dense<0.000000e+00> : vector<32xf32>
    %15 = vector.multi_reduction <add>, %14, %cst_13 [0] : vector<256x32xf32> to vector<32xf32>
    %16 = vector.shape_cast %15 : vector<32xf32> to vector<1x32xf32>
    %17 = arith.addf %13, %16 : vector<1x32xf32>
    %c0_14 = arith.constant 0 : index
    %c0_15 = arith.constant 0 : index
    %18 = vector.load %arg5[%c0_14, %c0_15] : memref<1x32xf32, #tpu.memory_space<vmem>>, vector<1x32xf32>
    tpu.vector_store %arg5[%c0_14, %c0_15], %17 {strides = array<i32>} : memref<1x32xf32, #tpu.memory_space<vmem>>, vector<1x32xf32>,
    return
  }
  func.func @transform_0(%arg0: i32) -> (i32, i32) {
    %c0_i32 = arith.constant 0 : i32
    %c0_i32_0 = arith.constant 0 : i32
    return %arg0, %c0_i32 : i32, i32
  }
  func.func @transform_1(%arg0: i32) -> (i32, i32) {
    %c0_i32 = arith.constant 0 : i32
    %c0_i32_0 = arith.constant 0 : i32
    %c0_i32_1 = arith.constant 0 : i32
    return %c0_i32, %c0_i32_0 : i32, i32
  }
  func.func @transform_2(%arg0: i32) -> (i32, i32) {
    %c0_i32 = arith.constant 0 : i32
    %c0_i32_0 = arith.constant 0 : i32
    return %arg0, %c0_i32 : i32, i32
  }
  func.func @transform_3(%arg0: i32) -> (i32, i32) {
    %c0_i32 = arith.constant 0 : i32
    %c0_i32_0 = arith.constant 0 : i32
    %c0_i32_1 = arith.constant 0 : i32
    return %c0_i32, %c0_i32_0 : i32, i32
  }
  func.func @transform_4(%arg0: i32) -> (i32, i32) {
    %c0_i32 = arith.constant 0 : i32
    %c0_i32_0 = arith.constant 0 : i32
    %c0_i32_1 = arith.constant 0 : i32
    return %c0_i32, %c0_i32_0 : i32, i32
  }
}

module attributes {stable_mosaic.version = 11 : i64} {
  func.func @conv2_stats_kernel(%arg0: i32, %arg1: memref<1x16x16x32xf32, #tpu.memory_space<vmem>>, %arg2: memref<1x32xf32, #tpu.memory_space<vmem>>, %arg3: memref<1x32xf32, #tpu.memory_space<vmem>>, %arg4: memref<9x32x32xbf16, #tpu.memory_space<vmem>>, %arg5: memref<256x32xf32, #tpu.memory_space<vmem>>, %arg6: memref<1x32xf32, #tpu.memory_space<vmem>>, %arg7: memref<1x32xf32, #tpu.memory_space<vmem>>, %arg8: memref<18x18x32xf32, #tpu.memory_space<vmem>>) attributes {dimension_semantics = [#tpu.dimension_semantics<arbitrary>], iteration_bounds = array<i64: 2>, scalar_prefetch = 0 : i64, scratch_operands = 1 : i64, tpu.core_type = #tpu.core_type<tc>, window_params = [{transform_indices = @transform_0, window_bounds = array<i64: 1, 16, 16, 32>}, {pipeline_mode = #tpu.pipeline_mode<synchronous>, transform_indices = @transform_1, window_bounds = array<i64: 1, 32>}, {pipeline_mode = #tpu.pipeline_mode<synchronous>, transform_indices = @transform_2, window_bounds = array<i64: 1, 32>}, {pipeline_mode = #tpu.pipeline_mode<synchronous>, transform_indices = @transform_3, window_bounds = array<i64: 9, 32, 32>}, {transform_indices = @transform_4, window_bounds = array<i64: 256, 32>}, {pipeline_mode = #tpu.pipeline_mode<synchronous>, transform_indices = @transform_5, window_bounds = array<i64: 1, 32>}, {pipeline_mode = #tpu.pipeline_mode<synchronous>, transform_indices = @transform_6, window_bounds = array<i64: 1, 32>}]} {
    %c0_i32 = arith.constant 0 : i32
    %0 = arith.cmpi eq, %arg0, %c0_i32 : i32
    %1 = arith.extui %0 : i1 to i32
    %c0_i32_0 = arith.constant 0 : i32
    %2 = arith.cmpi ne, %1, %c0_i32_0 : i32
    scf.if %2 {
      %cst_83 = arith.constant 0.000000e+00 : f32
      %94 = vector.broadcast %cst_83 : f32 to vector<1x32xf32>
      %c0_84 = arith.constant 0 : index
      %c0_85 = arith.constant 0 : index
      %95 = vector.load %arg6[%c0_84, %c0_85] : memref<1x32xf32, #tpu.memory_space<vmem>>, vector<1x32xf32>
      tpu.vector_store %arg6[%c0_84, %c0_85], %94 {strides = array<i32>} : memref<1x32xf32, #tpu.memory_space<vmem>>, vector<1x32xf32>,
      %cst_86 = arith.constant 0.000000e+00 : f32
      %96 = vector.broadcast %cst_86 : f32 to vector<1x32xf32>
      %c0_87 = arith.constant 0 : index
      %c0_88 = arith.constant 0 : index
      %97 = vector.load %arg7[%c0_87, %c0_88] : memref<1x32xf32, #tpu.memory_space<vmem>>, vector<1x32xf32>
      tpu.vector_store %arg7[%c0_87, %c0_88], %96 {strides = array<i32>} : memref<1x32xf32, #tpu.memory_space<vmem>>, vector<1x32xf32>,
    } else {
    }
    %c0 = arith.constant 0 : index
    %c0_1 = arith.constant 0 : index
    %c0_2 = arith.constant 0 : index
    %c0_3 = arith.constant 0 : index
    %3 = vector.load %arg1[%c0, %c0_1, %c0_2, %c0_3] : memref<1x16x16x32xf32, #tpu.memory_space<vmem>>, vector<1x16x16x32xf32>
    %4 = vector.shape_cast %3 : vector<1x16x16x32xf32> to vector<16x16x32xf32>
    %c0_4 = arith.constant 0 : index
    %c0_5 = arith.constant 0 : index
    %5 = vector.load %arg2[%c0_4, %c0_5] : memref<1x32xf32, #tpu.memory_space<vmem>>, vector<1x32xf32>
    %6 = vector.shape_cast %5 : vector<1x32xf32> to vector<1x1x32xf32>
    %7 = vector.broadcast %6 : vector<1x1x32xf32> to vector<16x16x32xf32>
    %8 = arith.mulf %4, %7 : vector<16x16x32xf32>
    %c0_6 = arith.constant 0 : index
    %c0_7 = arith.constant 0 : index
    %9 = vector.load %arg3[%c0_6, %c0_7] : memref<1x32xf32, #tpu.memory_space<vmem>>, vector<1x32xf32>
    %10 = vector.shape_cast %9 : vector<1x32xf32> to vector<1x1x32xf32>
    %11 = vector.broadcast %10 : vector<1x1x32xf32> to vector<16x16x32xf32>
    %12 = arith.addf %8, %11 : vector<16x16x32xf32>
    %cst = arith.constant 0.000000e+00 : f32
    %13 = vector.broadcast %cst : f32 to vector<16x16x32xf32>
    %14 = arith.maximumf %12, %13 : vector<16x16x32xf32>
    %cst_8 = arith.constant 0.000000e+00 : f32
    %15 = vector.broadcast %cst_8 : f32 to vector<18x18x32xf32>
    %c0_9 = arith.constant 0 : index
    %c0_10 = arith.constant 0 : index
    %c0_11 = arith.constant 0 : index
    %16 = vector.load %arg8[%c0_9, %c0_10, %c0_11] : memref<18x18x32xf32, #tpu.memory_space<vmem>>, vector<18x18x32xf32>
    tpu.vector_store %arg8[%c0_9, %c0_10, %c0_11], %15 {strides = array<i32>} : memref<18x18x32xf32, #tpu.memory_space<vmem>>, vector<18x18x32xf32>,
    %c1 = arith.constant 1 : index
    %c1_12 = arith.constant 1 : index
    %c0_13 = arith.constant 0 : index
    %17 = vector.load %arg8[%c1, %c1_12, %c0_13] : memref<18x18x32xf32, #tpu.memory_space<vmem>>, vector<16x16x32xf32>
    tpu.vector_store %arg8[%c1, %c1_12, %c0_13], %14 {strides = array<i32>} : memref<18x18x32xf32, #tpu.memory_space<vmem>>, vector<16x16x32xf32>,
    %cst_14 = arith.constant 0.000000e+00 : f32
    %18 = vector.broadcast %cst_14 : f32 to vector<256x32xf32>
    %c0_15 = arith.constant 0 : index
    %c0_16 = arith.constant 0 : index
    %c0_17 = arith.constant 0 : index
    %19 = vector.load %arg8[%c0_15, %c0_16, %c0_17] : memref<18x18x32xf32, #tpu.memory_space<vmem>>, vector<16x16x32xf32>
    %20 = vector.shape_cast %19 : vector<16x16x32xf32> to vector<256x32xf32>
    %21 = arith.truncf %20 : vector<256x32xf32> to vector<256x32xbf16>
    %c0_18 = arith.constant 0 : index
    %c0_19 = arith.constant 0 : index
    %c0_20 = arith.constant 0 : index
    %22 = vector.load %arg4[%c0_18, %c0_19, %c0_20] : memref<9x32x32xbf16, #tpu.memory_space<vmem>>, vector<1x32x32xbf16>
    %23 = vector.shape_cast %22 : vector<1x32x32xbf16> to vector<32x32xbf16>
    %cst_21 = arith.constant dense<0.000000e+00> : vector<256x32xf32>
    %24 = tpu.matmul %21, %23, %cst_21 {dimension_numbers = #tpu.dot_dimension_numbers<[1], [0], [0], [1], [0, 0, 1, 1], [], []>} : vector<256x32xbf16>, vector<32x32xbf16>, vector<256x32xf32> -> vector<256x32xf32>
    %25 = arith.addf %18, %24 : vector<256x32xf32>
    %c0_22 = arith.constant 0 : index
    %c1_23 = arith.constant 1 : index
    %c0_24 = arith.constant 0 : index
    %26 = vector.load %arg8[%c0_22, %c1_23, %c0_24] : memref<18x18x32xf32, #tpu.memory_space<vmem>>, vector<16x16x32xf32>
    %27 = vector.shape_cast %26 : vector<16x16x32xf32> to vector<256x32xf32>
    %28 = arith.truncf %27 : vector<256x32xf32> to vector<256x32xbf16>
    %c1_25 = arith.constant 1 : index
    %c0_26 = arith.constant 0 : index
    %c0_27 = arith.constant 0 : index
    %29 = vector.load %arg4[%c1_25, %c0_26, %c0_27] : memref<9x32x32xbf16, #tpu.memory_space<vmem>>, vector<1x32x32xbf16>
    %30 = vector.shape_cast %29 : vector<1x32x32xbf16> to vector<32x32xbf16>
    %cst_28 = arith.constant dense<0.000000e+00> : vector<256x32xf32>
    %31 = tpu.matmul %28, %30, %cst_28 {dimension_numbers = #tpu.dot_dimension_numbers<[1], [0], [0], [1], [0, 0, 1, 1], [], []>} : vector<256x32xbf16>, vector<32x32xbf16>, vector<256x32xf32> -> vector<256x32xf32>
    %32 = arith.addf %25, %31 : vector<256x32xf32>
    %c0_29 = arith.constant 0 : index
    %c2 = arith.constant 2 : index
    %c0_30 = arith.constant 0 : index
    %33 = vector.load %arg8[%c0_29, %c2, %c0_30] : memref<18x18x32xf32, #tpu.memory_space<vmem>>, vector<16x16x32xf32>
    %34 = vector.shape_cast %33 : vector<16x16x32xf32> to vector<256x32xf32>
    %35 = arith.truncf %34 : vector<256x32xf32> to vector<256x32xbf16>
    %c2_31 = arith.constant 2 : index
    %c0_32 = arith.constant 0 : index
    %c0_33 = arith.constant 0 : index
    %36 = vector.load %arg4[%c2_31, %c0_32, %c0_33] : memref<9x32x32xbf16, #tpu.memory_space<vmem>>, vector<1x32x32xbf16>
    %37 = vector.shape_cast %36 : vector<1x32x32xbf16> to vector<32x32xbf16>
    %cst_34 = arith.constant dense<0.000000e+00> : vector<256x32xf32>
    %38 = tpu.matmul %35, %37, %cst_34 {dimension_numbers = #tpu.dot_dimension_numbers<[1], [0], [0], [1], [0, 0, 1, 1], [], []>} : vector<256x32xbf16>, vector<32x32xbf16>, vector<256x32xf32> -> vector<256x32xf32>
    %39 = arith.addf %32, %38 : vector<256x32xf32>
    %c1_35 = arith.constant 1 : index
    %c0_36 = arith.constant 0 : index
    %c0_37 = arith.constant 0 : index
    %40 = vector.load %arg8[%c1_35, %c0_36, %c0_37] : memref<18x18x32xf32, #tpu.memory_space<vmem>>, vector<16x16x32xf32>
    %41 = vector.shape_cast %40 : vector<16x16x32xf32> to vector<256x32xf32>
    %42 = arith.truncf %41 : vector<256x32xf32> to vector<256x32xbf16>
    %c3 = arith.constant 3 : index
    %c0_38 = arith.constant 0 : index
    %c0_39 = arith.constant 0 : index
    %43 = vector.load %arg4[%c3, %c0_38, %c0_39] : memref<9x32x32xbf16, #tpu.memory_space<vmem>>, vector<1x32x32xbf16>
    %44 = vector.shape_cast %43 : vector<1x32x32xbf16> to vector<32x32xbf16>
    %cst_40 = arith.constant dense<0.000000e+00> : vector<256x32xf32>
    %45 = tpu.matmul %42, %44, %cst_40 {dimension_numbers = #tpu.dot_dimension_numbers<[1], [0], [0], [1], [0, 0, 1, 1], [], []>} : vector<256x32xbf16>, vector<32x32xbf16>, vector<256x32xf32> -> vector<256x32xf32>
    %46 = arith.addf %39, %45 : vector<256x32xf32>
    %c1_41 = arith.constant 1 : index
    %c1_42 = arith.constant 1 : index
    %c0_43 = arith.constant 0 : index
    %47 = vector.load %arg8[%c1_41, %c1_42, %c0_43] : memref<18x18x32xf32, #tpu.memory_space<vmem>>, vector<16x16x32xf32>
    %48 = vector.shape_cast %47 : vector<16x16x32xf32> to vector<256x32xf32>
    %49 = arith.truncf %48 : vector<256x32xf32> to vector<256x32xbf16>
    %c4 = arith.constant 4 : index
    %c0_44 = arith.constant 0 : index
    %c0_45 = arith.constant 0 : index
    %50 = vector.load %arg4[%c4, %c0_44, %c0_45] : memref<9x32x32xbf16, #tpu.memory_space<vmem>>, vector<1x32x32xbf16>
    %51 = vector.shape_cast %50 : vector<1x32x32xbf16> to vector<32x32xbf16>
    %cst_46 = arith.constant dense<0.000000e+00> : vector<256x32xf32>
    %52 = tpu.matmul %49, %51, %cst_46 {dimension_numbers = #tpu.dot_dimension_numbers<[1], [0], [0], [1], [0, 0, 1, 1], [], []>} : vector<256x32xbf16>, vector<32x32xbf16>, vector<256x32xf32> -> vector<256x32xf32>
    %53 = arith.addf %46, %52 : vector<256x32xf32>
    %c1_47 = arith.constant 1 : index
    %c2_48 = arith.constant 2 : index
    %c0_49 = arith.constant 0 : index
    %54 = vector.load %arg8[%c1_47, %c2_48, %c0_49] : memref<18x18x32xf32, #tpu.memory_space<vmem>>, vector<16x16x32xf32>
    %55 = vector.shape_cast %54 : vector<16x16x32xf32> to vector<256x32xf32>
    %56 = arith.truncf %55 : vector<256x32xf32> to vector<256x32xbf16>
    %c5 = arith.constant 5 : index
    %c0_50 = arith.constant 0 : index
    %c0_51 = arith.constant 0 : index
    %57 = vector.load %arg4[%c5, %c0_50, %c0_51] : memref<9x32x32xbf16, #tpu.memory_space<vmem>>, vector<1x32x32xbf16>
    %58 = vector.shape_cast %57 : vector<1x32x32xbf16> to vector<32x32xbf16>
    %cst_52 = arith.constant dense<0.000000e+00> : vector<256x32xf32>
    %59 = tpu.matmul %56, %58, %cst_52 {dimension_numbers = #tpu.dot_dimension_numbers<[1], [0], [0], [1], [0, 0, 1, 1], [], []>} : vector<256x32xbf16>, vector<32x32xbf16>, vector<256x32xf32> -> vector<256x32xf32>
    %60 = arith.addf %53, %59 : vector<256x32xf32>
    %c2_53 = arith.constant 2 : index
    %c0_54 = arith.constant 0 : index
    %c0_55 = arith.constant 0 : index
    %61 = vector.load %arg8[%c2_53, %c0_54, %c0_55] : memref<18x18x32xf32, #tpu.memory_space<vmem>>, vector<16x16x32xf32>
    %62 = vector.shape_cast %61 : vector<16x16x32xf32> to vector<256x32xf32>
    %63 = arith.truncf %62 : vector<256x32xf32> to vector<256x32xbf16>
    %c6 = arith.constant 6 : index
    %c0_56 = arith.constant 0 : index
    %c0_57 = arith.constant 0 : index
    %64 = vector.load %arg4[%c6, %c0_56, %c0_57] : memref<9x32x32xbf16, #tpu.memory_space<vmem>>, vector<1x32x32xbf16>
    %65 = vector.shape_cast %64 : vector<1x32x32xbf16> to vector<32x32xbf16>
    %cst_58 = arith.constant dense<0.000000e+00> : vector<256x32xf32>
    %66 = tpu.matmul %63, %65, %cst_58 {dimension_numbers = #tpu.dot_dimension_numbers<[1], [0], [0], [1], [0, 0, 1, 1], [], []>} : vector<256x32xbf16>, vector<32x32xbf16>, vector<256x32xf32> -> vector<256x32xf32>
    %67 = arith.addf %60, %66 : vector<256x32xf32>
    %c2_59 = arith.constant 2 : index
    %c1_60 = arith.constant 1 : index
    %c0_61 = arith.constant 0 : index
    %68 = vector.load %arg8[%c2_59, %c1_60, %c0_61] : memref<18x18x32xf32, #tpu.memory_space<vmem>>, vector<16x16x32xf32>
    %69 = vector.shape_cast %68 : vector<16x16x32xf32> to vector<256x32xf32>
    %70 = arith.truncf %69 : vector<256x32xf32> to vector<256x32xbf16>
    %c7 = arith.constant 7 : index
    %c0_62 = arith.constant 0 : index
    %c0_63 = arith.constant 0 : index
    %71 = vector.load %arg4[%c7, %c0_62, %c0_63] : memref<9x32x32xbf16, #tpu.memory_space<vmem>>, vector<1x32x32xbf16>
    %72 = vector.shape_cast %71 : vector<1x32x32xbf16> to vector<32x32xbf16>
    %cst_64 = arith.constant dense<0.000000e+00> : vector<256x32xf32>
    %73 = tpu.matmul %70, %72, %cst_64 {dimension_numbers = #tpu.dot_dimension_numbers<[1], [0], [0], [1], [0, 0, 1, 1], [], []>} : vector<256x32xbf16>, vector<32x32xbf16>, vector<256x32xf32> -> vector<256x32xf32>
    %74 = arith.addf %67, %73 : vector<256x32xf32>
    %c2_65 = arith.constant 2 : index
    %c2_66 = arith.constant 2 : index
    %c0_67 = arith.constant 0 : index
    %75 = vector.load %arg8[%c2_65, %c2_66, %c0_67] : memref<18x18x32xf32, #tpu.memory_space<vmem>>, vector<16x16x32xf32>
    %76 = vector.shape_cast %75 : vector<16x16x32xf32> to vector<256x32xf32>
    %77 = arith.truncf %76 : vector<256x32xf32> to vector<256x32xbf16>
    %c8 = arith.constant 8 : index
    %c0_68 = arith.constant 0 : index
    %c0_69 = arith.constant 0 : index
    %78 = vector.load %arg4[%c8, %c0_68, %c0_69] : memref<9x32x32xbf16, #tpu.memory_space<vmem>>, vector<1x32x32xbf16>
    %79 = vector.shape_cast %78 : vector<1x32x32xbf16> to vector<32x32xbf16>
    %cst_70 = arith.constant dense<0.000000e+00> : vector<256x32xf32>
    %80 = tpu.matmul %77, %79, %cst_70 {dimension_numbers = #tpu.dot_dimension_numbers<[1], [0], [0], [1], [0, 0, 1, 1], [], []>} : vector<256x32xbf16>, vector<32x32xbf16>, vector<256x32xf32> -> vector<256x32xf32>
    %81 = arith.addf %74, %80 : vector<256x32xf32>
    %c0_71 = arith.constant 0 : index
    %c0_72 = arith.constant 0 : index
    %82 = vector.load %arg5[%c0_71, %c0_72] : memref<256x32xf32, #tpu.memory_space<vmem>>, vector<256x32xf32>
    tpu.vector_store %arg5[%c0_71, %c0_72], %81 {strides = array<i32>} : memref<256x32xf32, #tpu.memory_space<vmem>>, vector<256x32xf32>,
    %c0_73 = arith.constant 0 : index
    %c0_74 = arith.constant 0 : index
    %83 = vector.load %arg6[%c0_73, %c0_74] : memref<1x32xf32, #tpu.memory_space<vmem>>, vector<1x32xf32>
    %cst_75 = arith.constant dense<0.000000e+00> : vector<32xf32>
    %84 = vector.multi_reduction <add>, %81, %cst_75 [0] : vector<256x32xf32> to vector<32xf32>
    %85 = vector.shape_cast %84 : vector<32xf32> to vector<1x32xf32>
    %86 = arith.addf %83, %85 : vector<1x32xf32>
    %c0_76 = arith.constant 0 : index
    %c0_77 = arith.constant 0 : index
    %87 = vector.load %arg6[%c0_76, %c0_77] : memref<1x32xf32, #tpu.memory_space<vmem>>, vector<1x32xf32>
    tpu.vector_store %arg6[%c0_76, %c0_77], %86 {strides = array<i32>} : memref<1x32xf32, #tpu.memory_space<vmem>>, vector<1x32xf32>,
    %c0_78 = arith.constant 0 : index
    %c0_79 = arith.constant 0 : index
    %88 = vector.load %arg7[%c0_78, %c0_79] : memref<1x32xf32, #tpu.memory_space<vmem>>, vector<1x32xf32>
    %89 = arith.mulf %81, %81 : vector<256x32xf32>
    %cst_80 = arith.constant dense<0.000000e+00> : vector<32xf32>
    %90 = vector.multi_reduction <add>, %89, %cst_80 [0] : vector<256x32xf32> to vector<32xf32>
    %91 = vector.shape_cast %90 : vector<32xf32> to vector<1x32xf32>
    %92 = arith.addf %88, %91 : vector<1x32xf32>
    %c0_81 = arith.constant 0 : index
    %c0_82 = arith.constant 0 : index
    %93 = vector.load %arg7[%c0_81, %c0_82] : memref<1x32xf32, #tpu.memory_space<vmem>>, vector<1x32xf32>
    tpu.vector_store %arg7[%c0_81, %c0_82], %92 {strides = array<i32>} : memref<1x32xf32, #tpu.memory_space<vmem>>, vector<1x32xf32>,
    return
  }
  func.func @transform_0(%arg0: i32) -> (i32, i32, i32, i32) {
    %c0_i32 = arith.constant 0 : i32
    %c0_i32_0 = arith.constant 0 : i32
    %c0_i32_1 = arith.constant 0 : i32
    %c0_i32_2 = arith.constant 0 : i32
    return %arg0, %c0_i32, %c0_i32_0, %c0_i32_1 : i32, i32, i32, i32
  }
  func.func @transform_1(%arg0: i32) -> (i32, i32) {
    %c0_i32 = arith.constant 0 : i32
    %c0_i32_0 = arith.constant 0 : i32
    %c0_i32_1 = arith.constant 0 : i32
    return %c0_i32, %c0_i32_0 : i32, i32
  }
  func.func @transform_2(%arg0: i32) -> (i32, i32) {
    %c0_i32 = arith.constant 0 : i32
    %c0_i32_0 = arith.constant 0 : i32
    %c0_i32_1 = arith.constant 0 : i32
    return %c0_i32, %c0_i32_0 : i32, i32
  }
  func.func @transform_3(%arg0: i32) -> (i32, i32, i32) {
    %c0_i32 = arith.constant 0 : i32
    %c0_i32_0 = arith.constant 0 : i32
    %c0_i32_1 = arith.constant 0 : i32
    %c0_i32_2 = arith.constant 0 : i32
    return %c0_i32, %c0_i32_0, %c0_i32_1 : i32, i32, i32
  }
  func.func @transform_4(%arg0: i32) -> (i32, i32) {
    %c0_i32 = arith.constant 0 : i32
    %c0_i32_0 = arith.constant 0 : i32
    return %arg0, %c0_i32 : i32, i32
  }
  func.func @transform_5(%arg0: i32) -> (i32, i32) {
    %c0_i32 = arith.constant 0 : i32
    %c0_i32_0 = arith.constant 0 : i32
    %c0_i32_1 = arith.constant 0 : i32
    return %c0_i32, %c0_i32_0 : i32, i32
  }
  func.func @transform_6(%arg0: i32) -> (i32, i32) {
    %c0_i32 = arith.constant 0 : i32
    %c0_i32_0 = arith.constant 0 : i32
    %c0_i32_1 = arith.constant 0 : i32
    return %c0_i32, %c0_i32_0 : i32, i32
  }
}

module attributes {stable_mosaic.version = 11 : i64} {
  func.func @conv3_stats_kernel(%arg0: i32, %arg1: memref<256x32xf32, #tpu.memory_space<vmem>>, %arg2: memref<1x32xf32, #tpu.memory_space<vmem>>, %arg3: memref<1x32xf32, #tpu.memory_space<vmem>>, %arg4: memref<32x64xbf16, #tpu.memory_space<vmem>>, %arg5: memref<256x64xf32, #tpu.memory_space<vmem>>, %arg6: memref<1x64xf32, #tpu.memory_space<vmem>>, %arg7: memref<1x64xf32, #tpu.memory_space<vmem>>) attributes {dimension_semantics = [#tpu.dimension_semantics<arbitrary>], iteration_bounds = array<i64: 2>, scalar_prefetch = 0 : i64, scratch_operands = 0 : i64, tpu.core_type = #tpu.core_type<tc>, window_params = [{transform_indices = @transform_0, window_bounds = array<i64: 256, 32>}, {pipeline_mode = #tpu.pipeline_mode<synchronous>, transform_indices = @transform_1, window_bounds = array<i64: 1, 32>}, {pipeline_mode = #tpu.pipeline_mode<synchronous>, transform_indices = @transform_2, window_bounds = array<i64: 1, 32>}, {pipeline_mode = #tpu.pipeline_mode<synchronous>, transform_indices = @transform_3, window_bounds = array<i64: 32, 64>}, {transform_indices = @transform_4, window_bounds = array<i64: 256, 64>}, {pipeline_mode = #tpu.pipeline_mode<synchronous>, transform_indices = @transform_5, window_bounds = array<i64: 1, 64>}, {pipeline_mode = #tpu.pipeline_mode<synchronous>, transform_indices = @transform_6, window_bounds = array<i64: 1, 64>}]} {
    %c0_i32 = arith.constant 0 : i32
    %0 = arith.cmpi eq, %arg0, %c0_i32 : i32
    %1 = arith.extui %0 : i1 to i32
    %c0_i32_0 = arith.constant 0 : i32
    %2 = arith.cmpi ne, %1, %c0_i32_0 : i32
    scf.if %2 {
      %cst_21 = arith.constant 0.000000e+00 : f32
      %27 = vector.broadcast %cst_21 : f32 to vector<1x64xf32>
      %c0_22 = arith.constant 0 : index
      %c0_23 = arith.constant 0 : index
      %28 = vector.load %arg6[%c0_22, %c0_23] : memref<1x64xf32, #tpu.memory_space<vmem>>, vector<1x64xf32>
      tpu.vector_store %arg6[%c0_22, %c0_23], %27 {strides = array<i32>} : memref<1x64xf32, #tpu.memory_space<vmem>>, vector<1x64xf32>,
      %cst_24 = arith.constant 0.000000e+00 : f32
      %29 = vector.broadcast %cst_24 : f32 to vector<1x64xf32>
      %c0_25 = arith.constant 0 : index
      %c0_26 = arith.constant 0 : index
      %30 = vector.load %arg7[%c0_25, %c0_26] : memref<1x64xf32, #tpu.memory_space<vmem>>, vector<1x64xf32>
      tpu.vector_store %arg7[%c0_25, %c0_26], %29 {strides = array<i32>} : memref<1x64xf32, #tpu.memory_space<vmem>>, vector<1x64xf32>,
    } else {
    }
    %c0 = arith.constant 0 : index
    %c0_1 = arith.constant 0 : index
    %3 = vector.load %arg1[%c0, %c0_1] : memref<256x32xf32, #tpu.memory_space<vmem>>, vector<256x32xf32>
    %c0_2 = arith.constant 0 : index
    %c0_3 = arith.constant 0 : index
    %4 = vector.load %arg2[%c0_2, %c0_3] : memref<1x32xf32, #tpu.memory_space<vmem>>, vector<1x32xf32>
    %5 = vector.broadcast %4 : vector<1x32xf32> to vector<256x32xf32>
    %6 = arith.mulf %3, %5 : vector<256x32xf32>
    %c0_4 = arith.constant 0 : index
    %c0_5 = arith.constant 0 : index
    %7 = vector.load %arg3[%c0_4, %c0_5] : memref<1x32xf32, #tpu.memory_space<vmem>>, vector<1x32xf32>
    %8 = vector.broadcast %7 : vector<1x32xf32> to vector<256x32xf32>
    %9 = arith.addf %6, %8 : vector<256x32xf32>
    %cst = arith.constant 0.000000e+00 : f32
    %10 = vector.broadcast %cst : f32 to vector<256x32xf32>
    %11 = arith.maximumf %9, %10 : vector<256x32xf32>
    %12 = arith.truncf %11 : vector<256x32xf32> to vector<256x32xbf16>
    %c0_6 = arith.constant 0 : index
    %c0_7 = arith.constant 0 : index
    %13 = vector.load %arg4[%c0_6, %c0_7] : memref<32x64xbf16, #tpu.memory_space<vmem>>, vector<32x64xbf16>
    %cst_8 = arith.constant dense<0.000000e+00> : vector<256x64xf32>
    %14 = tpu.matmul %12, %13, %cst_8 {dimension_numbers = #tpu.dot_dimension_numbers<[1], [0], [0], [1], [0, 0, 1, 1], [], []>} : vector<256x32xbf16>, vector<32x64xbf16>, vector<256x64xf32> -> vector<256x64xf32>
    %c0_9 = arith.constant 0 : index
    %c0_10 = arith.constant 0 : index
    %15 = vector.load %arg5[%c0_9, %c0_10] : memref<256x64xf32, #tpu.memory_space<vmem>>, vector<256x64xf32>
    tpu.vector_store %arg5[%c0_9, %c0_10], %14 {strides = array<i32>} : memref<256x64xf32, #tpu.memory_space<vmem>>, vector<256x64xf32>,
    %c0_11 = arith.constant 0 : index
    %c0_12 = arith.constant 0 : index
    %16 = vector.load %arg6[%c0_11, %c0_12] : memref<1x64xf32, #tpu.memory_space<vmem>>, vector<1x64xf32>
    %cst_13 = arith.constant dense<0.000000e+00> : vector<64xf32>
    %17 = vector.multi_reduction <add>, %14, %cst_13 [0] : vector<256x64xf32> to vector<64xf32>
    %18 = vector.shape_cast %17 : vector<64xf32> to vector<1x64xf32>
    %19 = arith.addf %16, %18 : vector<1x64xf32>
    %c0_14 = arith.constant 0 : index
    %c0_15 = arith.constant 0 : index
    %20 = vector.load %arg6[%c0_14, %c0_15] : memref<1x64xf32, #tpu.memory_space<vmem>>, vector<1x64xf32>
    tpu.vector_store %arg6[%c0_14, %c0_15], %19 {strides = array<i32>} : memref<1x64xf32, #tpu.memory_space<vmem>>, vector<1x64xf32>,
    %c0_16 = arith.constant 0 : index
    %c0_17 = arith.constant 0 : index
    %21 = vector.load %arg7[%c0_16, %c0_17] : memref<1x64xf32, #tpu.memory_space<vmem>>, vector<1x64xf32>
    %22 = arith.mulf %14, %14 : vector<256x64xf32>
    %cst_18 = arith.constant dense<0.000000e+00> : vector<64xf32>
    %23 = vector.multi_reduction <add>, %22, %cst_18 [0] : vector<256x64xf32> to vector<64xf32>
    %24 = vector.shape_cast %23 : vector<64xf32> to vector<1x64xf32>
    %25 = arith.addf %21, %24 : vector<1x64xf32>
    %c0_19 = arith.constant 0 : index
    %c0_20 = arith.constant 0 : index
    %26 = vector.load %arg7[%c0_19, %c0_20] : memref<1x64xf32, #tpu.memory_space<vmem>>, vector<1x64xf32>
    tpu.vector_store %arg7[%c0_19, %c0_20], %25 {strides = array<i32>} : memref<1x64xf32, #tpu.memory_space<vmem>>, vector<1x64xf32>,
    return
  }
  func.func @transform_0(%arg0: i32) -> (i32, i32) {
    %c0_i32 = arith.constant 0 : i32
    %c0_i32_0 = arith.constant 0 : i32
    return %arg0, %c0_i32 : i32, i32
  }
  func.func @transform_1(%arg0: i32) -> (i32, i32) {
    %c0_i32 = arith.constant 0 : i32
    %c0_i32_0 = arith.constant 0 : i32
    %c0_i32_1 = arith.constant 0 : i32
    return %c0_i32, %c0_i32_0 : i32, i32
  }
  func.func @transform_2(%arg0: i32) -> (i32, i32) {
    %c0_i32 = arith.constant 0 : i32
    %c0_i32_0 = arith.constant 0 : i32
    %c0_i32_1 = arith.constant 0 : i32
    return %c0_i32, %c0_i32_0 : i32, i32
  }
  func.func @transform_3(%arg0: i32) -> (i32, i32) {
    %c0_i32 = arith.constant 0 : i32
    %c0_i32_0 = arith.constant 0 : i32
    %c0_i32_1 = arith.constant 0 : i32
    return %c0_i32, %c0_i32_0 : i32, i32
  }
  func.func @transform_4(%arg0: i32) -> (i32, i32) {
    %c0_i32 = arith.constant 0 : i32
    %c0_i32_0 = arith.constant 0 : i32
    return %arg0, %c0_i32 : i32, i32
  }
  func.func @transform_5(%arg0: i32) -> (i32, i32) {
    %c0_i32 = arith.constant 0 : i32
    %c0_i32_0 = arith.constant 0 : i32
    %c0_i32_1 = arith.constant 0 : i32
    return %c0_i32, %c0_i32_0 : i32, i32
  }
  func.func @transform_6(%arg0: i32) -> (i32, i32) {
    %c0_i32 = arith.constant 0 : i32
    %c0_i32_0 = arith.constant 0 : i32
    %c0_i32_1 = arith.constant 0 : i32
    return %c0_i32, %c0_i32_0 : i32, i32
  }
}

module attributes {stable_mosaic.version = 11 : i64} {
  func.func @bn3_residual_relu_kernel(%arg0: i32, %arg1: memref<256x64xf32, #tpu.memory_space<vmem>>, %arg2: memref<1x64xf32, #tpu.memory_space<vmem>>, %arg3: memref<1x64xf32, #tpu.memory_space<vmem>>, %arg4: memref<256x64xf32, #tpu.memory_space<vmem>>, %arg5: memref<256x64xf32, #tpu.memory_space<vmem>>) attributes {dimension_semantics = [#tpu.dimension_semantics<parallel>], iteration_bounds = array<i64: 2>, scalar_prefetch = 0 : i64, scratch_operands = 0 : i64, tpu.core_type = #tpu.core_type<tc>, window_params = [{transform_indices = @transform_0, window_bounds = array<i64: 256, 64>}, {pipeline_mode = #tpu.pipeline_mode<synchronous>, transform_indices = @transform_1, window_bounds = array<i64: 1, 64>}, {pipeline_mode = #tpu.pipeline_mode<synchronous>, transform_indices = @transform_2, window_bounds = array<i64: 1, 64>}, {transform_indices = @transform_3, window_bounds = array<i64: 256, 64>}, {transform_indices = @transform_4, window_bounds = array<i64: 256, 64>}]} {
    %c0 = arith.constant 0 : index
    %c0_0 = arith.constant 0 : index
    %0 = vector.load %arg1[%c0, %c0_0] : memref<256x64xf32, #tpu.memory_space<vmem>>, vector<256x64xf32>
    %c0_1 = arith.constant 0 : index
    %c0_2 = arith.constant 0 : index
    %1 = vector.load %arg2[%c0_1, %c0_2] : memref<1x64xf32, #tpu.memory_space<vmem>>, vector<1x64xf32>
    %2 = vector.broadcast %1 : vector<1x64xf32> to vector<256x64xf32>
    %3 = arith.mulf %0, %2 : vector<256x64xf32>
    %c0_3 = arith.constant 0 : index
    %c0_4 = arith.constant 0 : index
    %4 = vector.load %arg3[%c0_3, %c0_4] : memref<1x64xf32, #tpu.memory_space<vmem>>, vector<1x64xf32>
    %5 = vector.broadcast %4 : vector<1x64xf32> to vector<256x64xf32>
    %6 = arith.addf %3, %5 : vector<256x64xf32>
    %c0_5 = arith.constant 0 : index
    %c0_6 = arith.constant 0 : index
    %7 = vector.load %arg4[%c0_5, %c0_6] : memref<256x64xf32, #tpu.memory_space<vmem>>, vector<256x64xf32>
    %8 = arith.addf %6, %7 : vector<256x64xf32>
    %cst = arith.constant 0.000000e+00 : f32
    %9 = vector.broadcast %cst : f32 to vector<256x64xf32>
    %10 = arith.maximumf %8, %9 : vector<256x64xf32>
    %c0_7 = arith.constant 0 : index
    %c0_8 = arith.constant 0 : index
    %11 = vector.load %arg5[%c0_7, %c0_8] : memref<256x64xf32, #tpu.memory_space<vmem>>, vector<256x64xf32>
    tpu.vector_store %arg5[%c0_7, %c0_8], %10 {strides = array<i32>} : memref<256x64xf32, #tpu.memory_space<vmem>>, vector<256x64xf32>,
    return
  }
  func.func @transform_0(%arg0: i32) -> (i32, i32) {
    %c0_i32 = arith.constant 0 : i32
    %c0_i32_0 = arith.constant 0 : i32
    return %arg0, %c0_i32 : i32, i32
  }
  func.func @transform_1(%arg0: i32) -> (i32, i32) {
    %c0_i32 = arith.constant 0 : i32
    %c0_i32_0 = arith.constant 0 : i32
    %c0_i32_1 = arith.constant 0 : i32
    return %c0_i32, %c0_i32_0 : i32, i32
  }
  func.func @transform_2(%arg0: i32) -> (i32, i32) {
    %c0_i32 = arith.constant 0 : i32
    %c0_i32_0 = arith.constant 0 : i32
    %c0_i32_1 = arith.constant 0 : i32
    return %c0_i32, %c0_i32_0 : i32, i32
  }
  func.func @transform_3(%arg0: i32) -> (i32, i32) {
    %c0_i32 = arith.constant 0 : i32
    %c0_i32_0 = arith.constant 0 : i32
    return %arg0, %c0_i32 : i32, i32
  }
  func.func @transform_4(%arg0: i32) -> (i32, i32) {
    %c0_i32 = arith.constant 0 : i32
    %c0_i32_0 = arith.constant 0 : i32
    return %arg0, %c0_i32 : i32, i32
  }
}

</mosaic_0001>

<bundles_post_ra>
// kernel: bottleneck_forward.7
= control target key start
LH: loop header
LB: loop body
LE: loop exit
PB: predicated region body
PF: predicated region fallthrough
CT: control target
= control target key end

     0   :  { %9 = vsyncpa [#allocation3], 0  ;;  %s1016_s0 = inlined_call_operand.vmem [shape: f32[512,64], index: 0, kind: input, shape index: {}]   ;;  %s1017_s1 = inlined_call_operand.vmem [shape: f32[1,64], index: 1, kind: input, shape index: {}]   ;;  %s1018_s2 = inlined_call_operand.vmem [shape: f32[1,64], index: 2, kind: input, shape index: {}]   ;;  %s1019_s3 = inlined_call_operand.vmem [shape: f32[512,64], index: 3, kind: input, shape index: {}]   ;;  %s1020_s4 = inlined_call_operand.hbm [shape: f32[512,64], index: 4, kind: output, shape index: {}]  }
   0x1   :  { %11 = vsyncpa [#allocation3 + $0x1], 0  ;;  %s696_s15 = smov 0   ;;  %s698_s16 = smov 0  }
   0x2   :  { %s700_s17 = smov 0   ;;  %s702_s18 = smov 0  }
   0x3 LB: > { %s717_s19 = sadd.s32 4294967295, %s666_s18   ;;  %s548_s20 = sadd.s32 4294967294, %s666_s18   ;;  %s666_s18 = sphi %s702_s18, %s1026_s18   ;;  %s662_s17 = sphi %s700_s17, %s1025_s17   ;;  %s658_s16 = sphi %s698_s16, %s1024_s16   ;;  %s654_s15 = sphi %s696_s15, %s1023_s15  }
   0x4   : > { %s721_s21 = sadd.s32 1, %s666_s18   ;;  %s118_s22 = sadd.s32 1, %s662_s17 }
   0x5   : > { %s115_s23 = ssub.s32 %s666_s18, %s721_s21  ;;  %p128_p0 = scmp.ne.s32.totalorder %s662_s17, %s658_s16 }
   0x6   : > { %p116_p1 = scmp.eq.s32.totalorder %s115_s23, 0  ;;  %p129_p2 = scmp.eq.s32.totalorder %s717_s19, 1 }
   0x7   : > { %p134_p3 = scmp.ne.s32.totalorder %s658_s16, %s654_s15  ;;  %p135_p4 = scmp.eq.s32.totalorder %s548_s20, 1 }
   0x8   : > { %s732_s24 = scalar_select %p116_p1, %s662_s17, %s118_s22  }
   0x9   : > { %p734_p5 = por %p129_p2, %p128_p0  ;;  %p738_p6 = por %p135_p4, %p134_p3 }
   0xa   : > { %p551_p7 = scmp.ge.s32.totalorder %s666_s18, 1  ;;  %p177_p8 = scmp.lt.s32.totalorder %s666_s18, 3 }
   0xc   : > { %p178_p9 = pnand %p551_p7, %p177_p8 }
   0xd   : > { %s553_s27 = sshll.u32 (!%p178_p9), %s717_s19, 5  ;;  %s205_s11 = sand.u32 (!%p178_p9), 1, %s658_s16  }
   0xe   : > { %181 = sbr.rel (%p178_p9) target bundleno = 74 (0x4a), region = 36  ;;  %p209_p10 = scmp.lt.s32.totalorder (!%p178_p9), %s553_s27, 63 }
   0xf   : > { %s778_s14 = sshll.u32 (!%p178_p9), %s205_s11, 8  ;;  %s564_s22 = sshll.u32 (!%p178_p9), %s717_s19, 12 }
  0x10   : > { %s808_s20 = scalar_lea.vmem (!%p178_p9), [#allocation2], %s778_s14  ;;  %s976_s29 = scalar_lea.sflag (!%p178_p9), [#allocation3], %s205_s11 }
  0x11   : > { %s474_s23 = sshll.u32 (!%p178_p9), %s808_s20, 4  ;;  %s668_s5 = smov (!%p178_p9), [#allocation2]   ;;  %s966_s23 = int_to_ptr.vmem [resolvable:$true] %s474_s23 }
  0x12   : > { %s606_s30 = scalar_lea.vmem (!%p178_p9), %s966_s23, 4096  ;;  %s610_s6 = sshll.u32 (!%p178_p9), %s668_s5, 4  ;;  %s611_s6 = int_to_ptr.vmem [resolvable:$false] %s610_s6 }
  0x13   : > { %s1028_s27 = smov (!%p209_p10, %s553_s27), 63  ;;  %v748_v0 = vld [vmem:[%s1017_s1] ss:$0 sm:$0xff]  ;;  %vm427_vm0 = vcmask 523264   ;;  %p607_p11 = scmp.ne.s32.totalorder %s966_s23, %s606_s30 }
  0x14   : > { %s554_s28 = sshll.u32 %s1028_s27, 3  ;;  %v765_v2 = vld [vmem:[%s1018_s2] ss:$0 sm:$0xff]  ;;  %p613_p0 = scmp.lt.s32.totalorder %s966_s23, %s611_s6 }
  0x15   : > { %s753_s7 = scalar_lea.vmem %s1016_s0, %s554_s28  ;;  %s758_s10 = scalar_lea.vmem %s1019_s3, %s554_s28 }
  0x16   : > { %v221_v1 = vld [vmem:[%s753_s7] sm:$0xff]  ;;  %v222_v3 = vld [vmem:[%s753_s7 + $0x8] sm:$0xff]  ;;  %v223_v7 = vld [vmem:[%s753_s7 + $0x10] sm:$0xff]  ;;  %s964_s28 = scalar_lea.hbm %s1020_s4, %s564_s22  ;;  %p608_p12 = pnand %p607_p11, %p734_p5 }
  0x17   : > { %v260_v4 = vmul.f32 %v748_v0, %v221_v1  ;;  %v331_v5 = vld [vmem:[%s758_s10] sm:$0xff]  ;;  %v261_v6 = vmul.f32 %v748_v0, %v222_v3  ;;  %v332_v8 = vld [vmem:[%s758_s10 + $0x8] sm:$0xff]  ;;  %v262_v9 = vmul.f32 %v748_v0, %v223_v7  ;;  %v224_v10 = vld [vmem:[%s753_s7 + $0x18] sm:$0xff] }
  0x18   : > { %v225_v11 = vld [vmem:[%s753_s7 + $0x20] sm:$0xff]  ;;  %v333_v14 = vld [vmem:[%s758_s10 + $0x10] sm:$0xff]  ;;  %v263_v15 = vmul.f32 %v748_v0, %v224_v10  ;;  %v334_v16 = vld [vmem:[%s758_s10 + $0x18] sm:$0xff]  ;;  %p609_p13 = pneg %p608_p12 }
  0x19   : > { %v299_v12 = vadd.f32 %v765_v2, %v260_v4  ;;  %v300_v13 = vadd.f32 %v765_v2, %v261_v6  ;;  %v264_v17 = vmul.f32 %v748_v0, %v225_v11  ;;  %v226_v18 = vld [vmem:[%s753_s7 + $0x28] sm:$0xff]  ;;  %v301_v19 = vadd.f32 %v765_v2, %v262_v9  ;;  %v335_v20 = vld [vmem:[%s758_s10 + $0x20] sm:$0xff]  ;;  %v227_v22 = vld [vmem:[%s753_s7 + $0x30] sm:$0xff] }
  0x1a   : > { %v265_v21 = vmul.f32 %v748_v0, %v226_v18  ;;  %v228_v23 = vld [vmem:[%s753_s7 + $0x38] sm:$0xff]  ;;  %v302_v26 = vadd.f32 %v765_v2, %v263_v15  ;;  %v336_v28 = vld [vmem:[%s758_s10 + $0x28] sm:$0xff]  ;;  %v266_v31 = vmul.f32 %v748_v0, %v227_v22  ;;  %v229_v33 = vld [vmem:[%s753_s7 + $0x40] sm:$0xff] }
  0x1b   : > { %v363_v24 = vadd.f32 %v331_v5, %v299_v12  ;;  %v364_v25 = vadd.f32 %v332_v8, %v300_v13  ;;  %v303_v27 = vadd.f32 %v765_v2, %v264_v17  ;;  %v365_v29 = vadd.f32 %v333_v14, %v301_v19  ;;  %v230_v34 = vld [vmem:[%s753_s7 + $0x48] sm:$0xff]  ;;  %v337_v39 = vld [vmem:[%s758_s10 + $0x30] sm:$0xff]  ;;  %v338_v40 = vld [vmem:[%s758_s10 + $0x38] sm:$0xff] }
  0x1c   : > { %v304_v30 = vadd.f32 %v765_v2, %v265_v21  ;;  %v267_v32 = vmul.f32 %v748_v0, %v228_v23  ;;  %v366_v37 = vadd.f32 %v334_v16, %v302_v26  ;;  %v231_v41 = vld [vmem:[%s753_s7 + $0x50] sm:$0xff]  ;;  %v305_v44 = vadd.f32 %v765_v2, %v266_v31  ;;  %v232_v46 = vld [vmem:[%s753_s7 + $0x58] sm:$0xff]  ;;  %v233_v47 = vld [vmem:[%s753_s7 + $0x60] sm:$0xff] }
  0x1d   : > { %v395_v35 = vmax.f32 %v363_v24, 0.0  ;;  %v396_v36 = vmax.f32 %v364_v25, 0.0  ;;  %v367_v38 = vadd.f32 %v335_v20, %v303_v27  ;;  %v397_v42 = vmax.f32 %v365_v29, 0.0  ;;  %v234_v52 = vld [vmem:[%s753_s7 + $0x68] sm:$0xff]  ;;  %v339_v56 = vld [vmem:[%s758_s10 + $0x40] sm:$0xff]  ;;  %v341_v61 = vld [vmem:[%s758_s10 + $0x50] sm:$0xff] }
  0x1e   : > { %v368_v43 = vadd.f32 %v336_v28, %v304_v30  ;;  %v306_v45 = vadd.f32 %v765_v2, %v267_v32  ;;  %v398_v48 = vmax.f32 %v366_v37, 0.0  ;;  %v268_v50 = vmul.f32 %v748_v0, %v229_v33  ;;  %v340_v57 = vld [vmem:[%s758_s10 + $0x48] sm:$0xff]  ;;  %v235_v1 = vld [vmem:[%s753_s7 + $0x70] sm:$0xff]  ;;  %v236_v3 = vld [vmem:[%s753_s7 + $0x78] sm:$0xff] }
  0x1f   : > { %428 = vst.msk [vmem:[%s808_s20] sm:$0xff] %vm427_vm0, %v395_v35  ;;  %429 = vst.msk [vmem:[%s808_s20 + $0x8] sm:$0xff] %vm427_vm0, %v396_v36  ;;  %v399_v49 = vmax.f32 %v367_v38, 0.0  ;;  %v269_v51 = vmul.f32 %v748_v0, %v230_v34  ;;  %v369_v54 = vadd.f32 %v337_v39, %v305_v44  ;;  %v270_v58 = vmul.f32 %v748_v0, %v231_v41  ;;  %v342_v7 = vld [vmem:[%s758_s10 + $0x58] sm:$0xff]  ;;  %v343_v8 = vld [vmem:[%s758_s10 + $0x60] sm:$0xff] }
  0x20   : > { %430 = vst.msk [vmem:[%s808_s20 + $0x10] sm:$0xff] %vm427_vm0, %v397_v42  ;;  %v400_v53 = vmax.f32 %v368_v43, 0.0  ;;  %v370_v55 = vadd.f32 %v338_v40, %v306_v45  ;;  %431 = vst.msk [vmem:[%s808_s20 + $0x18] sm:$0xff] %vm427_vm0, %v398_v48  ;;  %v307_v59 = vadd.f32 %v765_v2, %v268_v50  ;;  %v271_v62 = vmul.f32 %v748_v0, %v232_v46  ;;  %v344_v14 = vld [vmem:[%s758_s10 + $0x68] sm:$0xff]  ;;  %v237_v19 = vld [vmem:[%s753_s7 + $0x80] sm:$0xff] }
  0x21   : > { %432 = vst.msk [vmem:[%s808_s20 + $0x20] sm:$0xff] %vm427_vm0, %v399_v49  ;;  %v308_v60 = vadd.f32 %v765_v2, %v269_v51  ;;  %v272_v63 = vmul.f32 %v748_v0, %v233_v47  ;;  %v401_v4 = vmax.f32 %v369_v54, 0.0  ;;  %v309_v6 = vadd.f32 %v765_v2, %v270_v58  ;;  %v238_v20 = vld [vmem:[%s753_s7 + $0x88] sm:$0xff]  ;;  %v345_v25 = vld [vmem:[%s758_s10 + $0x70] sm:$0xff]  ;;  %v346_v26 = vld [vmem:[%s758_s10 + $0x78] sm:$0xff] }
  0x22   : > { %433 = vst.msk [vmem:[%s808_s20 + $0x28] sm:$0xff] %vm427_vm0, %v400_v53  ;;  %v402_v5 = vmax.f32 %v370_v55, 0.0  ;;  %v273_v9 = vmul.f32 %v748_v0, %v234_v52  ;;  %v371_v10 = vadd.f32 %v339_v56, %v307_v59  ;;  %v310_v12 = vadd.f32 %v765_v2, %v271_v62  ;;  %v239_v27 = vld [vmem:[%s753_s7 + $0x90] sm:$0xff]  ;;  %v240_v32 = vld [vmem:[%s753_s7 + $0x98] sm:$0xff]  ;;  %v241_v33 = vld [vmem:[%s753_s7 + $0xa0] sm:$0xff] }
  0x23   : > { %v372_v11 = vadd.f32 %v340_v57, %v308_v60  ;;  %v311_v13 = vadd.f32 %v765_v2, %v272_v63  ;;  %434 = vst.msk [vmem:[%s808_s20 + $0x30] sm:$0xff] %vm427_vm0, %v401_v4  ;;  %v373_v15 = vadd.f32 %v341_v61, %v309_v6  ;;  %v274_v17 = vmul.f32 %v748_v0, %v235_v1  ;;  %v242_v38 = vld [vmem:[%s753_s7 + $0xa8] sm:$0xff]  ;;  %v347_v42 = vld [vmem:[%s758_s10 + $0x80] sm:$0xff]  ;;  %v349_v47 = vld [vmem:[%s758_s10 + $0x90] sm:$0xff] }
  0x24   : > { %435 = vst.msk [vmem:[%s808_s20 + $0x38] sm:$0xff] %vm427_vm0, %v402_v5  ;;  %v312_v16 = vadd.f32 %v765_v2, %v273_v9  ;;  %v275_v18 = vmul.f32 %v748_v0, %v236_v3  ;;  %v403_v21 = vmax.f32 %v371_v10, 0.0  ;;  %v374_v23 = vadd.f32 %v342_v7, %v310_v12  ;;  %v348_v43 = vld [vmem:[%s758_s10 + $0x88] sm:$0xff]  ;;  %v243_v50 = vld [vmem:[%s753_s7 + $0xb0] sm:$0xff]  ;;  %v244_v51 = vld [vmem:[%s753_s7 + $0xb8] sm:$0xff] }
  0x25   : > { %v404_v22 = vmax.f32 %v372_v11, 0.0  ;;  %v375_v24 = vadd.f32 %v343_v8, %v311_v13  ;;  %v405_v28 = vmax.f32 %v373_v15, 0.0  ;;  %v313_v30 = vadd.f32 %v765_v2, %v274_v17  ;;  %v350_v55 = vld [vmem:[%s758_s10 + $0x98] sm:$0xff]  ;;  %v351_v56 = vld [vmem:[%s758_s10 + $0xa0] sm:$0xff]  ;;  %v352_v62 = vld [vmem:[%s758_s10 + $0xa8] sm:$0xff] }
  0x26   : > { %v376_v29 = vadd.f32 %v344_v14, %v312_v16  ;;  %v314_v31 = vadd.f32 %v765_v2, %v275_v18  ;;  %436 = vst.msk [vmem:[%s808_s20 + $0x40] sm:$0xff] %vm427_vm0, %v403_v21  ;;  %v406_v34 = vmax.f32 %v374_v23, 0.0  ;;  %v276_v36 = vmul.f32 %v748_v0, %v237_v19  ;;  %v245_v5 = vld [vmem:[%s753_s7 + $0xc0] sm:$0xff]  ;;  %v246_v6 = vld [vmem:[%s753_s7 + $0xc8] sm:$0xff]  ;;  %v353_v11 = vld [vmem:[%s758_s10 + $0xb0] sm:$0xff] }
  0x27   : > { %437 = vst.msk [vmem:[%s808_s20 + $0x48] sm:$0xff] %vm427_vm0, %v404_v22  ;;  %v407_v35 = vmax.f32 %v375_v24, 0.0  ;;  %v277_v37 = vmul.f32 %v748_v0, %v238_v20  ;;  %438 = vst.msk [vmem:[%s808_s20 + $0x50] sm:$0xff] %vm427_vm0, %v405_v28  ;;  %v377_v40 = vadd.f32 %v345_v25, %v313_v30  ;;  %v278_v44 = vmul.f32 %v748_v0, %v239_v27  ;;  %v354_v12 = vld [vmem:[%s758_s10 + $0xb8] sm:$0xff]  ;;  %v247_v13 = vld [vmem:[%s753_s7 + $0xd0] sm:$0xff] }
  0x28   : > { %v408_v39 = vmax.f32 %v376_v29, 0.0  ;;  %v378_v41 = vadd.f32 %v346_v26, %v314_v31  ;;  %439 = vst.msk [vmem:[%s808_s20 + $0x58] sm:$0xff] %vm427_vm0, %v406_v34  ;;  %v315_v45 = vadd.f32 %v765_v2, %v276_v36  ;;  %v279_v48 = vmul.f32 %v748_v0, %v240_v32  ;;  %v248_v18 = vld [vmem:[%s753_s7 + $0xd8] sm:$0xff]  ;;  %v249_v19 = vld [vmem:[%s753_s7 + $0xe0] sm:$0xff]  ;;  %v250_v24 = vld [vmem:[%s753_s7 + $0xe8] sm:$0xff] }
  0x29   : > { %440 = vst.msk [vmem:[%s808_s20 + $0x60] sm:$0xff] %vm427_vm0, %v407_v35  ;;  %v316_v46 = vadd.f32 %v765_v2, %v277_v37  ;;  %v280_v49 = vmul.f32 %v748_v0, %v241_v33  ;;  %v409_v52 = vmax.f32 %v377_v40, 0.0  ;;  %v317_v54 = vadd.f32 %v765_v2, %v278_v44  ;;  %v355_v28 = vld [vmem:[%s758_s10 + $0xc0] sm:$0xff]  ;;  %v356_v29 = vld [vmem:[%s758_s10 + $0xc8] sm:$0xff]  ;;  %v357_v33 = vld [vmem:[%s758_s10 + $0xd0] sm:$0xff] }
  0x2a   : > { %441 = vst.msk [vmem:[%s808_s20 + $0x68] sm:$0xff] %vm427_vm0, %v408_v39  ;;  %v410_v53 = vmax.f32 %v378_v41, 0.0  ;;  %v281_v57 = vmul.f32 %v748_v0, %v242_v38  ;;  %v379_v58 = vadd.f32 %v347_v42, %v315_v45  ;;  %v318_v60 = vadd.f32 %v765_v2, %v279_v48  ;;  %v251_v36 = vld [vmem:[%s753_s7 + $0xf0] sm:$0xff]  ;;  %v252_v37 = vld [vmem:[%s753_s7 + $0xf8] sm:$0xff]  ;;  %v359_v42 = vld [vmem:[%s758_s10 + $0xe0] sm:$0xff]  ;;  %s612_s7 = scalar_lea.vmem %s611_s6, 8192 }
  0x2b   : > { %v380_v59 = vadd.f32 %v348_v43, %v316_v46  ;;  %v319_v61 = vadd.f32 %v765_v2, %v280_v49  ;;  %442 = vst.msk [vmem:[%s808_s20 + $0x70] sm:$0xff] %vm427_vm0, %v409_v52  ;;  %v381_v63 = vadd.f32 %v349_v47, %v317_v54  ;;  %v282_v3 = vmul.f32 %v748_v0, %v243_v50  ;;  %v358_v41 = vld [vmem:[%s758_s10 + $0xd8] sm:$0xff]  ;;  %v360_v48 = vld [vmem:[%s758_s10 + $0xe8] sm:$0xff]  ;;  %p614_p1 = scmp.lt.s32.totalorder %s612_s7, %s606_s30 }
  0x2c   : > { %443 = vst.msk [vmem:[%s808_s20 + $0x78] sm:$0xff] %vm427_vm0, %v410_v53  ;;  %v320_v1 = vadd.f32 %v765_v2, %v281_v57  ;;  %v283_v4 = vmul.f32 %v748_v0, %v244_v51  ;;  %v411_v7 = vmax.f32 %v379_v58, 0.0  ;;  %v382_v9 = vadd.f32 %v350_v55, %v318_v60  ;;  %v361_v57 = vld [vmem:[%s758_s10 + $0xf0] sm:$0xff]  ;;  %v362_v58 = vld [vmem:[%s758_s10 + $0xf8] sm:$0xff] }
  0x2d   : > { %v412_v8 = vmax.f32 %v380_v59, 0.0  ;;  %v383_v10 = vadd.f32 %v351_v56, %v319_v61  ;;  %v413_v14 = vmax.f32 %v381_v63, 0.0  ;;  %v321_v16 = vadd.f32 %v765_v2, %v282_v3  ;;  %p615_p2 = por %p614_p1, %p613_p0 }
  0x2e   : > { %v384_v15 = vadd.f32 %v352_v62, %v320_v1  ;;  %v322_v17 = vadd.f32 %v765_v2, %v283_v4  ;;  %444 = vst.msk [vmem:[%s808_s20 + $0x80] sm:$0xff] %vm427_vm0, %v411_v7  ;;  %v414_v20 = vmax.f32 %v382_v9, 0.0  ;;  %v284_v22 = vmul.f32 %v748_v0, %v245_v5 }
  0x2f   : > { %445 = vst.msk [vmem:[%s808_s20 + $0x88] sm:$0xff] %vm427_vm0, %v412_v8  ;;  %v415_v21 = vmax.f32 %v383_v10, 0.0  ;;  %v285_v23 = vmul.f32 %v748_v0, %v246_v6  ;;  %446 = vst.msk [vmem:[%s808_s20 + $0x90] sm:$0xff] %vm427_vm0, %v413_v14  ;;  %v385_v26 = vadd.f32 %v353_v11, %v321_v16  ;;  %v286_v30 = vmul.f32 %v748_v0, %v247_v13  ;;  %p616_p3 = pnand %p615_p2, %p609_p13 }
  0x30   : > { %v416_v25 = vmax.f32 %v384_v15, 0.0  ;;  %v386_v27 = vadd.f32 %v354_v12, %v322_v17  ;;  %447 = vst.msk [vmem:[%s808_s20 + $0x98] sm:$0xff] %vm427_vm0, %v414_v20  ;;  %v323_v31 = vadd.f32 %v765_v2, %v284_v22  ;;  %v287_v34 = vmul.f32 %v748_v0, %v248_v18 }
  0x31   : > { %448 = vst.msk [vmem:[%s808_s20 + $0xa0] sm:$0xff] %vm427_vm0, %v415_v21  ;;  %v324_v32 = vadd.f32 %v765_v2, %v285_v23  ;;  %v288_v35 = vmul.f32 %v748_v0, %v249_v19  ;;  %v417_v38 = vmax.f32 %v385_v26, 0.0  ;;  %v325_v40 = vadd.f32 %v765_v2, %v286_v30 }
  0x32   : > { %449 = vst.msk [vmem:[%s808_s20 + $0xa8] sm:$0xff] %vm427_vm0, %v416_v25  ;;  %v418_v39 = vmax.f32 %v386_v27, 0.0  ;;  %v289_v43 = vmul.f32 %v748_v0, %v250_v24  ;;  %v387_v44 = vadd.f32 %v355_v28, %v323_v31  ;;  %v326_v46 = vadd.f32 %v765_v2, %v287_v34 }
  0x33   : > { %v388_v45 = vadd.f32 %v356_v29, %v324_v32  ;;  %v327_v47 = vadd.f32 %v765_v2, %v288_v35  ;;  %450 = vst.msk [vmem:[%s808_s20 + $0xb0] sm:$0xff] %vm427_vm0, %v417_v38  ;;  %v389_v49 = vadd.f32 %v357_v33, %v325_v40  ;;  %v290_v51 = vmul.f32 %v748_v0, %v251_v36 }
  0x34   : > { %451 = vst.msk [vmem:[%s808_s20 + $0xb8] sm:$0xff] %vm427_vm0, %v418_v39  ;;  %v328_v50 = vadd.f32 %v765_v2, %v289_v43  ;;  %v291_v52 = vmul.f32 %v748_v0, %v252_v37  ;;  %v419_v53 = vmax.f32 %v387_v44, 0.0  ;;  %v390_v55 = vadd.f32 %v358_v41, %v326_v46 }
  0x35   : > { %v420_v54 = vmax.f32 %v388_v45, 0.0  ;;  %v391_v56 = vadd.f32 %v359_v42, %v327_v47  ;;  %v421_v59 = vmax.f32 %v389_v49, 0.0  ;;  %v329_v61 = vadd.f32 %v765_v2, %v290_v51 }
  0x36   : > { %v392_v60 = vadd.f32 %v360_v48, %v328_v50  ;;  %v330_v62 = vadd.f32 %v765_v2, %v291_v52  ;;  %452 = vst.msk [vmem:[%s808_s20 + $0xc0] sm:$0xff] %vm427_vm0, %v419_v53  ;;  %v422_v0 = vmax.f32 %v390_v55, 0.0 }
  0x37   : > { %453 = vst.msk [vmem:[%s808_s20 + $0xc8] sm:$0xff] %vm427_vm0, %v420_v54  ;;  %v423_v63 = vmax.f32 %v391_v56, 0.0  ;;  %454 = vst.msk [vmem:[%s808_s20 + $0xd0] sm:$0xff] %vm427_vm0, %v421_v59  ;;  %v393_v3 = vadd.f32 %v361_v57, %v329_v61 }
  0x38   : > { %v424_v1 = vmax.f32 %v392_v60, 0.0  ;;  %v394_v4 = vadd.f32 %v362_v58, %v330_v62  ;;  %455 = vst.msk [vmem:[%s808_s20 + $0xd8] sm:$0xff] %vm427_vm0, %v422_v0 }
  0x39   : > { %456 = vst.msk [vmem:[%s808_s20 + $0xe0] sm:$0xff] %vm427_vm0, %v423_v63  ;;  %v425_v2 = vmax.f32 %v393_v3, 0.0 }
  0x3a   : > { %457 = vst.msk [vmem:[%s808_s20 + $0xe8] sm:$0xff] %vm427_vm0, %v424_v1  ;;  %v426_v5 = vmax.f32 %v394_v4, 0.0 }
  0x3b   : > { %458 = vst.msk [vmem:[%s808_s20 + $0xf0] sm:$0xff] %vm427_vm0, %v425_v2 }
  0x3c   : > { %459 = vst.msk [vmem:[%s808_s20 + $0xf8] sm:$0xff] %vm427_vm0, %v426_v5 }
  0x3d   : > { %619 = shalt.err (!%p616_p3)
}
  0x3e   : > { %s620_s8 = scalar_lea.hbm %s964_s28, 4096  ;;  %s624_s11 = scalar_lea.hbm %s1020_s4, 8192 }
  0x3f   : > { %p621_p4 = scmp.ne.s32.totalorder %s964_s28, %s620_s8  ;;  %p625_p9 = scmp.lt.s32.totalorder %s964_s28, %s1020_s4 }
  0x40   : > { %p626_p10 = scmp.lt.s32.totalorder %s624_s11, %s620_s8 }
  0x41   : > { %p622_p7 = pnand %p621_p4, %p734_p5 }
  0x42   : > { %p627_p11 = por %p626_p10, %p625_p9 }
  0x43   : > { %p623_p8 = pneg %p622_p7 }
  0x45   : > { %p628_p12 = pnand %p627_p11, %p623_p8 }
  0x47   : > { %631 = shalt.err (!%p628_p12)
}
  0x48   : > { %s669_s14 = smov 128   ;;  %s670_s20 = smov 8  }
  0x49   : > { %565 = dma.vmem_to_hbm [thread:$0]  (%p734_p5), %s966_s23, 4096, %s964_s28, %s976_s29, %s669_s14, %s669_s14, %s670_s20  }
  0x4a PF: > { %p571_p13 = scmp.ge.s32.totalorder %s666_s18, 2  ;;  %s489_s22 = sand.u32 1, %s654_s15  }
  0x4b   : > { %s490_s19 = scalar_lea.sflag [#allocation3], %s489_s22 }
  0x4c   : > { %p568_p0 = pnand %p571_p13, %p738_p6 }
  0x4e   : > { %p569_p1 = pneg %p568_p0 }
  0x50   : > { %649 = dma.done.wait (%p569_p1), %s490_s19, 4096  }
  0x51   : > { %651 = vsyncadd (%p569_p1), %s490_s19, 4294963200  ;;  %p14_p2 = scmp.ge.s32.totalorder %s721_s21, 4   ;;  %s1023_s15 = smov %s658_s16 }
  0x52   : > { %s1024_s16 = smov %s662_s17  ;;  %s1025_s17 = smov %s732_s24 }
  0x53   : > { %s1026_s18 = smov %s721_s21  ;;  %16 = sbr.rel (!%p14_p2) target bundleno = 3 (0x3), region = 74 }
  0x58   :  { %495 = vsyncpa [#allocation3], 1 }
  0x59   :  { %497 = vsyncpa [#allocation3 + $0x1], 1 }

// kernel: bottleneck_forward.4
= control target key start
LH: loop header
LB: loop body
LE: loop exit
PB: predicated region body
PF: predicated region fallthrough
CT: control target
= control target key end

     0   :  { %10 = vsyncpa [#allocation3], 0  ;;  %s1451_s0 = inlined_call_operand.hbm [shape: f32[512,64], index: 0, kind: input, shape index: {}]   ;;  %s1452_s1 = inlined_call_operand.vmem [shape: bf16[64,32], index: 1, kind: input, shape index: {}]   ;;  %s1453_s2 = inlined_call_operand.vmem [shape: f32[512,32], index: 2, kind: output, shape index: {0}]   ;;  %s1454_s3 = inlined_call_operand.vmem [shape: f32[1,32], index: 3, kind: output, shape index: {1}]   ;;  %s1455_s4 = inlined_call_operand.vmem [shape: f32[1,32], index: 4, kind: output, shape index: {2}]  }
   0x1   :  { %12 = vsyncpa [#allocation3 + $0x1], 0  ;;  %s1044_s15 = smov 0   ;;  %s1046_s16 = smov 0  }
   0x2   :  { %s1048_s17 = smov 0   ;;  %s1050_s18 = smov 0  }
   0x3 LB: > { %s1063_s19 = sadd.s32 4294967295, %s1013_s18   ;;  %s1066_s20 = sadd.s32 1, %s1013_s18   ;;  %s1013_s18 = sphi %s1050_s18, %s1464_s18   ;;  %s1009_s17 = sphi %s1048_s17, %s1463_s17   ;;  %s1005_s16 = sphi %s1046_s16, %s1462_s16   ;;  %s1001_s15 = sphi %s1044_s15, %s1461_s15  }
   0x4   : > { %s22_s21 = ssub.s32 %s1013_s18, %s1066_s20  ;;  %s25_s22 = sadd.s32 1, %s1009_s17 }
   0x5   : > { %p23_p0 = scmp.eq.s32.totalorder %s22_s21, 0  ;;  %p32_p1 = scmp.ne.s32.totalorder %s1009_s17, %s1005_s16 }
   0x6   : > { %p33_p2 = scmp.eq.s32.totalorder %s1013_s18, 0  ;;  %p38_p3 = scmp.ne.s32.totalorder %s1005_s16, %s1001_s15 }
   0x7   : > { %s1076_s23 = scalar_select %p23_p0, %s1009_s17, %s25_s22  }
   0x8   : > { %p34_p4 = por %p33_p2, %p32_p1  ;;  %p39_p5 = scmp.eq.s32.totalorder %s1063_s19, 0 }
   0x9   : > { %p911_p6 = scmp.lt.s32.totalorder %s1013_s18, 2  ;;  %s154_s25 = sand.u32 1, %s1009_s17  }
   0xa   : > { %p1080_p7 = por %p39_p5, %p38_p3  ;;  %s806_s26 = sshll.u32 %s154_s25, 8 }
   0xb   : > { %s836_s27 = sshll.u32 %s1013_s18, 12  ;;  %s158_s5 = scalar_lea.vmem [#allocation2], %s806_s26 }
   0xc   : > { %s1457_s24 = scalar_select %p1080_p7, 1, 0 }
   0xd   : > { %s1089_s30 = scalar_lea.hbm %s1451_s0, %s836_s27  ;;  %s165_s6 = sshll.u32 %s158_s5, 4  ;;  %s1091_s6 = int_to_ptr.vmem [resolvable:$true] %s165_s6 }
   0xe   : > { %p1093_p8 = pnand %p911_p6, %p34_p4  ;;  %s1098_s8 = scalar_lea.sflag [#allocation3], %s154_s25 }
   0xf   : > { %s951_s9 = scalar_lea.hbm %s1089_s30, 4096  ;;  %s956_s12 = scalar_lea.hbm %s1451_s0, 8192 }
  0x10   : > { %p952_p10 = scmp.ne.s32.totalorder %s1089_s30, %s951_s9  ;;  %p953_p11 = pneg %p1093_p8 }
  0x11   : > { %p957_p0 = scmp.lt.s32.totalorder %s1089_s30, %s1451_s0  ;;  %p958_p1 = scmp.lt.s32.totalorder %s956_s12, %s951_s9 }
  0x12   : > { %p954_p12 = pnand %p953_p11, %p952_p10 }
  0x13   : > { %p959_p2 = por %p958_p1, %p957_p0 }
  0x14   : > { %p955_p13 = pneg %p954_p12 }
  0x16   : > { %p960_p3 = pnand %p959_p2, %p955_p13 }
  0x18   : > { %963 = shalt.err (!%p960_p3)
}
  0x19   : > { %s964_s15 = scalar_lea.vmem %s1091_s6, 4096  ;;  %s1015_s21 = smov [#allocation2]  }
  0x1a   : > { %p965_p4 = scmp.ne.s32.totalorder %s1091_s6, %s964_s15  ;;  %s969_s22 = sshll.u32 %s1015_s21, 4  ;;  %s970_s22 = int_to_ptr.vmem [resolvable:$false] %s969_s22 }
  0x1b   : > { %s971_s25 = scalar_lea.vmem %s970_s22, 8192  ;;  %p972_p10 = scmp.lt.s32.totalorder %s1091_s6, %s970_s22 }
  0x1c   : > { %p967_p5 = pnand %p965_p4, %p953_p11  ;;  %p973_p12 = scmp.lt.s32.totalorder %s971_s25, %s964_s15 }
  0x1e   : > { %p968_p6 = pneg %p967_p5  ;;  %p974_p9 = por %p973_p12, %p972_p10 }
  0x20   : > { %p975_p7 = pnand %p974_p9, %p968_p6 }
  0x22   : > { %978 = shalt.err (!%p975_p7)
}
  0x23   : > { %s1016_s26 = smov 128   ;;  %s1017_s27 = smov 8  }
  0x24   : > { %910 = dma.hbm_to_vmem [thread:$0]  (!%p1093_p8), %s1089_s30, 4096, %s1091_s6, %s1098_s8, %s1016_s26, %s1016_s26, %s1017_s27  }
  0x25   : > { %p173_p11 = scmp.lt.s32.totalorder %s1013_s18, 3  ;;  %p1459_p13 = scmp.ge.s32.totalorder %s1013_s18, 1 }
  0x27   : > { %p174_p0 = pnand %p1459_p13, %p173_p11 }
  0x28   : > { %s179_s28 = sand.u32 (!%p174_p0), 1, %s1005_s16   ;;  %p1460_p7 = scmp.ne.s32.totalorder (!%p174_p0), %s1457_s24, 0 }
  0x29   : > { %177 = sbr.rel (%p174_p0) target bundleno = 352 (0x160), region = 28  ;;  %s810_s29 = sshll.u32 (!%p174_p0), %s179_s28, 8 }
  0x2a   : > { %s180_s5 = scalar_lea.sflag (!%p174_p0), [#allocation3], %s179_s28  ;;  %s1123_s9 = scalar_lea.vmem (!%p174_p0), [#allocation2], %s810_s29 }
  0x2e   : > { %996 = dma.done.wait (%p1460_p7), %s180_s5, 4096  }
  0x2f   : > { %998 = vsyncadd (%p1460_p7), %s180_s5, 4294963200  ;;  %s811_s10 = sshll.u32 %s1063_s19, 5  ;;  %p813_p8 = scmp.ne.s32.totalorder %s1063_s19, 0 }
  0x30   : > { %p210_p9 = scmp.lt.s32.totalorder %s811_s10, 63 }
  0x31   : > { %219 = sbr.rel (%p813_p8) target bundleno = 56 (0x38), region = 36 }
  0x32   : > { %s1466_s10 = smov (!%p210_p9, %s811_s10), 63 }
  0x33   : > { %s812_s30 = sshll.u32 %s1466_s10, 3 }
  0x34   : > { %s1133_s7 = scalar_lea.vmem %s1453_s2, %s812_s30 }
  0x36   : > { %vm220_vm0 = vcmask 253952   ;;  %v1018_v0 = vmov 0.0  }
  0x37   : > { %221 = vst.msk [vmem:[%s1454_s3] sm:$0x1] %vm220_vm0, %v1018_v0  ;;  %222 = vst.msk [vmem:[%s1455_s4] sm:$0x1] %vm220_vm0, %v1018_v0 }
  0x38 PF: > { %v947_v1 = vld [vmem:[%s1452_s1 + $0x18] sm:$0xff]   ;;  %v948_v2 = vld [vmem:[%s1452_s1 + $0x10] sm:$0xff]   ;;  %v949_v3 = vld [vmem:[%s1452_s1 + $0x8] sm:$0xff]   ;;  %vm303_vm1 = vcmask 523264   ;;  %vm513_vm2 = vcmask 261120   ;;  %vm617_vm3 = vcmask 253952  }
  0x39   : > { %857 = vmatprep.subr.bf16.mxu0 %v947_v1  ;;  %897 = vmatprep.subr.bf16.mxu1 %v947_v1  ;;  %v223_v4 = vld [vmem:[%s1123_s9] sm:$0xff]  ;;  %v224_v5 = vld [vmem:[%s1123_s9 + $0x8] sm:$0xff]  ;;  %v225_v11 = vld [vmem:[%s1123_s9 + $0x10] sm:$0xff] }
  0x3a   : > { %858 = vmatpush3.bf16.msra.mxu0 %v947_v1  ;;  %901 = vmatpush3.bf16.msra.mxu1 %v947_v1  ;;  %v255_v6 = vpack.c.bf16 %v224_v5, %v223_v4  ;;  %v950_v7 = vld [vmem:[%s1452_s1] sm:$0xff]   ;;  %v240_v9 = vld [vmem:[%s1123_s9 + $0x88] sm:$0xff]  ;;  %v226_v12 = vld [vmem:[%s1123_s9 + $0x18] sm:$0xff] }
  0x3b   : > { %859 = vmatprep.subr.bf16.mxu0 %v948_v2  ;;  %898 = vmatprep.subr.bf16.mxu1 %v948_v2  ;;  %v239_v8 = vld [vmem:[%s1123_s9 + $0x80] sm:$0xff]  ;;  %v228_v14 = vld [vmem:[%s1123_s9 + $0x28] sm:$0xff]  ;;  %v241_v15 = vld [vmem:[%s1123_s9 + $0x90] sm:$0xff]  ;;  %v256_v19 = vpack.c.bf16 %v226_v12, %v225_v11 }
  0x3c   : > { %865 = vmatprep.mubr.msk.bf16.mxu0 %vm303_vm1, %v255_v6  ;;  %v263_v10 = vpack.c.bf16 %v240_v9, %v239_v8  ;;  %v227_v13 = vld [vmem:[%s1123_s9 + $0x20] sm:$0xff]  ;;  %v242_v16 = vld [vmem:[%s1123_s9 + $0x98] sm:$0xff]  ;;  %v244_v18 = vld [vmem:[%s1123_s9 + $0xa8] sm:$0xff] }
  0x3d   : > { %v243_v17 = vld [vmem:[%s1123_s9 + $0xa0] sm:$0xff]  ;;  %v257_v20 = vpack.c.bf16 %v228_v14, %v227_v13  ;;  %v264_v21 = vpack.c.bf16 %v242_v16, %v241_v15  ;;  %v229_v23 = vld [vmem:[%s1123_s9 + $0x30] sm:$0xff]  ;;  %v230_v24 = vld [vmem:[%s1123_s9 + $0x38] sm:$0xff] }
  0x3e   : > { %860 = vmatpush3.bf16.msra.mxu0 %v948_v2  ;;  %902 = vmatpush3.bf16.msra.mxu1 %v948_v2  ;;  %v265_v22 = vpack.c.bf16 %v244_v18, %v243_v17  ;;  %v231_v25 = vld [vmem:[%s1123_s9 + $0x40] sm:$0xff]  ;;  %v232_v26 = vld [vmem:[%s1123_s9 + $0x48] sm:$0xff]  ;;  %v245_v27 = vld [vmem:[%s1123_s9 + $0xb0] sm:$0xff]  ;;  %v258_v31 = vpack.c.bf16 %v230_v24, %v229_v23 }
  0x3f   : > { %861 = vmatprep.subr.bf16.mxu0 %v949_v3  ;;  %899 = vmatprep.subr.bf16.mxu1 %v949_v3  ;;  %v246_v28 = vld [vmem:[%s1123_s9 + $0xb8] sm:$0xff]  ;;  %v247_v29 = vld [vmem:[%s1123_s9 + $0xc0] sm:$0xff]  ;;  %v248_v30 = vld [vmem:[%s1123_s9 + $0xc8] sm:$0xff]  ;;  %v259_v32 = vpack.c.bf16 %v232_v26, %v231_v25 }
  0x40   : > { %881 = vmatprep.mubr.msk.bf16.mxu1 %vm303_vm1, %v263_v10  ;;  %v266_v33 = vpack.c.bf16 %v246_v28, %v245_v27  ;;  %v267_v34 = vpack.c.bf16 %v248_v30, %v247_v29  ;;  %v233_v35 = vld [vmem:[%s1123_s9 + $0x50] sm:$0xff]  ;;  %v234_v36 = vld [vmem:[%s1123_s9 + $0x58] sm:$0xff]  ;;  %v235_v37 = vld [vmem:[%s1123_s9 + $0x60] sm:$0xff] }
  0x41   : > { %v236_v38 = vld [vmem:[%s1123_s9 + $0x68] sm:$0xff]  ;;  %v249_v39 = vld [vmem:[%s1123_s9 + $0xd0] sm:$0xff]  ;;  %v250_v40 = vld [vmem:[%s1123_s9 + $0xd8] sm:$0xff]  ;;  %v260_v43 = vpack.c.bf16 %v234_v36, %v233_v35 }
  0x42   : > { %862 = vmatpush3.bf16.msra.mxu0 %v949_v3  ;;  %903 = vmatpush3.bf16.msra.mxu1 %v949_v3  ;;  %v251_v41 = vld [vmem:[%s1123_s9 + $0xe0] sm:$0xff]  ;;  %v252_v42 = vld [vmem:[%s1123_s9 + $0xe8] sm:$0xff]  ;;  %v261_v44 = vpack.c.bf16 %v236_v38, %v235_v37  ;;  %v268_v45 = vpack.c.bf16 %v250_v40, %v249_v39  ;;  %v237_v47 = vld [vmem:[%s1123_s9 + $0x70] sm:$0xff] }
  0x43   : > { %863 = vmatprep.subr.bf16.mxu0 %v950_v7  ;;  %900 = vmatprep.subr.bf16.mxu1 %v950_v7  ;;  %v269_v46 = vpack.c.bf16 %v252_v42, %v251_v41  ;;  %v238_v48 = vld [vmem:[%s1123_s9 + $0x78] sm:$0xff]  ;;  %v253_v49 = vld [vmem:[%s1123_s9 + $0xf0] sm:$0xff] }
  0x44   : > { %v254_v50 = vld [vmem:[%s1123_s9 + $0xf8] sm:$0xff]  ;;  %v262_v51 = vpack.c.bf16 %v238_v48, %v237_v47 }
  0x45   : > { %v270_v52 = vpack.c.bf16 %v254_v50, %v253_v49 }
  0x46   : > { %864 = vmatpush3.bf16.msra.mxu0 %v950_v7  ;;  %904 = vmatpush3.bf16.msra.mxu1 %v950_v7 }
  0x49   : > { %866 = vmatmul.mubr.msk.bf16.vlgmr.msra.gmra.mxu0 %vm303_vm1, %v256_v19  ;;  %882 = vmatmul.mubr.msk.bf16.vlgmr.msra.gmra.mxu1 %vm303_vm1, %v264_v21 }
  0x4a   : > { %869 = vmatprep.mubr.msk.bf16.mxu0 %vm303_vm1, %v257_v20  ;;  %885 = vmatprep.mubr.msk.bf16.mxu1 %vm303_vm1, %v265_v22 }
  0x51   : > { %870 = vmatmul.mubr.msk.bf16.gmra.mxu0 %vm303_vm1, %v258_v31  ;;  %886 = vmatmul.mubr.msk.bf16.gmra.mxu1 %vm303_vm1, %v266_v33 }
  0x52   : > { %873 = vmatprep.mubr.msk.bf16.mxu0 %vm303_vm1, %v259_v32  ;;  %889 = vmatprep.mubr.msk.bf16.mxu1 %vm303_vm1, %v267_v34 }
  0x59   : > { %874 = vmatmul.mubr.msk.bf16.gmra.mxu0 %vm303_vm1, %v260_v43  ;;  %890 = vmatmul.mubr.msk.bf16.gmra.mxu1 %vm303_vm1, %v268_v45 }
  0x5a   : > { %877 = vmatprep.mubr.msk.bf16.mxu0 %vm303_vm1, %v261_v44  ;;  %893 = vmatprep.mubr.msk.bf16.mxu1 %vm303_vm1, %v269_v46 }
  0x61   : > { %878 = vmatmul.mubr.msk.bf16.gmra.mxu0 %vm303_vm1, %v262_v51  ;;  %894 = vmatmul.mubr.msk.bf16.gmra.mxu1 %vm303_vm1, %v270_v52 }
 0x109   : > { %v867_v53 = vpop.f32.mrf.mxu0  ;;  %v1204_v54 = vpop.f32.mrf.mxu1 }
 0x10a   : > { %516 = vst.msk [vmem:[%s1133_s7 + $0x10] sm:$0xff] %vm513_vm2, %v867_v53  ;;  %532 = vst.msk [vmem:[%s1133_s7 + $0x90] sm:$0xff] %vm513_vm2, %v1204_v54  ;;  %v622_v61 = vmul.f32 %v867_v53, %v867_v53  ;;  %v550_v4 = vsel %vm513_vm2, %v867_v53, 0.0 }
 0x10b   : > { %v386_v55 = vpop.f32.mrf.mxu0  ;;  %v1211_v56 = vpop.f32.mrf.mxu1 }
 0x10c   : > { %514 = vst.msk [vmem:[%s1133_s7] sm:$0xff] %vm513_vm2, %v386_v55  ;;  %530 = vst.msk [vmem:[%s1133_s7 + $0x80] sm:$0xff] %vm513_vm2, %v1211_v56  ;;  %v620_v58 = vmul.f32 %v386_v55, %v386_v55  ;;  %v547_v62 = vsel %vm513_vm2, %v386_v55, 0.0  ;;  %v655_v12 = vsel %vm513_vm2, %v622_v61, 0.0 }
 0x10d   : > { %v868_v57 = vpop.f32.mrf.mxu0  ;;  %v1218_v59 = vpop.f32.mrf.mxu1 }
 0x10e   : > { %517 = vst.msk [vmem:[%s1133_s7 + $0x18] sm:$0xff] %vm513_vm2, %v868_v57  ;;  %533 = vst.msk [vmem:[%s1133_s7 + $0x98] sm:$0xff] %vm513_vm2, %v1218_v59  ;;  %v652_v5 = vsel %vm513_vm2, %v620_v58, 0.0  ;;  %v623_v6 = vmul.f32 %v868_v57, %v868_v57  ;;  %v552_v13 = vsel %vm513_vm2, %v868_v57, 0.0 }
 0x10f   : > { %v389_v60 = vpop.f32.mrf.mxu0  ;;  %v1227_v1 = vpop.f32.mrf.mxu1 }
 0x110   : > { %515 = vst.msk [vmem:[%s1133_s7 + $0x8] sm:$0xff] %vm513_vm2, %v389_v60  ;;  %v548_v63 = vsel %vm513_vm2, %v389_v60, 0.0  ;;  %v621_v0 = vmul.f32 %v389_v60, %v389_v60  ;;  %531 = vst.msk [vmem:[%s1133_s7 + $0x88] sm:$0xff] %vm513_vm2, %v1227_v1  ;;  %v657_v19 = vsel %vm513_vm2, %v623_v6, 0.0 }
 0x111   : > { %v549_v2 = vadd.f32 %v548_v63, %v547_v62  ;;  %v871_v3 = vpop.f32.mrf.mxu0  ;;  %v1237_v8 = vpop.f32.mrf.mxu1 }
 0x112   : > { %v653_v7 = vsel %vm513_vm2, %v621_v0, 0.0  ;;  %520 = vst.msk [vmem:[%s1133_s7 + $0x30] sm:$0xff] %vm513_vm2, %v871_v3  ;;  %536 = vst.msk [vmem:[%s1133_s7 + $0xb0] sm:$0xff] %vm513_vm2, %v1237_v8  ;;  %v626_v25 = vmul.f32 %v871_v3, %v871_v3  ;;  %v558_v33 = vsel %vm513_vm2, %v871_v3, 0.0 }
 0x113   : > { %v551_v9 = vadd.f32 %v550_v4, %v549_v2  ;;  %v654_v10 = vadd.f32 %v653_v7, %v652_v5  ;;  %v402_v11 = vpop.f32.mrf.mxu0  ;;  %v1246_v15 = vpop.f32.mrf.mxu1 }
 0x114   : > { %518 = vst.msk [vmem:[%s1133_s7 + $0x20] sm:$0xff] %vm513_vm2, %v402_v11  ;;  %v624_v14 = vmul.f32 %v402_v11, %v402_v11  ;;  %534 = vst.msk [vmem:[%s1133_s7 + $0xa0] sm:$0xff] %vm513_vm2, %v1246_v15  ;;  %v554_v20 = vsel %vm513_vm2, %v402_v11, 0.0  ;;  %v663_v40 = vsel %vm513_vm2, %v626_v25, 0.0 }
 0x115   : > { %v656_v16 = vadd.f32 %v655_v12, %v654_v10  ;;  %v553_v17 = vadd.f32 %v552_v13, %v551_v9  ;;  %v872_v18 = vpop.f32.mrf.mxu0  ;;  %v1255_v21 = vpop.f32.mrf.mxu1 }
 0x116   : > { %521 = vst.msk [vmem:[%s1133_s7 + $0x38] sm:$0xff] %vm513_vm2, %v872_v18  ;;  %537 = vst.msk [vmem:[%s1133_s7 + $0xb8] sm:$0xff] %vm513_vm2, %v1255_v21  ;;  %v659_v26 = vsel %vm513_vm2, %v624_v14, 0.0  ;;  %v627_v34 = vmul.f32 %v872_v18, %v872_v18  ;;  %v560_v41 = vsel %vm513_vm2, %v872_v18, 0.0 }
 0x117   : > { %v555_v22 = vadd.f32 %v554_v20, %v553_v17  ;;  %v658_v23 = vadd.f32 %v657_v19, %v656_v16  ;;  %v405_v24 = vpop.f32.mrf.mxu0  ;;  %v1264_v29 = vpop.f32.mrf.mxu1 }
 0x118   : > { %519 = vst.msk [vmem:[%s1133_s7 + $0x28] sm:$0xff] %vm513_vm2, %v405_v24  ;;  %v556_v27 = vsel %vm513_vm2, %v405_v24, 0.0  ;;  %v625_v28 = vmul.f32 %v405_v24, %v405_v24  ;;  %535 = vst.msk [vmem:[%s1133_s7 + $0xa8] sm:$0xff] %vm513_vm2, %v1264_v29  ;;  %v665_v47 = vsel %vm513_vm2, %v627_v34, 0.0 }
 0x119   : > { %v660_v30 = vadd.f32 %v659_v26, %v658_v23  ;;  %v557_v31 = vadd.f32 %v556_v27, %v555_v22  ;;  %v875_v32 = vpop.f32.mrf.mxu0  ;;  %v1273_v36 = vpop.f32.mrf.mxu1 }
 0x11a   : > { %v661_v35 = vsel %vm513_vm2, %v625_v28, 0.0  ;;  %524 = vst.msk [vmem:[%s1133_s7 + $0x50] sm:$0xff] %vm513_vm2, %v875_v32  ;;  %540 = vst.msk [vmem:[%s1133_s7 + $0xd0] sm:$0xff] %vm513_vm2, %v1273_v36  ;;  %v630_v53 = vmul.f32 %v875_v32, %v875_v32  ;;  %v566_v0 = vsel %vm513_vm2, %v875_v32, 0.0 }
 0x11b   : > { %v559_v37 = vadd.f32 %v558_v33, %v557_v31  ;;  %v662_v38 = vadd.f32 %v661_v35, %v660_v30  ;;  %v418_v39 = vpop.f32.mrf.mxu0  ;;  %v1282_v43 = vpop.f32.mrf.mxu1 }
 0x11c   : > { %522 = vst.msk [vmem:[%s1133_s7 + $0x40] sm:$0xff] %vm513_vm2, %v418_v39  ;;  %v628_v42 = vmul.f32 %v418_v39, %v418_v39  ;;  %538 = vst.msk [vmem:[%s1133_s7 + $0xc0] sm:$0xff] %vm513_vm2, %v1282_v43  ;;  %v562_v48 = vsel %vm513_vm2, %v418_v39, 0.0  ;;  %v671_v9 = vsel %vm513_vm2, %v630_v53, 0.0 }
 0x11d   : > { %v664_v44 = vadd.f32 %v663_v40, %v662_v38  ;;  %v561_v45 = vadd.f32 %v560_v41, %v559_v37  ;;  %v876_v46 = vpop.f32.mrf.mxu0  ;;  %v1291_v49 = vpop.f32.mrf.mxu1  ;;  %v636_v40 = vmul.f32 %v1211_v56, %v1211_v56 }
 0x11e   : > { %525 = vst.msk [vmem:[%s1133_s7 + $0x58] sm:$0xff] %vm513_vm2, %v876_v46  ;;  %541 = vst.msk [vmem:[%s1133_s7 + $0xd8] sm:$0xff] %vm513_vm2, %v1291_v49  ;;  %v667_v55 = vsel %vm513_vm2, %v628_v42, 0.0  ;;  %v631_v2 = vmul.f32 %v876_v46, %v876_v46  ;;  %v568_v10 = vsel %vm513_vm2, %v876_v46, 0.0  ;;  %v637_v46 = vmul.f32 %v1227_v1, %v1227_v1 }
 0x11f   : > { %v563_v50 = vadd.f32 %v562_v48, %v561_v45  ;;  %v666_v51 = vadd.f32 %v665_v47, %v664_v44  ;;  %v421_v52 = vpop.f32.mrf.mxu0  ;;  %v1300_v60 = vpop.f32.mrf.mxu1  ;;  %v578_v45 = vsel %vm513_vm2, %v1211_v56, 0.0  ;;  %v639_v56 = vmul.f32 %v1218_v59, %v1218_v59 }
 0x120   : > { %523 = vst.msk [vmem:[%s1133_s7 + $0x48] sm:$0xff] %vm513_vm2, %v421_v52  ;;  %v564_v57 = vsel %vm513_vm2, %v421_v52, 0.0  ;;  %v629_v58 = vmul.f32 %v421_v52, %v421_v52  ;;  %539 = vst.msk [vmem:[%s1133_s7 + $0xc8] sm:$0xff] %vm513_vm2, %v1300_v60  ;;  %v673_v17 = vsel %vm513_vm2, %v631_v2, 0.0  ;;  %v580_v52 = vsel %vm513_vm2, %v1227_v1, 0.0 }
 0x121   : > { %v668_v61 = vadd.f32 %v667_v55, %v666_v51  ;;  %v565_v62 = vadd.f32 %v564_v57, %v563_v50  ;;  %v879_v63 = vpop.f32.mrf.mxu0  ;;  %v1309_v4 = vpop.f32.mrf.mxu1  ;;  %v638_v50 = vmul.f32 %v1204_v54, %v1204_v54  ;;  %v683_v51 = vsel %vm513_vm2, %v636_v40, 0.0 }
 0x122   : > { %v669_v3 = vsel %vm513_vm2, %v629_v58, 0.0  ;;  %528 = vst.msk [vmem:[%s1133_s7 + $0x70] sm:$0xff] %vm513_vm2, %v879_v63  ;;  %544 = vst.msk [vmem:[%s1133_s7 + $0xf0] sm:$0xff] %vm513_vm2, %v1309_v4  ;;  %v634_v24 = vmul.f32 %v879_v63, %v879_v63  ;;  %v574_v32 = vsel %vm513_vm2, %v879_v63, 0.0  ;;  %v582_v57 = vsel %vm513_vm2, %v1204_v54, 0.0 }
 0x123   : > { %v567_v5 = vadd.f32 %v566_v0, %v565_v62  ;;  %v670_v6 = vadd.f32 %v669_v3, %v668_v61  ;;  %v434_v7 = vpop.f32.mrf.mxu0  ;;  %v1318_v12 = vpop.f32.mrf.mxu1  ;;  %v685_v58 = vsel %vm513_vm2, %v637_v46, 0.0  ;;  %v687_v63 = vsel %vm513_vm2, %v638_v50, 0.0 }
 0x124   : > { %526 = vst.msk [vmem:[%s1133_s7 + $0x60] sm:$0xff] %vm513_vm2, %v434_v7  ;;  %v632_v11 = vmul.f32 %v434_v7, %v434_v7  ;;  %542 = vst.msk [vmem:[%s1133_s7 + $0xe0] sm:$0xff] %vm513_vm2, %v1318_v12  ;;  %v570_v18 = vsel %vm513_vm2, %v434_v7, 0.0  ;;  %v679_v38 = vsel %vm513_vm2, %v634_v24, 0.0  ;;  %v584_v0 = vsel %vm513_vm2, %v1218_v59, 0.0 }
 0x125   : > { %v672_v13 = vadd.f32 %v671_v9, %v670_v6  ;;  %v569_v14 = vadd.f32 %v568_v10, %v567_v5  ;;  %v880_v16 = vpop.f32.mrf.mxu0  ;;  %v1327_v19 = vpop.f32.mrf.mxu1  ;;  %v640_v1 = vmul.f32 %v1246_v15, %v1246_v15  ;;  %v689_v5 = vsel %vm513_vm2, %v639_v56, 0.0 }
 0x126   : > { %529 = vst.msk [vmem:[%s1133_s7 + $0x78] sm:$0xff] %vm513_vm2, %v880_v16  ;;  %545 = vst.msk [vmem:[%s1133_s7 + $0xf8] sm:$0xff] %vm513_vm2, %v1327_v19  ;;  %v675_v25 = vsel %vm513_vm2, %v632_v11, 0.0  ;;  %v635_v33 = vmul.f32 %v880_v16, %v880_v16  ;;  %v576_v39 = vsel %vm513_vm2, %v880_v16, 0.0  ;;  %v586_v54 = vsel %vm513_vm2, %v1246_v15, 0.0 }
 0x127   : > { %v571_v20 = vadd.f32 %v570_v18, %v569_v14  ;;  %v674_v22 = vadd.f32 %v673_v17, %v672_v13  ;;  %v437_v23 = vpop.f32.mrf.mxu0  ;;  %v1336_v28 = vpop.f32.mrf.mxu1  ;;  %v641_v6 = vmul.f32 %v1264_v29, %v1264_v29  ;;  %v642_v10 = vmul.f32 %v1237_v8, %v1237_v8 }
 0x128   : > { %527 = vst.msk [vmem:[%s1133_s7 + $0x68] sm:$0xff] %vm513_vm2, %v437_v23  ;;  %v572_v26 = vsel %vm513_vm2, %v437_v23, 0.0  ;;  %v633_v27 = vmul.f32 %v437_v23, %v437_v23  ;;  %543 = vst.msk [vmem:[%s1133_s7 + $0xe8] sm:$0xff] %vm513_vm2, %v1336_v28  ;;  %v681_v44 = vsel %vm513_vm2, %v635_v33, 0.0  ;;  %v691_v59 = vsel %vm513_vm2, %v640_v1, 0.0 }
 0x129   : > { %v676_v30 = vadd.f32 %v675_v25, %v674_v22  ;;  %v573_v31 = vadd.f32 %v572_v26, %v571_v20  ;;  %v588_v11 = vsel %vm513_vm2, %v1264_v29, 0.0  ;;  %v590_v16 = vsel %vm513_vm2, %v1237_v8, 0.0 }
 0x12a   : > { %v677_v34 = vsel %vm513_vm2, %v633_v27, 0.0  ;;  %v643_v15 = vmul.f32 %v1255_v21, %v1255_v21  ;;  %v693_v17 = vsel %vm513_vm2, %v641_v6, 0.0  ;;  %v695_v22 = vsel %vm513_vm2, %v642_v10, 0.0 }
 0x12b   : > { %v575_v35 = vadd.f32 %v574_v32, %v573_v31  ;;  %v678_v37 = vadd.f32 %v677_v34, %v676_v30  ;;  %v592_v23 = vsel %vm513_vm2, %v1255_v21, 0.0  ;;  %v644_v29 = vmul.f32 %v1282_v43, %v1282_v43 }
 0x12c   : > { %v697_v26 = vsel %vm513_vm2, %v643_v15, 0.0  ;;  %v594_v8 = vsel %vm513_vm2, %v1282_v43, 0.0  ;;  %v645_v27 = vmul.f32 %v1300_v60, %v1300_v60  ;;  %v646_v32 = vmul.f32 %v1273_v36, %v1273_v36 }
 0x12d   : > { %v577_v41 = vadd.f32 %v576_v39, %v575_v35  ;;  %v680_v42 = vadd.f32 %v679_v38, %v678_v37  ;;  %v699_v21 = vsel %vm513_vm2, %v644_v29, 0.0  ;;  %v596_v33 = vsel %vm513_vm2, %v1300_v60, 0.0 }
 0x12e   : > { %v598_v37 = vsel %vm513_vm2, %v1273_v36, 0.0  ;;  %v647_v43 = vmul.f32 %v1291_v49, %v1291_v49  ;;  %v701_v38 = vsel %vm513_vm2, %v645_v27, 0.0  ;;  %v648_v60 = vmul.f32 %v1318_v12, %v1318_v12 }
 0x12f   : > { %v682_v47 = vadd.f32 %v681_v44, %v680_v42  ;;  %v579_v48 = vadd.f32 %v578_v45, %v577_v41  ;;  %v703_v41 = vsel %vm513_vm2, %v646_v32, 0.0  ;;  %v600_v42 = vsel %vm513_vm2, %v1291_v49, 0.0 }
 0x130   : > { %v705_v46 = vsel %vm513_vm2, %v647_v43, 0.0  ;;  %v602_v36 = vsel %vm513_vm2, %v1318_v12, 0.0  ;;  %v707_v49 = vsel %vm513_vm2, %v648_v60, 0.0  ;;  %v651_v12 = vmul.f32 %v1327_v19, %v1327_v19 }
 0x131   : > { %v581_v53 = vadd.f32 %v580_v52, %v579_v48  ;;  %v684_v55 = vadd.f32 %v683_v51, %v682_v47  ;;  %v649_v47 = vmul.f32 %v1336_v28, %v1336_v28  ;;  %v650_v51 = vmul.f32 %v1309_v4, %v1309_v4 }
 0x132   : > { %v604_v52 = vsel %vm513_vm2, %v1336_v28, 0.0  ;;  %v713_v28 = vsel %vm513_vm2, %v651_v12, 0.0 }
 0x133   : > { %v583_v61 = vadd.f32 %v582_v57, %v581_v53  ;;  %v686_v62 = vadd.f32 %v685_v58, %v684_v55  ;;  %v606_v57 = vsel %vm513_vm2, %v1309_v4, 0.0  ;;  %v709_v56 = vsel %vm513_vm2, %v649_v47, 0.0 }
 0x135   : > { %v688_v2 = vadd.f32 %v687_v63, %v686_v62  ;;  %v585_v3 = vadd.f32 %v584_v0, %v583_v61  ;;  %v711_v62 = vsel %vm513_vm2, %v650_v51, 0.0  ;;  %v608_v63 = vsel %vm513_vm2, %v1327_v19, 0.0 }
 0x137   : > { %v587_v7 = vadd.f32 %v586_v54, %v585_v3  ;;  %v690_v9 = vadd.f32 %v689_v5, %v688_v2 }
 0x139   : > { %v692_v13 = vadd.f32 %v691_v59, %v690_v9  ;;  %v589_v14 = vadd.f32 %v588_v11, %v587_v7  ;;  %v546_v11 = vld [vmem:[%s1454_s3] sm:$0x1] }
 0x13b   : > { %v591_v18 = vadd.f32 %v590_v16, %v589_v14  ;;  %v694_v20 = vadd.f32 %v693_v17, %v692_v13  ;;  %v619_v14 = vld [vmem:[%s1455_s4] sm:$0x1] }
 0x13d   : > { %v696_v24 = vadd.f32 %v695_v22, %v694_v20  ;;  %v593_v25 = vadd.f32 %v592_v23, %v591_v18 }
 0x13f   : > { %v595_v30 = vadd.f32 %v594_v8, %v593_v25  ;;  %v698_v31 = vadd.f32 %v697_v26, %v696_v24 }
 0x141   : > { %v700_v34 = vadd.f32 %v699_v21, %v698_v31  ;;  %v597_v35 = vadd.f32 %v596_v33, %v595_v30 }
 0x143   : > { %v599_v39 = vadd.f32 %v598_v37, %v597_v35  ;;  %v702_v40 = vadd.f32 %v701_v38, %v700_v34 }
 0x145   : > { %v704_v44 = vadd.f32 %v703_v41, %v702_v40  ;;  %v601_v45 = vadd.f32 %v600_v42, %v599_v39 }
 0x147   : > { %v603_v48 = vadd.f32 %v602_v36, %v601_v45  ;;  %v706_v50 = vadd.f32 %v705_v46, %v704_v44 }
 0x149   : > { %v708_v53 = vadd.f32 %v707_v49, %v706_v50  ;;  %v605_v55 = vadd.f32 %v604_v52, %v603_v48 }
 0x14b   : > { %v607_v58 = vadd.f32 %v606_v57, %v605_v55  ;;  %v710_v61 = vadd.f32 %v709_v56, %v708_v53 }
 0x14d   : > { %v609_v0 = vadd.f32 %v608_v63, %v607_v58  ;;  %v712_v1 = vadd.f32 %v711_v62, %v710_v61 }
 0x14f   : > { %v610_v2 = vrot.slane %v609_v0, 4  ;;  %v714_v3 = vadd.f32 %v713_v28, %v712_v1 }
 0x151   : > { %v611_v5 = vadd.f32 %v610_v2, %v609_v0  ;;  %v715_v4 = vrot.slane %v714_v3, 4 }
 0x153   : > { %v612_v54 = vrot.slane %v611_v5, 2  ;;  %v716_v6 = vadd.f32 %v715_v4, %v714_v3 }
 0x155   : > { %v613_v7 = vadd.f32 %v612_v54, %v611_v5  ;;  %v717_v9 = vrot.slane %v716_v6, 2 }
 0x157   : > { %v614_v10 = vrot.slane %v613_v7, 1  ;;  %v718_v59 = vadd.f32 %v717_v9, %v716_v6 }
 0x159   : > { %v615_v13 = vadd.f32 %v614_v10, %v613_v7  ;;  %v719_v19 = vrot.slane %v718_v59, 1 }
 0x15b   : > { %v616_v16 = vadd.f32 %v615_v13, %v546_v11  ;;  %v720_v15 = vadd.f32 %v719_v19, %v718_v59 }
 0x15d   : > { %618 = vst.msk [vmem:[%s1454_s3] sm:$0x1] %vm617_vm3, %v616_v16  ;;  %v721_v17 = vadd.f32 %v720_v15, %v619_v14 }
 0x15f   : > { %722 = vst.msk [vmem:[%s1455_s4] sm:$0x1] %vm617_vm3, %v721_v17 }
 0x160 PF: > { %p15_p1 = scmp.ge.s32.totalorder %s1066_s20, 4   ;;  %s1461_s15 = smov %s1005_s16 }
 0x161   : > { %s1462_s16 = smov %s1009_s17  ;;  %s1463_s17 = smov %s1076_s23 }
 0x162   : > { %s1464_s18 = smov %s1066_s20  ;;  %17 = sbr.rel (!%p15_p1) target bundleno = 3 (0x3), region = 88 }
 0x167   :  { %757 = vsyncpa [#allocation3], 1 }
 0x168   :  { %759 = vsyncpa [#allocation3 + $0x1], 1 }

// kernel: bottleneck_forward.6
= control target key start
LH: loop header
LB: loop body
LE: loop exit
PB: predicated region body
PF: predicated region fallthrough
CT: control target
= control target key end

     0   :  { %s1065_s21 = smov 0   ;;  %s1441_s0 = inlined_call_operand.vmem [shape: f32[512,32], index: 0, kind: input, shape index: {}]   ;;  %s1442_s1 = inlined_call_operand.vmem [shape: f32[1,32], index: 1, kind: input, shape index: {}]   ;;  %s1443_s2 = inlined_call_operand.vmem [shape: f32[1,32], index: 2, kind: input, shape index: {}]   ;;  %s1444_s3 = inlined_call_operand.vmem [shape: bf16[32,64], index: 3, kind: input, shape index: {}]   ;;  %s1445_s4 = inlined_call_operand.vmem [shape: f32[512,64], index: 4, kind: output, shape index: {0}]   ;;  %s1446_s5 = inlined_call_operand.vmem [shape: f32[1,64], index: 5, kind: output, shape index: {1}]   ;;  %s1447_s6 = inlined_call_operand.vmem [shape: f32[1,64], index: 6, kind: output, shape index: {2}]  }
   0x1 LB: > { %s920_s22 = sadd.s32 4294967295, %s1027_s21   ;;  %p924_p0 = scmp.ge.s32.totalorder %s1027_s21, 1  ;;  %s1027_s21 = sphi %s1065_s21, %s17_s21  }
   0x2   : > { %p208_p1 = scmp.lt.s32.totalorder %s1027_s21, 3 }
   0x4   : > { %p209_p2 = pnand %p924_p0, %p208_p1 }
   0x5   : > { %s925_s23 = sshll.u32 (!%p209_p2), %s920_s22, 5  ;;  %p929_p4 = scmp.ne.s32.totalorder (!%p209_p2), %s920_s22, 0 }
   0x6   : > { %212 = sbr.rel (%p209_p2) target bundleno = 309 (0x135), region = 36  ;;  %p239_p3 = scmp.lt.s32.totalorder (!%p209_p2), %s925_s23, 63 }
   0xb   : > { %s1449_s23 = smov (!%p239_p3, %s925_s23), 63  ;;  %254 = sbr.rel (%p929_p4) target bundleno = 18 (0x12), region = 40 }
   0xc   : > { %s926_s24 = sshll.u32 %s1449_s23, 3 }
   0xd   : > { %s1076_s27 = scalar_lea.vmem %s1441_s0, %s926_s24  ;;  %s1081_s30 = scalar_lea.vmem %s1445_s4, %s926_s24 }
  0x10   : > { %vm255_vm0 = vcmask 516096   ;;  %v1029_v0 = vmov 0.0  }
  0x11   : > { %256 = vst.msk [vmem:[%s1446_s5] sm:$0x1] %vm255_vm0, %v1029_v0  ;;  %257 = vst.msk [vmem:[%s1447_s6] sm:$0x1] %vm255_vm0, %v1029_v0 }
  0x12 PF: > { %v1019_v1 = vld [vmem:[%s1444_s3 + $0x8] sm:$0xff]   ;;  %v1020_v2 = vld [vmem:[%s1444_s3] sm:$0xff]   ;;  %v260_v9 = vld [vmem:[%s1076_s27 + $0x10] sm:$0xff]  ;;  %vm432_vm1 = vcmask 261120   ;;  %vm642_vm2 = vcmask 523264   ;;  %vm746_vm3 = vcmask 516096  }
  0x13   : > { %970 = vmatprep.subr.bf16.mxu0 %v1019_v1  ;;  %v258_v3 = vld [vmem:[%s1076_s27] sm:$0xff]  ;;  %v259_v4 = vld [vmem:[%s1076_s27 + $0x8] sm:$0xff]  ;;  %1006 = vmatprep.subr.bf16.mxu1 %v1019_v1  ;;  %v261_v10 = vld [vmem:[%s1076_s27 + $0x18] sm:$0xff] }
  0x14   : > { %v1100_v5 = vld [vmem:[%s1442_s1] ss:$0 sm:$0xff]  ;;  %971 = vmatpush3.bf16.msra.mxu0 %v1019_v1  ;;  %1008 = vmatpush3.bf16.msra.mxu1 %v1019_v1  ;;  %v263_v14 = vld [vmem:[%s1076_s27 + $0x28] sm:$0xff]  ;;  %v264_v15 = vld [vmem:[%s1076_s27 + $0x30] sm:$0xff] }
  0x15   : > { %v297_v6 = vmul.f32 %v1100_v5, %v258_v3  ;;  %v298_v7 = vmul.f32 %v1100_v5, %v259_v4  ;;  %v1107_v8 = vld [vmem:[%s1443_s2] ss:$0 sm:$0xff]  ;;  %972 = vmatprep.subr.bf16.mxu0 %v1020_v2  ;;  %v299_v11 = vmul.f32 %v1100_v5, %v260_v9  ;;  %v300_v12 = vmul.f32 %v1100_v5, %v261_v10  ;;  %v265_v20 = vld [vmem:[%s1076_s27 + $0x38] sm:$0xff]  ;;  %v267_v30 = vld [vmem:[%s1076_s27 + $0x48] sm:$0xff] }
  0x16   : > { %v262_v13 = vld [vmem:[%s1076_s27 + $0x20] sm:$0xff]  ;;  %1007 = vmatprep.subr.bf16.mxu1 %v1020_v2  ;;  %v302_v19 = vmul.f32 %v1100_v5, %v263_v14  ;;  %v303_v23 = vmul.f32 %v1100_v5, %v264_v15  ;;  %v304_v24 = vmul.f32 %v1100_v5, %v265_v20  ;;  %v268_v35 = vld [vmem:[%s1076_s27 + $0x50] sm:$0xff]  ;;  %v269_v36 = vld [vmem:[%s1076_s27 + $0x58] sm:$0xff]  ;;  %v306_v45 = vmul.f32 %v1100_v5, %v267_v30 }
  0x17   : > { %v336_v16 = vadd.f32 %v1107_v8, %v297_v6  ;;  %v337_v17 = vadd.f32 %v1107_v8, %v298_v7  ;;  %v301_v18 = vmul.f32 %v1100_v5, %v262_v13  ;;  %v338_v21 = vadd.f32 %v1107_v8, %v299_v11  ;;  %v266_v25 = vld [vmem:[%s1076_s27 + $0x40] sm:$0xff]  ;;  %v271_v42 = vld [vmem:[%s1076_s27 + $0x68] sm:$0xff]  ;;  %v272_v46 = vld [vmem:[%s1076_s27 + $0x70] sm:$0xff] }
  0x18   : > { %v339_v22 = vadd.f32 %v1107_v8, %v300_v12  ;;  %973 = vmatpush3.bf16.msra.mxu0 %v1020_v2  ;;  %v341_v29 = vadd.f32 %v1107_v8, %v302_v19  ;;  %1009 = vmatpush3.bf16.msra.mxu1 %v1020_v2  ;;  %v342_v33 = vadd.f32 %v1107_v8, %v303_v23  ;;  %v270_v41 = vld [vmem:[%s1076_s27 + $0x60] sm:$0xff]  ;;  %v273_v59 = vld [vmem:[%s1076_s27 + $0x78] sm:$0xff]  ;;  %v275_v0 = vld [vmem:[%s1076_s27 + $0x88] sm:$0xff] }
  0x19   : > { %v368_v26 = vmax.f32 %v336_v16, 0.0  ;;  %v369_v27 = vmax.f32 %v337_v17, 0.0  ;;  %v340_v28 = vadd.f32 %v1107_v8, %v301_v18  ;;  %v370_v31 = vmax.f32 %v338_v21, 0.0  ;;  %v274_v55 = vld [vmem:[%s1076_s27 + $0x80] sm:$0xff]  ;;  %v276_v2 = vld [vmem:[%s1076_s27 + $0x90] sm:$0xff]  ;;  %v277_v3 = vld [vmem:[%s1076_s27 + $0x98] sm:$0xff] }
  0x1a   : > { %v371_v32 = vmax.f32 %v339_v22, 0.0  ;;  %v343_v34 = vadd.f32 %v1107_v8, %v304_v24  ;;  %v373_v39 = vmax.f32 %v341_v29, 0.0  ;;  %v305_v40 = vmul.f32 %v1100_v5, %v266_v25  ;;  %v278_v10 = vld [vmem:[%s1076_s27 + $0xa0] sm:$0xff]  ;;  %v279_v11 = vld [vmem:[%s1076_s27 + $0xa8] sm:$0xff]  ;;  %v280_v16 = vld [vmem:[%s1076_s27 + $0xb0] sm:$0xff] }
  0x1b   : > { %v400_v37 = vpack.c.bf16 %v369_v27, %v368_v26  ;;  %v372_v38 = vmax.f32 %v340_v28, 0.0  ;;  %v374_v44 = vmax.f32 %v342_v33, 0.0  ;;  %v307_v49 = vmul.f32 %v1100_v5, %v268_v35  ;;  %v281_v21 = vld [vmem:[%s1076_s27 + $0xb8] sm:$0xff]  ;;  %v282_v26 = vld [vmem:[%s1076_s27 + $0xc0] sm:$0xff]  ;;  %v283_v35 = vld [vmem:[%s1076_s27 + $0xc8] sm:$0xff] }
  0x1c   : > { %v401_v43 = vpack.c.bf16 %v371_v32, %v370_v31  ;;  %v344_v48 = vadd.f32 %v1107_v8, %v305_v40  ;;  %v308_v50 = vmul.f32 %v1100_v5, %v269_v36  ;;  %v375_v51 = vmax.f32 %v343_v34, 0.0 }
  0x1d   : > { %974 = vmatprep.mubr.msk.bf16.mxu0 %vm432_vm1, %v400_v37  ;;  %v402_v47 = vpack.c.bf16 %v373_v39, %v372_v38  ;;  %v345_v52 = vadd.f32 %v1107_v8, %v306_v45  ;;  %v309_v53 = vmul.f32 %v1100_v5, %v270_v41  ;;  %v310_v54 = vmul.f32 %v1100_v5, %v271_v42  ;;  %v285_v45 = vld [vmem:[%s1076_s27 + $0xd8] sm:$0xff] }
  0x1e   : > { %975 = vmatmul.mubr.msk.bf16.vlgmr.msra.gmra.mxu0 %vm432_vm1, %v401_v43  ;;  %v376_v56 = vmax.f32 %v344_v48, 0.0  ;;  %v346_v57 = vadd.f32 %v1107_v8, %v307_v49  ;;  %v347_v58 = vadd.f32 %v1107_v8, %v308_v50  ;;  %v311_v60 = vmul.f32 %v1100_v5, %v272_v46  ;;  %v286_v50 = vld [vmem:[%s1076_s27 + $0xe0] sm:$0xff] }
  0x1f   : > { %978 = vmatprep.mubr.msk.bf16.mxu0 %vm432_vm1, %v402_v47  ;;  %v377_v61 = vmax.f32 %v345_v52, 0.0  ;;  %v348_v62 = vadd.f32 %v1107_v8, %v309_v53  ;;  %v349_v63 = vadd.f32 %v1107_v8, %v310_v54  ;;  %v313_v1 = vmul.f32 %v1100_v5, %v274_v55 }
  0x20   : > { %v403_v4 = vpack.c.bf16 %v375_v51, %v374_v44  ;;  %v378_v6 = vmax.f32 %v346_v57, 0.0  ;;  %v379_v7 = vmax.f32 %v347_v58, 0.0  ;;  %v312_v9 = vmul.f32 %v1100_v5, %v273_v59  ;;  %v284_v44 = vld [vmem:[%s1076_s27 + $0xd0] sm:$0xff]  ;;  %v287_v51 = vld [vmem:[%s1076_s27 + $0xe8] sm:$0xff] }
  0x21   : > { %v404_v12 = vpack.c.bf16 %v377_v61, %v376_v56  ;;  %v1162_v13 = vadd.f32 %v1107_v8, %v311_v60  ;;  %v314_v14 = vmul.f32 %v1100_v5, %v275_v0  ;;  %v352_v15 = vadd.f32 %v1107_v8, %v313_v1 }
  0x22   : > { %v380_v17 = vmax.f32 %v348_v62, 0.0  ;;  %v381_v18 = vmax.f32 %v349_v63, 0.0  ;;  %v315_v19 = vmul.f32 %v1100_v5, %v276_v2  ;;  %v316_v20 = vmul.f32 %v1100_v5, %v277_v3 }
  0x23   : > { %v353_v22 = vadd.f32 %v1107_v8, %v314_v14  ;;  %v384_v23 = vmax.f32 %v352_v15, 0.0  ;;  %v317_v24 = vmul.f32 %v1100_v5, %v278_v10  ;;  %v318_v25 = vmul.f32 %v1100_v5, %v279_v11  ;;  %v289_v10 = vld [vmem:[%s1076_s27 + $0xf8] sm:$0xff] }
  0x24   : > { %v351_v27 = vadd.f32 %v1107_v8, %v312_v9  ;;  %v354_v28 = vadd.f32 %v1107_v8, %v315_v19  ;;  %v355_v29 = vadd.f32 %v1107_v8, %v316_v20  ;;  %v319_v30 = vmul.f32 %v1100_v5, %v280_v16  ;;  %v288_v9 = vld [vmem:[%s1076_s27 + $0xf0] sm:$0xff] }
  0x25   : > { %v385_v31 = vmax.f32 %v353_v22, 0.0  ;;  %v356_v32 = vadd.f32 %v1107_v8, %v317_v24  ;;  %v357_v33 = vadd.f32 %v1107_v8, %v318_v25  ;;  %v320_v34 = vmul.f32 %v1100_v5, %v281_v21 }
  0x26   : > { %979 = vmatmul.mubr.msk.bf16.gmra.mxu0 %vm432_vm1, %v403_v4  ;;  %v386_v36 = vmax.f32 %v354_v28, 0.0  ;;  %v387_v37 = vmax.f32 %v355_v29, 0.0  ;;  %v358_v38 = vadd.f32 %v1107_v8, %v319_v30  ;;  %v321_v39 = vmul.f32 %v1100_v5, %v282_v26 }
  0x27   : > { %982 = vmatprep.mubr.msk.bf16.mxu0 %vm432_vm1, %v404_v12  ;;  %v408_v40 = vpack.c.bf16 %v385_v31, %v384_v23  ;;  %v388_v41 = vmax.f32 %v356_v32, 0.0  ;;  %v389_v42 = vmax.f32 %v357_v33, 0.0  ;;  %v359_v43 = vadd.f32 %v1107_v8, %v320_v34 }
  0x28   : > { %v405_v46 = vpack.c.bf16 %v379_v7, %v378_v6  ;;  %v409_v47 = vpack.c.bf16 %v387_v37, %v386_v36  ;;  %v322_v48 = vmul.f32 %v1100_v5, %v283_v35  ;;  %v360_v49 = vadd.f32 %v1107_v8, %v321_v39 }
  0x29   : > { %v406_v52 = vpack.c.bf16 %v381_v18, %v380_v17  ;;  %990 = vmatprep.mubr.msk.bf16.mxu1 %vm432_vm1, %v408_v40  ;;  %v410_v53 = vpack.c.bf16 %v389_v42, %v388_v41  ;;  %v390_v54 = vmax.f32 %v358_v38, 0.0  ;;  %v391_v55 = vmax.f32 %v359_v43, 0.0 }
  0x2a   : > { %991 = vmatmul.mubr.msk.bf16.vlgmr.msra.gmra.mxu1 %vm432_vm1, %v409_v47  ;;  %v361_v56 = vadd.f32 %v1107_v8, %v322_v48  ;;  %v323_v57 = vmul.f32 %v1100_v5, %v284_v44  ;;  %v324_v58 = vmul.f32 %v1100_v5, %v285_v45  ;;  %v392_v59 = vmax.f32 %v360_v49, 0.0 }
  0x2b   : > { %994 = vmatprep.mubr.msk.bf16.mxu1 %vm432_vm1, %v410_v53  ;;  %v325_v60 = vmul.f32 %v1100_v5, %v286_v50  ;;  %v326_v61 = vmul.f32 %v1100_v5, %v287_v51  ;;  %v382_v62 = vmax.f32 %v1162_v13, 0.0  ;;  %v383_v63 = vmax.f32 %v351_v27, 0.0 }
  0x2c   : > { %v393_v0 = vmax.f32 %v361_v56, 0.0  ;;  %v411_v1 = vpack.c.bf16 %v391_v55, %v390_v54  ;;  %v362_v2 = vadd.f32 %v1107_v8, %v323_v57  ;;  %v363_v3 = vadd.f32 %v1107_v8, %v324_v58 }
  0x2d   : > { %v364_v6 = vadd.f32 %v1107_v8, %v325_v60  ;;  %v365_v7 = vadd.f32 %v1107_v8, %v326_v61  ;;  %v407_v11 = vpack.c.bf16 %v383_v63, %v382_v62  ;;  %v327_v14 = vmul.f32 %v1100_v5, %v288_v9 }
  0x2e   : > { %983 = vmatmul.mubr.msk.bf16.gmra.mxu0 %vm432_vm1, %v405_v46  ;;  %v412_v4 = vpack.c.bf16 %v393_v0, %v392_v59  ;;  %v394_v12 = vmax.f32 %v362_v2, 0.0  ;;  %v395_v13 = vmax.f32 %v363_v3, 0.0  ;;  %v328_v15 = vmul.f32 %v1100_v5, %v289_v10 }
  0x2f   : > { %986 = vmatprep.mubr.msk.bf16.mxu0 %vm432_vm1, %v406_v52  ;;  %v396_v16 = vmax.f32 %v364_v6, 0.0  ;;  %v397_v17 = vmax.f32 %v365_v7, 0.0  ;;  %v366_v19 = vadd.f32 %v1107_v8, %v327_v14 }
  0x30   : > { %v413_v18 = vpack.c.bf16 %v395_v13, %v394_v12  ;;  %v367_v20 = vadd.f32 %v1107_v8, %v328_v15 }
  0x31   : > { %v414_v21 = vpack.c.bf16 %v397_v17, %v396_v16  ;;  %v398_v22 = vmax.f32 %v366_v19, 0.0 }
  0x32   : > { %995 = vmatmul.mubr.msk.bf16.gmra.mxu1 %vm432_vm1, %v411_v1  ;;  %v399_v5 = vmax.f32 %v367_v20, 0.0 }
  0x33   : > { %998 = vmatprep.mubr.msk.bf16.mxu1 %vm432_vm1, %v412_v4 }
  0x34   : > { %v415_v23 = vpack.c.bf16 %v399_v5, %v398_v22 }
  0x36   : > { %987 = vmatmul.mubr.msk.bf16.gmra.mxu0 %vm432_vm1, %v407_v11 }
  0x3a   : > { %999 = vmatmul.mubr.msk.bf16.gmra.mxu1 %vm432_vm1, %v413_v18 }
  0x3b   : > { %1002 = vmatprep.mubr.msk.bf16.mxu1 %vm432_vm1, %v414_v21 }
  0x42   : > { %1003 = vmatmul.mubr.msk.bf16.gmra.mxu1 %vm432_vm1, %v415_v23 }
  0xde   : > { %v976_v24 = vpop.f32.mrf.mxu0 }
  0xdf   : > { %645 = vst.msk [vmem:[%s1081_s30 + $0x10] sm:$0xff] %vm642_vm2, %v976_v24  ;;  %v751_v28 = vmul.f32 %v976_v24, %v976_v24  ;;  %v679_v34 = vsel %vm642_vm2, %v976_v24, 0.0 }
  0xe0   : > { %v515_v25 = vpop.f32.mrf.mxu0 }
  0xe1   : > { %643 = vst.msk [vmem:[%s1081_s30] sm:$0xff] %vm642_vm2, %v515_v25  ;;  %v749_v26 = vmul.f32 %v515_v25, %v515_v25  ;;  %v676_v29 = vsel %vm642_vm2, %v515_v25, 0.0  ;;  %v784_v41 = vsel %vm642_vm2, %v751_v28, 0.0 }
  0xe2   : > { %v977_v8 = vpop.f32.mrf.mxu0 }
  0xe3   : > { %646 = vst.msk [vmem:[%s1081_s30 + $0x18] sm:$0xff] %vm642_vm2, %v977_v8  ;;  %v781_v35 = vsel %vm642_vm2, %v749_v26, 0.0  ;;  %v752_v36 = vmul.f32 %v977_v8, %v977_v8  ;;  %v681_v42 = vsel %vm642_vm2, %v977_v8, 0.0 }
  0xe4   : > { %v518_v27 = vpop.f32.mrf.mxu0 }
  0xe5   : > { %644 = vst.msk [vmem:[%s1081_s30 + $0x8] sm:$0xff] %vm642_vm2, %v518_v27  ;;  %v677_v30 = vsel %vm642_vm2, %v518_v27, 0.0  ;;  %v750_v31 = vmul.f32 %v518_v27, %v518_v27  ;;  %v786_v47 = vsel %vm642_vm2, %v752_v36, 0.0 }
  0xe6   : > { %v678_v32 = vadd.f32 %v677_v30, %v676_v29  ;;  %v980_v33 = vpop.f32.mrf.mxu0 }
  0xe7   : > { %v782_v37 = vsel %vm642_vm2, %v750_v31, 0.0  ;;  %649 = vst.msk [vmem:[%s1081_s30 + $0x30] sm:$0xff] %vm642_vm2, %v980_v33  ;;  %v755_v53 = vmul.f32 %v980_v33, %v980_v33  ;;  %v687_v61 = vsel %vm642_vm2, %v980_v33, 0.0 }
  0xe8   : > { %v680_v38 = vadd.f32 %v679_v34, %v678_v32  ;;  %v783_v39 = vadd.f32 %v782_v37, %v781_v35  ;;  %v531_v40 = vpop.f32.mrf.mxu0 }
  0xe9   : > { %647 = vst.msk [vmem:[%s1081_s30 + $0x20] sm:$0xff] %vm642_vm2, %v531_v40  ;;  %v753_v43 = vmul.f32 %v531_v40, %v531_v40  ;;  %v683_v48 = vsel %vm642_vm2, %v531_v40, 0.0  ;;  %v792_v4 = vsel %vm642_vm2, %v755_v53, 0.0 }
  0xea   : > { %v785_v44 = vadd.f32 %v784_v41, %v783_v39  ;;  %v682_v45 = vadd.f32 %v681_v42, %v680_v38  ;;  %v981_v46 = vpop.f32.mrf.mxu0  ;;  %v1243_v52 = vpop.f32.mrf.mxu1 }
  0xeb   : > { %650 = vst.msk [vmem:[%s1081_s30 + $0x38] sm:$0xff] %vm642_vm2, %v981_v46  ;;  %v788_v54 = vsel %vm642_vm2, %v753_v43, 0.0  ;;  %661 = vst.msk [vmem:[%s1081_s30 + $0x90] sm:$0xff] %vm642_vm2, %v1243_v52  ;;  %v756_v62 = vmul.f32 %v981_v46, %v981_v46  ;;  %v689_v6 = vsel %vm642_vm2, %v981_v46, 0.0 }
  0xec   : > { %v684_v49 = vadd.f32 %v683_v48, %v682_v45  ;;  %v787_v50 = vadd.f32 %v786_v47, %v785_v44  ;;  %v534_v51 = vpop.f32.mrf.mxu0  ;;  %v1252_v60 = vpop.f32.mrf.mxu1 }
  0xed   : > { %648 = vst.msk [vmem:[%s1081_s30 + $0x28] sm:$0xff] %vm642_vm2, %v534_v51  ;;  %v685_v55 = vsel %vm642_vm2, %v534_v51, 0.0  ;;  %v754_v56 = vmul.f32 %v534_v51, %v534_v51  ;;  %659 = vst.msk [vmem:[%s1081_s30 + $0x80] sm:$0xff] %vm642_vm2, %v1252_v60  ;;  %v794_v13 = vsel %vm642_vm2, %v756_v62, 0.0  ;;  %v765_v62 = vmul.f32 %v1252_v60, %v1252_v60 }
  0xee   : > { %v789_v57 = vadd.f32 %v788_v54, %v787_v50  ;;  %v686_v58 = vadd.f32 %v685_v55, %v684_v49  ;;  %v984_v59 = vpop.f32.mrf.mxu0  ;;  %v1261_v3 = vpop.f32.mrf.mxu1 }
  0xef   : > { %v790_v63 = vsel %vm642_vm2, %v754_v56, 0.0  ;;  %653 = vst.msk [vmem:[%s1081_s30 + $0x50] sm:$0xff] %vm642_vm2, %v984_v59  ;;  %662 = vst.msk [vmem:[%s1081_s30 + $0x98] sm:$0xff] %vm642_vm2, %v1261_v3  ;;  %v759_v19 = vmul.f32 %v984_v59, %v984_v59  ;;  %v695_v8 = vsel %vm642_vm2, %v984_v59, 0.0 }
  0xf0   : > { %v688_v0 = vadd.f32 %v687_v61, %v686_v58  ;;  %v791_v1 = vadd.f32 %v790_v63, %v789_v57  ;;  %v547_v2 = vpop.f32.mrf.mxu0  ;;  %v1270_v12 = vpop.f32.mrf.mxu1 }
  0xf1   : > { %651 = vst.msk [vmem:[%s1081_s30 + $0x40] sm:$0xff] %vm642_vm2, %v547_v2  ;;  %v757_v7 = vmul.f32 %v547_v2, %v547_v2  ;;  %v691_v14 = vsel %vm642_vm2, %v547_v2, 0.0  ;;  %660 = vst.msk [vmem:[%s1081_s30 + $0x88] sm:$0xff] %vm642_vm2, %v1270_v12  ;;  %v800_v32 = vsel %vm642_vm2, %v759_v19, 0.0  ;;  %v768_v19 = vmul.f32 %v1261_v3, %v1261_v3 }
  0xf2   : > { %v793_v9 = vadd.f32 %v792_v4, %v791_v1  ;;  %v690_v10 = vadd.f32 %v689_v6, %v688_v0  ;;  %v985_v11 = vpop.f32.mrf.mxu0  ;;  %v1279_v18 = vpop.f32.mrf.mxu1  ;;  %v707_v4 = vsel %vm642_vm2, %v1252_v60, 0.0  ;;  %v766_v6 = vmul.f32 %v1270_v12, %v1270_v12 }
  0xf3   : > { %654 = vst.msk [vmem:[%s1081_s30 + $0x58] sm:$0xff] %vm642_vm2, %v985_v11  ;;  %v796_v20 = vsel %vm642_vm2, %v757_v7, 0.0  ;;  %665 = vst.msk [vmem:[%s1081_s30 + $0xb0] sm:$0xff] %vm642_vm2, %v1279_v18  ;;  %v760_v26 = vmul.f32 %v985_v11, %v985_v11  ;;  %v697_v33 = vsel %vm642_vm2, %v985_v11, 0.0  ;;  %v767_v11 = vmul.f32 %v1243_v52, %v1243_v52 }
  0xf4   : > { %v692_v15 = vadd.f32 %v691_v14, %v690_v10  ;;  %v795_v16 = vadd.f32 %v794_v13, %v793_v9  ;;  %v550_v17 = vpop.f32.mrf.mxu0  ;;  %v1288_v25 = vpop.f32.mrf.mxu1  ;;  %v812_v13 = vsel %vm642_vm2, %v765_v62, 0.0  ;;  %v709_v14 = vsel %vm642_vm2, %v1270_v12, 0.0 }
  0xf5   : > { %652 = vst.msk [vmem:[%s1081_s30 + $0x48] sm:$0xff] %vm642_vm2, %v550_v17  ;;  %v693_v21 = vsel %vm642_vm2, %v550_v17, 0.0  ;;  %v758_v22 = vmul.f32 %v550_v17, %v550_v17  ;;  %663 = vst.msk [vmem:[%s1081_s30 + $0xa0] sm:$0xff] %vm642_vm2, %v1288_v25  ;;  %v802_v39 = vsel %vm642_vm2, %v760_v26, 0.0  ;;  %v711_v17 = vsel %vm642_vm2, %v1243_v52, 0.0 }
  0xf6   : > { %v797_v5 = vadd.f32 %v796_v20, %v795_v16  ;;  %v694_v23 = vadd.f32 %v693_v21, %v692_v15  ;;  %v988_v24 = vpop.f32.mrf.mxu0  ;;  %v1297_v31 = vpop.f32.mrf.mxu1  ;;  %v814_v20 = vsel %vm642_vm2, %v766_v6, 0.0  ;;  %v769_v52 = vmul.f32 %v1288_v25, %v1288_v25 }
  0xf7   : > { %v798_v27 = vsel %vm642_vm2, %v758_v22, 0.0  ;;  %657 = vst.msk [vmem:[%s1081_s30 + $0x70] sm:$0xff] %vm642_vm2, %v988_v24  ;;  %666 = vst.msk [vmem:[%s1081_s30 + $0xb8] sm:$0xff] %vm642_vm2, %v1297_v31  ;;  %v763_v45 = vmul.f32 %v988_v24, %v988_v24  ;;  %v703_v53 = vsel %vm642_vm2, %v988_v24, 0.0 }
  0xf8   : > { %v696_v28 = vadd.f32 %v695_v8, %v694_v23  ;;  %v799_v29 = vadd.f32 %v798_v27, %v797_v5  ;;  %v563_v30 = vpop.f32.mrf.mxu0  ;;  %v1306_v38 = vpop.f32.mrf.mxu1  ;;  %v816_v5 = vsel %vm642_vm2, %v767_v11, 0.0  ;;  %v713_v23 = vsel %vm642_vm2, %v1261_v3, 0.0 }
  0xf9   : > { %655 = vst.msk [vmem:[%s1081_s30 + $0x60] sm:$0xff] %vm642_vm2, %v563_v30  ;;  %v761_v34 = vmul.f32 %v563_v30, %v563_v30  ;;  %v699_v40 = vsel %vm642_vm2, %v563_v30, 0.0  ;;  %664 = vst.msk [vmem:[%s1081_s30 + $0xa8] sm:$0xff] %vm642_vm2, %v1306_v38  ;;  %v808_v59 = vsel %vm642_vm2, %v763_v45, 0.0  ;;  %v818_v27 = vsel %vm642_vm2, %v768_v19, 0.0 }
  0xfa   : > { %v801_v35 = vadd.f32 %v800_v32, %v799_v29  ;;  %v698_v36 = vadd.f32 %v697_v33, %v696_v28  ;;  %v989_v37 = vpop.f32.mrf.mxu0  ;;  %v1315_v44 = vpop.f32.mrf.mxu1  ;;  %v715_v28 = vsel %vm642_vm2, %v1288_v25, 0.0  ;;  %v770_v29 = vmul.f32 %v1306_v38, %v1306_v38 }
  0xfb   : > { %658 = vst.msk [vmem:[%s1081_s30 + $0x78] sm:$0xff] %vm642_vm2, %v989_v37  ;;  %v804_v46 = vsel %vm642_vm2, %v761_v34, 0.0  ;;  %669 = vst.msk [vmem:[%s1081_s30 + $0xd0] sm:$0xff] %vm642_vm2, %v1315_v44  ;;  %v764_v54 = vmul.f32 %v989_v37, %v989_v37  ;;  %v705_v61 = vsel %vm642_vm2, %v989_v37, 0.0  ;;  %v771_v32 = vmul.f32 %v1279_v18, %v1279_v18 }
  0xfc   : > { %v700_v41 = vadd.f32 %v699_v40, %v698_v36  ;;  %v803_v42 = vadd.f32 %v802_v39, %v801_v35  ;;  %v566_v43 = vpop.f32.mrf.mxu0  ;;  %v1324_v51 = vpop.f32.mrf.mxu1  ;;  %v820_v33 = vsel %vm642_vm2, %v769_v52, 0.0  ;;  %v717_v34 = vsel %vm642_vm2, %v1306_v38, 0.0 }
  0xfd   : > { %656 = vst.msk [vmem:[%s1081_s30 + $0x68] sm:$0xff] %vm642_vm2, %v566_v43  ;;  %v701_v47 = vsel %vm642_vm2, %v566_v43, 0.0  ;;  %v762_v48 = vmul.f32 %v566_v43, %v566_v43  ;;  %667 = vst.msk [vmem:[%s1081_s30 + $0xc0] sm:$0xff] %vm642_vm2, %v1324_v51  ;;  %v810_v2 = vsel %vm642_vm2, %v764_v54, 0.0  ;;  %v719_v25 = vsel %vm642_vm2, %v1279_v18, 0.0 }
  0xfe   : > { %v805_v49 = vadd.f32 %v804_v46, %v803_v42  ;;  %v702_v50 = vadd.f32 %v701_v47, %v700_v41  ;;  %v1331_v58 = vpop.f32.mrf.mxu1  ;;  %v772_v37 = vmul.f32 %v1297_v31, %v1297_v31  ;;  %v822_v39 = vsel %vm642_vm2, %v770_v29, 0.0 }
  0xff   : > { %v806_v55 = vsel %vm642_vm2, %v762_v48, 0.0  ;;  %670 = vst.msk [vmem:[%s1081_s30 + $0xd8] sm:$0xff] %vm642_vm2, %v1331_v58  ;;  %v824_v42 = vsel %vm642_vm2, %v771_v32, 0.0  ;;  %v721_v43 = vsel %vm642_vm2, %v1297_v31, 0.0  ;;  %v773_v38 = vmul.f32 %v1324_v51, %v1324_v51 }
 0x100   : > { %v704_v56 = vadd.f32 %v703_v53, %v702_v50  ;;  %v807_v57 = vadd.f32 %v806_v55, %v805_v49  ;;  %v614_v1 = vpop.f32.mrf.mxu1  ;;  %v826_v47 = vsel %vm642_vm2, %v772_v37, 0.0  ;;  %v723_v18 = vsel %vm642_vm2, %v1324_v51, 0.0 }
 0x101   : > { %668 = vst.msk [vmem:[%s1081_s30 + $0xc8] sm:$0xff] %vm642_vm2, %v614_v1  ;;  %v774_v48 = vmul.f32 %v614_v1, %v614_v1  ;;  %v775_v53 = vmul.f32 %v1315_v44, %v1315_v44  ;;  %v828_v54 = vsel %vm642_vm2, %v773_v38, 0.0  ;;  %v725_v31 = vsel %vm642_vm2, %v614_v1, 0.0 }
 0x102   : > { %v706_v63 = vadd.f32 %v705_v61, %v704_v56  ;;  %v809_v0 = vadd.f32 %v808_v59, %v807_v57  ;;  %v1347_v10 = vpop.f32.mrf.mxu1  ;;  %v727_v57 = vsel %vm642_vm2, %v1315_v44, 0.0  ;;  %v776_v59 = vmul.f32 %v1331_v58, %v1331_v58 }
 0x103   : > { %673 = vst.msk [vmem:[%s1081_s30 + $0xf0] sm:$0xff] %vm642_vm2, %v1347_v10  ;;  %v830_v51 = vsel %vm642_vm2, %v774_v48, 0.0 }
 0x104   : > { %v811_v7 = vadd.f32 %v810_v2, %v809_v0  ;;  %v708_v9 = vadd.f32 %v707_v4, %v706_v63  ;;  %v627_v16 = vpop.f32.mrf.mxu1  ;;  %v832_v63 = vsel %vm642_vm2, %v775_v53, 0.0  ;;  %v729_v0 = vsel %vm642_vm2, %v1331_v58, 0.0 }
 0x105   : > { %671 = vst.msk [vmem:[%s1081_s30 + $0xe0] sm:$0xff] %vm642_vm2, %v627_v16  ;;  %v777_v2 = vmul.f32 %v627_v16, %v627_v16  ;;  %v834_v6 = vsel %vm642_vm2, %v776_v59, 0.0  ;;  %v735_v58 = vsel %vm642_vm2, %v1347_v10, 0.0 }
 0x106   : > { %v710_v60 = vadd.f32 %v709_v14, %v708_v9  ;;  %v813_v15 = vadd.f32 %v812_v13, %v811_v7  ;;  %v1364_v12 = vpop.f32.mrf.mxu1  ;;  %v731_v7 = vsel %vm642_vm2, %v627_v16, 0.0  ;;  %v779_v13 = vmul.f32 %v1347_v10, %v1347_v10 }
 0x107   : > { %674 = vst.msk [vmem:[%s1081_s30 + $0xf8] sm:$0xff] %vm642_vm2, %v1364_v12  ;;  %v836_v14 = vsel %vm642_vm2, %v777_v2, 0.0  ;;  %v780_v19 = vmul.f32 %v1364_v12, %v1364_v12 }
 0x108   : > { %v712_v21 = vadd.f32 %v711_v17, %v710_v60  ;;  %v815_v22 = vadd.f32 %v814_v20, %v813_v15  ;;  %v630_v26 = vpop.f32.mrf.mxu1 }
 0x109   : > { %672 = vst.msk [vmem:[%s1081_s30 + $0xe8] sm:$0xff] %vm642_vm2, %v630_v26  ;;  %v778_v44 = vmul.f32 %v630_v26, %v630_v26  ;;  %v733_v60 = vsel %vm642_vm2, %v630_v26, 0.0 }
 0x10a   : > { %v817_v24 = vadd.f32 %v816_v5, %v815_v22  ;;  %v714_v8 = vadd.f32 %v713_v23, %v712_v21  ;;  %v840_v22 = vsel %vm642_vm2, %v779_v13, 0.0  ;;  %v737_v5 = vsel %vm642_vm2, %v1364_v12, 0.0 }
 0x10b   : > { %v838_v16 = vsel %vm642_vm2, %v778_v44, 0.0 }
 0x10c   : > { %v716_v3 = vadd.f32 %v715_v28, %v714_v8  ;;  %v819_v30 = vadd.f32 %v818_v27, %v817_v24  ;;  %v842_v24 = vsel %vm642_vm2, %v780_v19, 0.0 }
 0x10e   : > { %v821_v35 = vadd.f32 %v820_v33, %v819_v30  ;;  %v718_v36 = vadd.f32 %v717_v34, %v716_v3  ;;  %v675_v34 = vld [vmem:[%s1446_s5] sm:$0x1] }
 0x110   : > { %v720_v40 = vadd.f32 %v719_v25, %v718_v36  ;;  %v823_v41 = vadd.f32 %v822_v39, %v821_v35  ;;  %v748_v36 = vld [vmem:[%s1447_s6] sm:$0x1] }
 0x112   : > { %v825_v45 = vadd.f32 %v824_v42, %v823_v41  ;;  %v722_v46 = vadd.f32 %v721_v43, %v720_v40 }
 0x114   : > { %v724_v49 = vadd.f32 %v723_v18, %v722_v46  ;;  %v827_v50 = vadd.f32 %v826_v47, %v825_v45 }
 0x116   : > { %v829_v55 = vadd.f32 %v828_v54, %v827_v50  ;;  %v726_v56 = vadd.f32 %v725_v31, %v724_v49 }
 0x118   : > { %v728_v61 = vadd.f32 %v727_v57, %v726_v56  ;;  %v831_v62 = vadd.f32 %v830_v51, %v829_v55 }
 0x11a   : > { %v833_v4 = vadd.f32 %v832_v63, %v831_v62  ;;  %v730_v1 = vadd.f32 %v729_v0, %v728_v61 }
 0x11c   : > { %v732_v9 = vadd.f32 %v731_v7, %v730_v1  ;;  %v835_v11 = vadd.f32 %v834_v6, %v833_v4 }
 0x11e   : > { %v837_v15 = vadd.f32 %v836_v14, %v835_v11  ;;  %v734_v17 = vadd.f32 %v733_v60, %v732_v9 }
 0x120   : > { %v736_v20 = vadd.f32 %v735_v58, %v734_v17  ;;  %v839_v21 = vadd.f32 %v838_v16, %v837_v15 }
 0x122   : > { %v738_v23 = vadd.f32 %v737_v5, %v736_v20  ;;  %v841_v52 = vadd.f32 %v840_v22, %v839_v21 }
 0x124   : > { %v739_v8 = vrot.slane %v738_v23, 4  ;;  %v843_v26 = vadd.f32 %v842_v24, %v841_v52 }
 0x126   : > { %v740_v27 = vadd.f32 %v739_v8, %v738_v23  ;;  %v844_v10 = vrot.slane %v843_v26, 4 }
 0x128   : > { %v741_v28 = vrot.slane %v740_v27, 2  ;;  %v845_v29 = vadd.f32 %v844_v10, %v843_v26 }
 0x12a   : > { %v742_v3 = vadd.f32 %v741_v28, %v740_v27  ;;  %v846_v30 = vrot.slane %v845_v29, 2 }
 0x12c   : > { %v743_v32 = vrot.slane %v742_v3, 1  ;;  %v847_v33 = vadd.f32 %v846_v30, %v845_v29 }
 0x12e   : > { %v744_v35 = vadd.f32 %v743_v32, %v742_v3  ;;  %v848_v12 = vrot.slane %v847_v33, 1 }
 0x130   : > { %v745_v25 = vadd.f32 %v744_v35, %v675_v34  ;;  %v849_v37 = vadd.f32 %v848_v12, %v847_v33 }
 0x132   : > { %747 = vst.msk [vmem:[%s1446_s5] sm:$0x1] %vm746_vm3, %v745_v25  ;;  %v850_v39 = vadd.f32 %v849_v37, %v748_v36 }
 0x134   : > { %851 = vst.msk [vmem:[%s1447_s6] sm:$0x1] %vm746_vm3, %v850_v39 }
 0x135 PF: > { %s17_s21 = sadd.s32 1, %s1027_s21  }
 0x136   : > { %p14_p5 = scmp.ge.s32.totalorder %s17_s21, 4  }
 0x138   :  { %16 = sbr.rel (!%p14_p5) target bundleno = 1 (0x1), region = 86 }

// kernel: bottleneck_forward.5
= control target key start
LH: loop header
LB: loop body
LE: loop exit
PB: predicated region body
PF: predicated region fallthrough
CT: control target
= control target key end

     0   :  { %s4226_s21 = smov 0   ;;  %s5544_s0 = inlined_call_operand.vmem [shape: f32[2,16,16,32], index: 0, kind: input, shape index: {}]   ;;  %s5545_s1 = inlined_call_operand.vmem [shape: f32[1,32], index: 1, kind: input, shape index: {}]   ;;  %s5546_s2 = inlined_call_operand.vmem [shape: f32[1,32], index: 2, kind: input, shape index: {}]   ;;  %s5547_s3 = inlined_call_operand.vmem [shape: bf16[9,32,32], index: 3, kind: input, shape index: {}]   ;;  %s5548_s4 = inlined_call_operand.vmem [shape: f32[512,32], index: 4, kind: output, shape index: {0}]   ;;  %s5549_s5 = inlined_call_operand.vmem [shape: f32[1,32], index: 5, kind: output, shape index: {1}]   ;;  %s5550_s6 = inlined_call_operand.vmem [shape: f32[1,32], index: 6, kind: output, shape index: {2}]  }
   0x1 LB: > { %s3454_s22 = sadd.s32 4294967295, %s4187_s21   ;;  %p3458_p0 = scmp.ge.s32.totalorder %s4187_s21, 1  ;;  %s4187_s21 = sphi %s4226_s21, %s17_s21  }
   0x2   : > { %p207_p1 = scmp.lt.s32.totalorder %s4187_s21, 3 }
   0x4   : > { %p208_p2 = pnand %p3458_p0, %p207_p1 }
   0x6   : > { %211 = sbr.rel (%p208_p2) target bundleno = 568 (0x238), region = 36 }
   0xb   : > { %p237_p3 = scmp.lt.s32.totalorder %s3454_s22, 1  ;;  %s3461_s23 = sshll.u32 %s3454_s22, 5 }
   0xc   : > { %p243_p4 = scmp.lt.s32.totalorder %s3461_s23, 63  ;;  %p3463_p5 = scmp.ne.s32.totalorder %s3454_s22, 0 }
   0xd   : > { %s238_s24 = scalar_select %p237_p3, %s3454_s22, 1 }
   0xe   : > { %s5638_s23 = smov (!%p243_p4, %s3461_s23), 63  ;;  %252 = sbr.rel (%p3463_p5) target bundleno = 21 (0x15), region = 40 }
   0xf   : > { %s3662_s25 = sshll.u32 %s238_s24, 8  ;;  %s3462_s29 = sshll.u32 %s5638_s23, 3 }
  0x10   : > { %s4237_s28 = scalar_lea.vmem %s5544_s0, %s3662_s25  ;;  %s4242_s8 = scalar_lea.vmem %s5548_s4, %s3462_s29 }
  0x13   : > { %vm253_vm0 = vcmask 253952   ;;  %v4189_v0 = vmov 0.0  }
  0x14   : > { %254 = vst.msk [vmem:[%s5549_s5] sm:$0x1] %vm253_vm0, %v4189_v0  ;;  %255 = vst.msk [vmem:[%s5550_s6] sm:$0x1] %vm253_vm0, %v4189_v0 }
  0x15 PF: > { %v4163_v1 = vld [vmem:[%s5547_s3 + $0x18] sm:$0xff]   ;;  %vm398_vm1 = vcmask 261120   ;;  %v4256_v2 = vld [vmem:[%s5547_s3 + $0x10] sm:$0xff]   ;;  %v4190_v3 = vmov 0.0   ;;  %vm401_vm2 = vcmask 254976   ;;  %v256_v4 = vld [vmem:[%s4237_s28] sm:$0xff] }
  0x16   : > { %3825 = vmatprep.subr.bf16.mxu0 %v4163_v1  ;;  %4149 = vmatprep.subr.bf16.mxu1 %v4163_v1  ;;  %399 = vst.msk [vmem:[#allocation2] sm:$0xff] %vm398_vm1, %v4190_v3  ;;  %400 = vst.msk [vmem:[#allocation2 + $0x8] sm:$0xff] %vm398_vm1, %v4190_v3  ;;  %v257_v5 = vld [vmem:[%s4237_s28 + $0x8] sm:$0xff]  ;;  %v4299_v6 = vld [vmem:[%s5545_s1] ss:$0 sm:$0xff]  ;;  %vm3280_vm3 = vcmask 253952  }
  0x17   : > { %403 = vst.msk [vmem:[#allocation2 + $0x18] sm:$0xff] %vm398_vm1, %v4190_v3  ;;  %404 = vst.msk [vmem:[#allocation2 + $0x20] sm:$0xff] %vm398_vm1, %v4190_v3  ;;  %3826 = vmatpush3.bf16.msra.mxu0 %v4163_v1  ;;  %4151 = vmatpush3.bf16.msra.mxu1 %v4163_v1  ;;  %v295_v7 = vmul.f32 %v4299_v6, %v256_v4  ;;  %v296_v8 = vmul.f32 %v4299_v6, %v257_v5  ;;  %v4324_v9 = vld [vmem:[%s5546_s2] ss:$0 sm:$0xff]  ;;  %v270_v10 = vld [vmem:[%s4237_s28 + $0x70] sm:$0xff] }
  0x18   : > { %406 = vst.msk [vmem:[#allocation2 + $0x30] sm:$0xff] %vm398_vm1, %v4190_v3  ;;  %407 = vst.msk [vmem:[#allocation2 + $0x38] sm:$0xff] %vm398_vm1, %v4190_v3  ;;  %v271_v11 = vld [vmem:[%s4237_s28 + $0x78] sm:$0xff]  ;;  %3827 = vmatprep.subr.bf16.mxu0 %v4256_v2  ;;  %4150 = vmatprep.subr.bf16.mxu1 %v4256_v2  ;;  %v309_v12 = vmul.f32 %v4299_v6, %v270_v10  ;;  %v4335_v14 = vld [vmem:[%s5547_s3 + $0x8] sm:$0xff]  }
  0x19   : > { %409 = vst.msk [vmem:[#allocation2 + $0x48] sm:$0xff] %vm398_vm1, %v4190_v3  ;;  %410 = vst.msk [vmem:[#allocation2 + $0x50] sm:$0xff] %vm398_vm1, %v4190_v3  ;;  %v310_v13 = vmul.f32 %v4299_v6, %v271_v11  ;;  %v334_v15 = vadd.f32 %v4324_v9, %v295_v7  ;;  %v335_v16 = vadd.f32 %v4324_v9, %v296_v8  ;;  %v272_v17 = vld [vmem:[%s4237_s28 + $0x80] sm:$0xff]  ;;  %v273_v18 = vld [vmem:[%s4237_s28 + $0x88] sm:$0xff] }
  0x1a   : > { %412 = vst.msk [vmem:[#allocation2 + $0x60] sm:$0xff] %vm398_vm1, %v4190_v3  ;;  %413 = vst.msk [vmem:[#allocation2 + $0x68] sm:$0xff] %vm398_vm1, %v4190_v3  ;;  %v348_v19 = vadd.f32 %v4324_v9, %v309_v12  ;;  %v311_v21 = vmul.f32 %v4299_v6, %v272_v17  ;;  %v312_v22 = vmul.f32 %v4299_v6, %v273_v18  ;;  %v4348_v23 = vld [vmem:[%s5547_s3 + $0x28] sm:$0xff]   ;;  %v258_v24 = vld [vmem:[%s4237_s28 + $0x10] sm:$0xff] }
  0x1b   : > { %415 = vst.msk [vmem:[#allocation2 + $0x78] sm:$0xff] %vm398_vm1, %v4190_v3  ;;  %416 = vst.msk [vmem:[#allocation2 + $0x80] sm:$0xff] %vm398_vm1, %v4190_v3  ;;  %v349_v20 = vadd.f32 %v4324_v9, %v310_v13  ;;  %3828 = vmatpush3.bf16.msra.mxu0 %v4256_v2  ;;  %4152 = vmatpush3.bf16.msra.mxu1 %v4256_v2  ;;  %v366_v25 = vmax.f32 %v334_v15, 0.0  ;;  %v367_v26 = vmax.f32 %v335_v16, 0.0  ;;  %v259_v27 = vld [vmem:[%s4237_s28 + $0x18] sm:$0xff]  ;;  %v260_v29 = vld [vmem:[%s4237_s28 + $0x20] sm:$0xff] }
  0x1c   : > { %418 = vst.msk [vmem:[#allocation2 + $0x90] sm:$0xff] %vm398_vm1, %v4190_v3  ;;  %419 = vst.msk [vmem:[#allocation2 + $0x98] sm:$0xff] %vm398_vm1, %v4190_v3  ;;  %v297_v28 = vmul.f32 %v4299_v6, %v258_v24  ;;  %v261_v30 = vld [vmem:[%s4237_s28 + $0x28] sm:$0xff]  ;;  %v380_v31 = vmax.f32 %v348_v19, 0.0  ;;  %3861 = vmatprep.subr.bf16.mxu1 %v4335_v14  ;;  %v350_v33 = vadd.f32 %v4324_v9, %v311_v21  ;;  %3897 = vmatprep.subr.bf16.mxu0 %v4348_v23  ;;  %v274_v35 = vld [vmem:[%s4237_s28 + $0x90] sm:$0xff] }
  0x1d   : > { %421 = vst.msk [vmem:[#allocation2 + $0xa8] sm:$0xff] %vm398_vm1, %v4190_v3  ;;  %422 = vst.msk [vmem:[#allocation2 + $0xb0] sm:$0xff] %vm398_vm1, %v4190_v3  ;;  %v381_v32 = vmax.f32 %v349_v20, 0.0  ;;  %v351_v34 = vadd.f32 %v4324_v9, %v312_v22  ;;  %v275_v36 = vld [vmem:[%s4237_s28 + $0x98] sm:$0xff]  ;;  %v539_v37 = vld [vmem:[#allocation2 + $0x1] sm:$0xff]  ;;  %v298_v38 = vmul.f32 %v4299_v6, %v259_v27  ;;  %v299_v40 = vmul.f32 %v4299_v6, %v260_v29 }
  0x1e   : > { %424 = vst.msk [vmem:[#allocation2 + $0xc0] sm:$0xff] %vm398_vm1, %v4190_v3  ;;  %425 = vst.msk [vmem:[#allocation2 + $0xc8] sm:$0xff] %vm398_vm1, %v4190_v3  ;;  %v336_v39 = vadd.f32 %v4324_v9, %v297_v28  ;;  %v300_v41 = vmul.f32 %v4299_v6, %v261_v30  ;;  %v276_v42 = vld [vmem:[%s4237_s28 + $0xa0] sm:$0xff]  ;;  %v382_v44 = vmax.f32 %v350_v33, 0.0  ;;  %v313_v46 = vmul.f32 %v4299_v6, %v274_v35  ;;  %v277_v48 = vld [vmem:[%s4237_s28 + $0xa8] sm:$0xff] }
  0x1f   : > { %427 = vst.msk [vmem:[#allocation2 + $0xd8] sm:$0xff] %vm398_vm1, %v4190_v3  ;;  %428 = vst.msk [vmem:[#allocation2 + $0xe0] sm:$0xff] %vm398_vm1, %v4190_v3  ;;  %v383_v45 = vmax.f32 %v351_v34, 0.0  ;;  %v314_v47 = vmul.f32 %v4299_v6, %v275_v36  ;;  %v262_v49 = vld [vmem:[%s4237_s28 + $0x30] sm:$0xff]  ;;  %v337_v51 = vadd.f32 %v4324_v9, %v298_v38  ;;  %v338_v53 = vadd.f32 %v4324_v9, %v299_v40  ;;  %v263_v54 = vld [vmem:[%s4237_s28 + $0x38] sm:$0xff] }
  0x20   : > { %430 = vst.msk [vmem:[#allocation2 + $0xf0] sm:$0xff] %vm398_vm1, %v4190_v3  ;;  %431 = vst.msk [vmem:[#allocation2 + $0xf8] sm:$0xff] %vm398_vm1, %v4190_v3  ;;  %v368_v52 = vmax.f32 %v336_v39, 0.0  ;;  %v264_v55 = vld [vmem:[%s4237_s28 + $0x40] sm:$0xff]  ;;  %v339_v56 = vadd.f32 %v4324_v9, %v300_v41  ;;  %v352_v57 = vadd.f32 %v4324_v9, %v313_v46  ;;  %v315_v59 = vmul.f32 %v4299_v6, %v276_v42  ;;  %v265_v60 = vld [vmem:[%s4237_s28 + $0x48] sm:$0xff] }
  0x21   : > { %433 = vst.msk [vmem:[#allocation2 + $0x108] sm:$0xff] %vm398_vm1, %v4190_v3  ;;  %434 = vst.msk [vmem:[#allocation2 + $0x110] sm:$0xff] %vm398_vm1, %v4190_v3  ;;  %v353_v58 = vadd.f32 %v4324_v9, %v314_v47  ;;  %v369_v61 = vmax.f32 %v337_v51, 0.0  ;;  %v370_v62 = vmax.f32 %v338_v53, 0.0  ;;  %v316_v63 = vmul.f32 %v4299_v6, %v277_v48  ;;  %v278_v1 = vld [vmem:[%s4237_s28 + $0xb0] sm:$0xff]  ;;  %v279_v2 = vld [vmem:[%s4237_s28 + $0xb8] sm:$0xff] }
  0x22   : > { %436 = vst.msk [vmem:[#allocation2 + $0x120] sm:$0xff] %vm398_vm1, %v4190_v3  ;;  %437 = vst.msk [vmem:[#allocation2 + $0x128] sm:$0xff] %vm398_vm1, %v4190_v3  ;;  %v301_v0 = vmul.f32 %v4299_v6, %v262_v49  ;;  %v384_v4 = vmax.f32 %v352_v57, 0.0  ;;  %v354_v7 = vadd.f32 %v4324_v9, %v315_v59  ;;  %v302_v10 = vmul.f32 %v4299_v6, %v263_v54  ;;  %v280_v13 = vld [vmem:[%s4237_s28 + $0xc0] sm:$0xff]  ;;  %v281_v15 = vld [vmem:[%s4237_s28 + $0xc8] sm:$0xff] }
  0x23   : > { %439 = vst.msk [vmem:[#allocation2 + $0x138] sm:$0xff] %vm398_vm1, %v4190_v3  ;;  %440 = vst.msk [vmem:[#allocation2 + $0x140] sm:$0xff] %vm398_vm1, %v4190_v3  ;;  %v385_v5 = vmax.f32 %v353_v58, 0.0  ;;  %v355_v8 = vadd.f32 %v4324_v9, %v316_v63  ;;  %v303_v12 = vmul.f32 %v4299_v6, %v264_v55  ;;  %v304_v19 = vmul.f32 %v4299_v6, %v265_v60  ;;  %v4411_v22 = vld [vmem:[%s5547_s3 + $0x20] sm:$0xff]   ;;  %v266_v30 = vld [vmem:[%s4237_s28 + $0x50] sm:$0xff] }
  0x24   : > { %442 = vst.msk [vmem:[#allocation2 + $0x150] sm:$0xff] %vm398_vm1, %v4190_v3  ;;  %443 = vst.msk [vmem:[#allocation2 + $0x158] sm:$0xff] %vm398_vm1, %v4190_v3  ;;  %v340_v11 = vadd.f32 %v4324_v9, %v301_v0  ;;  %v386_v18 = vmax.f32 %v354_v7, 0.0  ;;  %v317_v20 = vmul.f32 %v4299_v6, %v278_v1  ;;  %v318_v21 = vmul.f32 %v4299_v6, %v279_v2  ;;  %v267_v35 = vld [vmem:[%s4237_s28 + $0x58] sm:$0xff]  ;;  %v268_v36 = vld [vmem:[%s4237_s28 + $0x60] sm:$0xff] }
  0x25   : > { %445 = vst.msk [vmem:[#allocation2 + $0x168] sm:$0xff] %vm398_vm1, %v4190_v3  ;;  %446 = vst.msk [vmem:[#allocation2 + $0x170] sm:$0xff] %vm398_vm1, %v4190_v3  ;;  %v387_v27 = vmax.f32 %v355_v8, 0.0  ;;  %v341_v28 = vadd.f32 %v4324_v9, %v302_v10  ;;  %v343_v33 = vadd.f32 %v4324_v9, %v304_v19  ;;  %v319_v42 = vmul.f32 %v4299_v6, %v280_v13  ;;  %v284_v55 = vld [vmem:[%s4237_s28 + $0xe0] sm:$0xff]  ;;  %v4473_v10 = vld [vmem:[%s5547_s3 + $0x38] sm:$0xff]  }
  0x26   : > { %448 = vst.msk [vmem:[#allocation2 + $0x180] sm:$0xff] %vm398_vm1, %v4190_v3  ;;  %449 = vst.msk [vmem:[#allocation2 + $0x188] sm:$0xff] %vm398_vm1, %v4190_v3  ;;  %v372_v29 = vmax.f32 %v340_v11, 0.0  ;;  %v356_v34 = vadd.f32 %v4324_v9, %v317_v20  ;;  %v357_v41 = vadd.f32 %v4324_v9, %v318_v21  ;;  %v305_v54 = vmul.f32 %v4299_v6, %v266_v30 }
  0x27   : > { %451 = vst.msk [vmem:[#allocation2 + $0x198] sm:$0xff] %vm398_vm1, %v4190_v3  ;;  %452 = vst.msk [vmem:[#allocation2 + $0x1a0] sm:$0xff] %vm398_vm1, %v4190_v3  ;;  %v373_v40 = vmax.f32 %v341_v28, 0.0  ;;  %v375_v48 = vmax.f32 %v343_v33, 0.0  ;;  %v306_v59 = vmul.f32 %v4299_v6, %v267_v35  ;;  %v307_v60 = vmul.f32 %v4299_v6, %v268_v36 }
  0x28   : > { %402 = vst.msk [vmem:[#allocation2 + $0x10] sm:$0x3] %vm401_vm2, %v4190_v3  ;;  %405 = vst.msk [vmem:[#allocation2 + $0x28] sm:$0x3] %vm401_vm2, %v4190_v3  ;;  %v388_v49 = vmax.f32 %v356_v34, 0.0  ;;  %v389_v51 = vmax.f32 %v357_v41, 0.0  ;;  %v323_v21 = vmul.f32 %v4299_v6, %v284_v55 }
  0x29   : > { %408 = vst.msk [vmem:[#allocation2 + $0x40] sm:$0x3] %vm401_vm2, %v4190_v3  ;;  %411 = vst.msk [vmem:[#allocation2 + $0x58] sm:$0x3] %vm401_vm2, %v4190_v3  ;;  %v346_v13 = vadd.f32 %v4324_v9, %v307_v60 }
  0x2a   : > { %414 = vst.msk [vmem:[#allocation2 + $0x70] sm:$0x3] %vm401_vm2, %v4190_v3  ;;  %417 = vst.msk [vmem:[#allocation2 + $0x88] sm:$0x3] %vm401_vm2, %v4190_v3  ;;  %v362_v33 = vadd.f32 %v4324_v9, %v323_v21 }
  0x2b   : > { %420 = vst.msk [vmem:[#allocation2 + $0xa0] sm:$0x3] %vm401_vm2, %v4190_v3  ;;  %423 = vst.msk [vmem:[#allocation2 + $0xb8] sm:$0x3] %vm401_vm2, %v4190_v3 }
  0x2c   : > { %426 = vst.msk [vmem:[#allocation2 + $0xd0] sm:$0x3] %vm401_vm2, %v4190_v3  ;;  %429 = vst.msk [vmem:[#allocation2 + $0xe8] sm:$0x3] %vm401_vm2, %v4190_v3  ;;  %v394_v41 = vmax.f32 %v362_v33, 0.0 }
  0x2d   : > { %432 = vst.msk [vmem:[#allocation2 + $0x100] sm:$0x3] %vm401_vm2, %v4190_v3  ;;  %435 = vst.msk [vmem:[#allocation2 + $0x118] sm:$0x3] %vm401_vm2, %v4190_v3 }
  0x2e   : > { %438 = vst.msk [vmem:[#allocation2 + $0x130] sm:$0x3] %vm401_vm2, %v4190_v3  ;;  %441 = vst.msk [vmem:[#allocation2 + $0x148] sm:$0x3] %vm401_vm2, %v4190_v3 }
  0x2f   : > { %444 = vst.msk [vmem:[#allocation2 + $0x160] sm:$0x3] %vm401_vm2, %v4190_v3  ;;  %447 = vst.msk [vmem:[#allocation2 + $0x178] sm:$0x3] %vm401_vm2, %v4190_v3  ;;  %v540_v43 = vld [vmem:[#allocation2 + $0x9] sm:$0xff] }
  0x30   : > { %450 = vst.msk [vmem:[#allocation2 + $0x190] sm:$0x3] %vm401_vm2, %v4190_v3  ;;  %453 = vst.msk [vmem:[#allocation2 + $0x1a8] sm:$0x3] %vm401_vm2, %v4190_v3  ;;  %v571_v50 = vpack.c.bf16 %v540_v43, %v539_v37  ;;  %v371_v3 = vmax.f32 %v339_v56, 0.0  ;;  %v269_v37 = vld [vmem:[%s4237_s28 + $0x68] sm:$0xff]  ;;  %v320_v43 = vmul.f32 %v4299_v6, %v281_v15 }
  0x31   : > { %455 = vst.msk [vmem:[#allocation2 + $0x19] sm:$0xff] %vm398_vm1, %v366_v25  ;;  %456 = vst.msk [vmem:[#allocation2 + $0x21] sm:$0xff] %vm398_vm1, %v367_v26  ;;  %v285_v56 = vld [vmem:[%s4237_s28 + $0xe8] sm:$0xff] }
  0x32   : > { %469 = vst.msk [vmem:[#allocation2 + $0xc1] sm:$0xff] %vm398_vm1, %v380_v31  ;;  %470 = vst.msk [vmem:[#allocation2 + $0xc9] sm:$0xff] %vm398_vm1, %v381_v32  ;;  %3829 = vmatprep.mubr.msk.bf16.mxu0 %vm398_vm1, %v571_v50  ;;  %v342_v32 = vadd.f32 %v4324_v9, %v303_v12  ;;  %v4167_v50 = vld [vmem:[%s5547_s3] sm:$0xff]   ;;  %v359_v53 = vadd.f32 %v4324_v9, %v320_v43  ;;  %v1035_v55 = vld [vmem:[#allocation2 + $0xa] sm:$0xff] }
  0x33   : > { %471 = vst.msk [vmem:[#allocation2 + $0xd9] sm:$0xff] %vm398_vm1, %v382_v44  ;;  %472 = vst.msk [vmem:[#allocation2 + $0xe1] sm:$0xff] %vm398_vm1, %v383_v45  ;;  %v282_v44 = vld [vmem:[%s4237_s28 + $0xd0] sm:$0xff] }
  0x34   : > { %457 = vst.msk [vmem:[#allocation2 + $0x31] sm:$0xff] %vm398_vm1, %v368_v52  ;;  %458 = vst.msk [vmem:[#allocation2 + $0x39] sm:$0xff] %vm398_vm1, %v369_v61  ;;  %v374_v47 = vmax.f32 %v342_v32, 0.0  ;;  %v358_v52 = vadd.f32 %v4324_v9, %v319_v42  ;;  %v308_v61 = vmul.f32 %v4299_v6, %v269_v37 }
  0x35   : > { %459 = vst.msk [vmem:[#allocation2 + $0x49] sm:$0xff] %vm398_vm1, %v370_v62  ;;  %460 = vst.msk [vmem:[#allocation2 + $0x51] sm:$0xff] %vm398_vm1, %v371_v3  ;;  %v321_v62 = vmul.f32 %v4299_v6, %v282_v44 }
  0x36   : > { %473 = vst.msk [vmem:[#allocation2 + $0xf1] sm:$0xff] %vm398_vm1, %v384_v4  ;;  %474 = vst.msk [vmem:[#allocation2 + $0xf9] sm:$0xff] %vm398_vm1, %v385_v5  ;;  %v390_v3 = vmax.f32 %v358_v52, 0.0  ;;  %v391_v4 = vmax.f32 %v359_v53, 0.0  ;;  %v344_v5 = vadd.f32 %v4324_v9, %v305_v54  ;;  %v347_v15 = vadd.f32 %v4324_v9, %v308_v61 }
  0x37   : > { %475 = vst.msk [vmem:[#allocation2 + $0x109] sm:$0xff] %vm398_vm1, %v386_v18  ;;  %476 = vst.msk [vmem:[#allocation2 + $0x111] sm:$0xff] %vm398_vm1, %v387_v27  ;;  %v360_v20 = vadd.f32 %v4324_v9, %v321_v62  ;;  %v487_v62 = vld [vmem:[#allocation2] sm:$0xff] }
  0x38   : > { %v541_v16 = vld [vmem:[#allocation2 + $0x19] sm:$0xff]  ;;  %v542_v17 = vld [vmem:[#allocation2 + $0x21] sm:$0xff]  ;;  %461 = vst.msk [vmem:[#allocation2 + $0x61] sm:$0xff] %vm398_vm1, %v372_v29  ;;  %462 = vst.msk [vmem:[#allocation2 + $0x69] sm:$0xff] %vm398_vm1, %v373_v40  ;;  %v376_v12 = vmax.f32 %v344_v5, 0.0  ;;  %v379_v27 = vmax.f32 %v347_v15, 0.0 }
  0x39   : > { %v4413_v24 = vpack.c.bf16 %v542_v17, %v541_v16  ;;  %v555_v25 = vld [vmem:[#allocation2 + $0xc1] sm:$0xff]  ;;  %v556_v26 = vld [vmem:[#allocation2 + $0xc9] sm:$0xff]  ;;  %463 = vst.msk [vmem:[#allocation2 + $0x79] sm:$0xff] %vm398_vm1, %v374_v47  ;;  %464 = vst.msk [vmem:[#allocation2 + $0x81] sm:$0xff] %vm398_vm1, %v375_v48  ;;  %v392_v32 = vmax.f32 %v360_v20, 0.0 }
  0x3a   : > { %v4417_v31 = vpack.c.bf16 %v556_v26, %v555_v25  ;;  %v557_v38 = vld [vmem:[#allocation2 + $0xd9] sm:$0xff]  ;;  %v558_v39 = vld [vmem:[#allocation2 + $0xe1] sm:$0xff]  ;;  %477 = vst.msk [vmem:[#allocation2 + $0x121] sm:$0xff] %vm398_vm1, %v388_v49  ;;  %478 = vst.msk [vmem:[#allocation2 + $0x129] sm:$0xff] %vm398_vm1, %v389_v51  ;;  %v378_v26 = vmax.f32 %v346_v13, 0.0 }
  0x3b   : > { %3830 = vmatmul.mubr.msk.bf16.vlgmr.msra.gmra.mxu0 %vm398_vm1, %v4413_v24  ;;  %v4436_v45 = vpack.c.bf16 %v558_v39, %v557_v38  ;;  %v543_v46 = vld [vmem:[#allocation2 + $0x31] sm:$0xff]  ;;  %v544_v57 = vld [vmem:[#allocation2 + $0x39] sm:$0xff]  ;;  %479 = vst.msk [vmem:[#allocation2 + $0x139] sm:$0xff] %vm398_vm1, %v390_v3  ;;  %480 = vst.msk [vmem:[#allocation2 + $0x141] sm:$0xff] %vm398_vm1, %v391_v4 }
  0x3c   : > { %3845 = vmatprep.mubr.msk.bf16.mxu1 %vm398_vm1, %v4417_v31  ;;  %3898 = vmatpush3.bf16.msra.mxu0 %v4348_v23  ;;  %v283_v23 = vld [vmem:[%s4237_s28 + $0xd8] sm:$0xff]  ;;  %v545_v58 = vld [vmem:[#allocation2 + $0x49] sm:$0xff]  ;;  %v4460_v63 = vpack.c.bf16 %v544_v57, %v543_v46  ;;  %465 = vst.msk [vmem:[#allocation2 + $0x91] sm:$0xff] %vm398_vm1, %v376_v12  ;;  %467 = vst.msk [vmem:[#allocation2 + $0xa9] sm:$0xff] %vm398_vm1, %v378_v26 }
  0x3d   : > { %3899 = vmatprep.subr.bf16.mxu0 %v4411_v22  ;;  %3846 = vmatmul.mubr.msk.bf16.vlgmr.msra.gmra.mxu1 %vm398_vm1, %v4436_v45  ;;  %v546_v0 = vld [vmem:[#allocation2 + $0x51] sm:$0xff]  ;;  %v560_v2 = vld [vmem:[#allocation2 + $0xf9] sm:$0xff]  ;;  %v322_v16 = vmul.f32 %v4299_v6, %v283_v23  ;;  %v4496_v29 = vld [vmem:[%s5547_s3 + $0x48] sm:$0xff]   ;;  %468 = vst.msk [vmem:[#allocation2 + $0xb1] sm:$0xff] %vm398_vm1, %v379_v27 }
  0x3e   : > { %3862 = vmatpush3.bf16.msra.mxu1 %v4335_v14  ;;  %v559_v1 = vld [vmem:[#allocation2 + $0xf1] sm:$0xff]  ;;  %v4464_v7 = vpack.c.bf16 %v546_v0, %v545_v58  ;;  %v345_v14 = vadd.f32 %v4324_v9, %v306_v59  ;;  %3833 = vmatprep.mubr.msk.bf16.mxu0 %vm398_vm1, %v4460_v63  ;;  %v561_v11 = vld [vmem:[#allocation2 + $0x109] sm:$0xff]  ;;  %481 = vst.msk [vmem:[#allocation2 + $0x151] sm:$0xff] %vm398_vm1, %v392_v32  ;;  %483 = vst.msk [vmem:[#allocation2 + $0x169] sm:$0xff] %vm398_vm1, %v394_v41 }
  0x3f   : > { %v4466_v8 = vpack.c.bf16 %v560_v2, %v559_v1  ;;  %3863 = vmatprep.subr.bf16.mxu1 %v4167_v50  ;;  %v562_v17 = vld [vmem:[#allocation2 + $0x111] sm:$0xff]  ;;  %v547_v18 = vld [vmem:[#allocation2 + $0x61] sm:$0xff]  ;;  %v361_v28 = vadd.f32 %v4324_v9, %v322_v16  ;;  %v548_v30 = vld [vmem:[#allocation2 + $0x69] sm:$0xff] }
  0x40   : > { %3900 = vmatpush3.bf16.msra.mxu0 %v4411_v22  ;;  %v377_v19 = vmax.f32 %v345_v14, 0.0  ;;  %v324_v22 = vmul.f32 %v4299_v6, %v285_v56  ;;  %v4489_v25 = vpack.c.bf16 %v562_v17, %v561_v11  ;;  %v4502_v35 = vpack.c.bf16 %v548_v30, %v547_v18  ;;  %v549_v36 = vld [vmem:[#allocation2 + $0x79] sm:$0xff]  ;;  %v550_v37 = vld [vmem:[#allocation2 + $0x81] sm:$0xff]  ;;  %v491_v16 = vld [vmem:[#allocation2 + $0x30] sm:$0xff] }
  0x41   : > { %3849 = vmatprep.mubr.msk.bf16.mxu1 %vm398_vm1, %v4466_v8  ;;  %v563_v38 = vld [vmem:[#allocation2 + $0x121] sm:$0xff]  ;;  %v393_v39 = vmax.f32 %v361_v28, 0.0  ;;  %3969 = vmatprep.subr.bf16.mxu0 %v4496_v29  ;;  %v564_v40 = vld [vmem:[#allocation2 + $0x129] sm:$0xff]  ;;  %v4512_v43 = vpack.c.bf16 %v550_v37, %v549_v36  ;;  %v1038_v5 = vld [vmem:[#allocation2 + $0x32] sm:$0xff] }
  0x42   : > { %3864 = vmatpush3.bf16.msra.mxu1 %v4167_v50  ;;  %466 = vst.msk [vmem:[#allocation2 + $0x99] sm:$0xff] %vm398_vm1, %v377_v19  ;;  %v363_v34 = vadd.f32 %v4324_v9, %v324_v22  ;;  %v4514_v44 = vpack.c.bf16 %v564_v40, %v563_v38  ;;  %v565_v46 = vld [vmem:[#allocation2 + $0x139] sm:$0xff]  ;;  %v566_v47 = vld [vmem:[#allocation2 + $0x141] sm:$0xff]  ;;  %v1040_v21 = vld [vmem:[#allocation2 + $0x4a] sm:$0xff] }
  0x43   : > { %3834 = vmatmul.mubr.msk.bf16.gmra.mxu0 %vm398_vm1, %v4464_v7  ;;  %3933 = vmatprep.subr.bf16.mxu1 %v4473_v10  ;;  %482 = vst.msk [vmem:[#allocation2 + $0x159] sm:$0xff] %vm398_vm1, %v393_v39  ;;  %v4521_v48 = vpack.c.bf16 %v566_v47, %v565_v46  ;;  %v551_v49 = vld [vmem:[#allocation2 + $0x91] sm:$0xff]  ;;  %v553_v52 = vld [vmem:[#allocation2 + $0xa9] sm:$0xff]  ;;  %v1036_v3 = vld [vmem:[#allocation2 + $0x1a] sm:$0xff] }
  0x44   : > { %v395_v42 = vmax.f32 %v363_v34, 0.0  ;;  %3837 = vmatprep.mubr.msk.bf16.mxu0 %vm398_vm1, %v4502_v35  ;;  %v554_v53 = vld [vmem:[#allocation2 + $0xb1] sm:$0xff]  ;;  %v1034_v23 = vld [vmem:[#allocation2 + $0x2] sm:$0xff]  ;;  %v1039_v14 = vld [vmem:[#allocation2 + $0x3a] sm:$0xff] }
  0x45   : > { %3850 = vmatmul.mubr.msk.bf16.gmra.mxu1 %vm398_vm1, %v4489_v25  ;;  %v567_v54 = vld [vmem:[#allocation2 + $0x151] sm:$0xff]  ;;  %v4531_v57 = vpack.c.bf16 %v554_v53, %v553_v52  ;;  %v569_v59 = vld [vmem:[#allocation2 + $0x169] sm:$0xff]  ;;  %v1066_v61 = vpack.c.bf16 %v1035_v55, %v1034_v23  ;;  %v490_v13 = vld [vmem:[#allocation2 + $0x20] sm:$0xff]  ;;  %v4547_v15 = vpack.c.bf16 %v1039_v14, %v1038_v5 }
  0x46   : > { %484 = vst.msk [vmem:[#allocation2 + $0x171] sm:$0xff] %vm398_vm1, %v395_v42  ;;  %3853 = vmatprep.mubr.msk.bf16.mxu1 %vm398_vm1, %v4514_v44  ;;  %v488_v0 = vld [vmem:[#allocation2 + $0x8] sm:$0xff]  ;;  %v489_v12 = vld [vmem:[#allocation2 + $0x18] sm:$0xff]  ;;  %v4172_v18 = vld [vmem:[%s5547_s3 + $0x40] sm:$0xff]  }
  0x47   : > { %v519_v2 = vpack.c.bf16 %v488_v0, %v487_v62  ;;  %v1037_v4 = vld [vmem:[#allocation2 + $0x22] sm:$0xff]  ;;  %v492_v17 = vld [vmem:[#allocation2 + $0x38] sm:$0xff]  ;;  %v4552_v19 = vpack.c.bf16 %v490_v13, %v489_v12  ;;  %v4171_v27 = vld [vmem:[%s5547_s3 + $0x30] sm:$0xff]  }
  0x48   : > { %v4545_v11 = vpack.c.bf16 %v1037_v4, %v1036_v3  ;;  %v4556_v20 = vpack.c.bf16 %v492_v17, %v491_v16  ;;  %v1041_v22 = vld [vmem:[#allocation2 + $0x52] sm:$0xff]  ;;  %v1042_v26 = vld [vmem:[#allocation2 + $0x62] sm:$0xff]  ;;  %v1043_v32 = vld [vmem:[#allocation2 + $0x6a] sm:$0xff] }
  0x49   : > { %v552_v50 = vld [vmem:[#allocation2 + $0x99] sm:$0xff]  ;;  %v493_v28 = vld [vmem:[#allocation2 + $0x48] sm:$0xff]  ;;  %v494_v30 = vld [vmem:[#allocation2 + $0x50] sm:$0xff]  ;;  %v4574_v34 = vpack.c.bf16 %v1041_v22, %v1040_v21  ;;  %v4576_v37 = vpack.c.bf16 %v1043_v32, %v1042_v26 }
  0x4a   : > { %v4525_v51 = vpack.c.bf16 %v552_v50, %v551_v49  ;;  %v568_v56 = vld [vmem:[#allocation2 + $0x159] sm:$0xff]  ;;  %v496_v36 = vld [vmem:[#allocation2 + $0x68] sm:$0xff]  ;;  %v286_v39 = vld [vmem:[%s4237_s28 + $0xf0] sm:$0xff] }
  0x4b   : > { %3838 = vmatmul.mubr.msk.bf16.gmra.mxu0 %vm398_vm1, %v4512_v43  ;;  %v4533_v58 = vpack.c.bf16 %v568_v56, %v567_v54  ;;  %v495_v33 = vld [vmem:[#allocation2 + $0x60] sm:$0xff]  ;;  %v4581_v38 = vld [vmem:[%s5547_s3 + $0x58] sm:$0xff]   ;;  %v325_v42 = vmul.f32 %v4299_v6, %v286_v39  ;;  %v1051_v5 = vld [vmem:[#allocation2 + $0xca] sm:$0xff] }
  0x4c   : > { %3841 = vmatprep.mubr.msk.bf16.mxu0 %vm398_vm1, %v4525_v51  ;;  %v287_v40 = vld [vmem:[%s4237_s28 + $0xf8] sm:$0xff]  ;;  %v4592_v47 = vpack.c.bf16 %v496_v36, %v495_v33  ;;  %v1045_v49 = vld [vmem:[#allocation2 + $0x82] sm:$0xff]  ;;  %v502_v13 = vld [vmem:[#allocation2 + $0xb0] sm:$0xff] }
  0x4d   : > { %3854 = vmatmul.mubr.msk.bf16.gmra.mxu1 %vm398_vm1, %v4521_v48  ;;  %v570_v60 = vld [vmem:[#allocation2 + $0x171] sm:$0xff]  ;;  %v1044_v41 = vld [vmem:[#allocation2 + $0x7a] sm:$0xff]  ;;  %v326_v46 = vmul.f32 %v4299_v6, %v287_v40  ;;  %v364_v50 = vadd.f32 %v4324_v9, %v325_v42  ;;  %v1050_v4 = vld [vmem:[#allocation2 + $0xc2] sm:$0xff] }
  0x4e   : > { %3857 = vmatprep.mubr.msk.bf16.mxu1 %vm398_vm1, %v4533_v58  ;;  %v4537_v1 = vpack.c.bf16 %v570_v60, %v569_v59  ;;  %v1046_v53 = vld [vmem:[#allocation2 + $0x92] sm:$0xff]  ;;  %v1047_v54 = vld [vmem:[#allocation2 + $0x9a] sm:$0xff]  ;;  %v4603_v55 = vpack.c.bf16 %v1045_v49, %v1044_v41  ;;  %v501_v12 = vld [vmem:[#allocation2 + $0xa8] sm:$0xff]  ;;  %v4623_v16 = vpack.c.bf16 %v1051_v5, %v1050_v4 }
  0x4f   : > { %v365_v52 = vadd.f32 %v4324_v9, %v326_v46  ;;  %v396_v6 = vmax.f32 %v364_v50, 0.0  ;;  %v497_v56 = vld [vmem:[#allocation2 + $0x78] sm:$0xff]  ;;  %v498_v59 = vld [vmem:[#allocation2 + $0x80] sm:$0xff]  ;;  %v4605_v60 = vpack.c.bf16 %v1047_v54, %v1046_v53  ;;  %v4625_v21 = vpack.c.bf16 %v502_v13, %v501_v12  ;;  %v507_v40 = vld [vmem:[#allocation2 + $0xf0] sm:$0xff] }
  0x50   : > { %v500_v62 = vld [vmem:[#allocation2 + $0x98] sm:$0xff]  ;;  %v4609_v9 = vpack.c.bf16 %v498_v59, %v497_v56  ;;  %v503_v17 = vld [vmem:[#allocation2 + $0xc0] sm:$0xff]  ;;  %v1056_v49 = vld [vmem:[#allocation2 + $0x10a] sm:$0xff] }
  0x51   : > { %v397_v23 = vmax.f32 %v365_v52, 0.0  ;;  %485 = vst.msk [vmem:[#allocation2 + $0x181] sm:$0xff] %vm398_vm1, %v396_v6  ;;  %v1049_v3 = vld [vmem:[#allocation2 + $0xb2] sm:$0xff]  ;;  %v1052_v26 = vld [vmem:[#allocation2 + $0xda] sm:$0xff]  ;;  %v1058_v52 = vld [vmem:[#allocation2 + $0x122] sm:$0xff] }
  0x52   : > { %v505_v33 = vld [vmem:[#allocation2 + $0xd8] sm:$0xff]  ;;  %v506_v36 = vld [vmem:[#allocation2 + $0xe0] sm:$0xff]  ;;  %v1059_v53 = vld [vmem:[#allocation2 + $0x12a] sm:$0xff] }
  0x53   : > { %3842 = vmatmul.mubr.msk.bf16.gmra.mxu0 %vm398_vm1, %v4531_v57  ;;  %486 = vst.msk [vmem:[#allocation2 + $0x189] sm:$0xff] %vm398_vm1, %v397_v23  ;;  %v508_v41 = vld [vmem:[#allocation2 + $0xf8] sm:$0xff]  ;;  %v4641_v42 = vpack.c.bf16 %v506_v36, %v505_v33  ;;  %v509_v6 = vld [vmem:[#allocation2 + $0x108] sm:$0xff]  ;;  %v510_v23 = vld [vmem:[#allocation2 + $0x110] sm:$0xff]  ;;  %v4655_v56 = vpack.c.bf16 %v1059_v53, %v1058_v52 }
  0x54   : > { %3901 = vmatprep.mubr.msk.bf16.mxu0 %vm398_vm1, %v1066_v61  ;;  %v499_v61 = vld [vmem:[#allocation2 + $0x90] sm:$0xff]  ;;  %v4645_v46 = vpack.c.bf16 %v508_v41, %v507_v40  ;;  %v511_v59 = vld [vmem:[#allocation2 + $0x120] sm:$0xff] }
  0x55   : > { %3858 = vmatmul.mubr.msk.bf16.gmra.mxu1 %vm398_vm1, %v4537_v1  ;;  %v4613_v0 = vpack.c.bf16 %v500_v62, %v499_v61  ;;  %v1057_v50 = vld [vmem:[#allocation2 + $0x112] sm:$0xff]  ;;  %v512_v61 = vld [vmem:[#allocation2 + $0x128] sm:$0xff]  ;;  %v4657_v62 = vpack.c.bf16 %v510_v23, %v509_v6  ;;  %v1063_v12 = vld [vmem:[#allocation2 + $0x15a] sm:$0xff] }
  0x56   : > { %3865 = vmatprep.mubr.msk.bf16.mxu1 %vm398_vm1, %v519_v2  ;;  %v1048_v2 = vld [vmem:[#allocation2 + $0xaa] sm:$0xff]  ;;  %v4653_v54 = vpack.c.bf16 %v1057_v50, %v1056_v49  ;;  %v1061_v4 = vld [vmem:[#allocation2 + $0x142] sm:$0xff]  ;;  %v1062_v5 = vld [vmem:[#allocation2 + $0x152] sm:$0xff] }
  0x57   : > { %v4621_v14 = vpack.c.bf16 %v1049_v3, %v1048_v2  ;;  %v4661_v2 = vpack.c.bf16 %v512_v61, %v511_v59  ;;  %v1060_v3 = vld [vmem:[#allocation2 + $0x13a] sm:$0xff]  ;;  %v1064_v36 = vld [vmem:[#allocation2 + $0x16a] sm:$0xff]  ;;  %v1065_v40 = vld [vmem:[#allocation2 + $0x172] sm:$0xff] }
  0x58   : > { %v4669_v13 = vpack.c.bf16 %v1061_v4, %v1060_v3  ;;  %v4685_v41 = vpack.c.bf16 %v1065_v40, %v1064_v36  ;;  %v517_v49 = vld [vmem:[#allocation2 + $0x168] sm:$0xff]  ;;  %v518_v50 = vld [vmem:[#allocation2 + $0x170] sm:$0xff]  ;;  %v4176_v53 = vld [vmem:[%s5547_s3 + $0x60] sm:$0xff]  }
  0x59   : > { %v4687_v52 = vpack.c.bf16 %v518_v50, %v517_v49  ;;  %v2289_v6 = vld [vmem:[#allocation2 + $0x198] sm:$0xff]  ;;  %v2290_v23 = vld [vmem:[#allocation2 + $0x1a0] sm:$0xff]  ;;  %v2567_v49 = vld [vmem:[#allocation2 + $0x49] sm:$0xff] }
  0x5a   : > { %v1982_v3 = vld [vmem:[#allocation2 + $0x182] sm:$0xff]  ;;  %v1983_v4 = vld [vmem:[#allocation2 + $0x18a] sm:$0xff] }
  0x5b   : > { %3902 = vmatmul.mubr.msk.bf16.vlgmr.msra.gmra.mxu0 %vm398_vm1, %v4545_v11  ;;  %v2568_v50 = vld [vmem:[#allocation2 + $0x51] sm:$0xff] }
  0x5c   : > { %3970 = vmatpush3.bf16.msra.mxu0 %v4496_v29  ;;  %3905 = vmatprep.mubr.msk.bf16.mxu0 %vm398_vm1, %v4547_v15  ;;  %v4569_v29 = vld [vmem:[%s5547_s3 + $0x68] sm:$0xff]  }
  0x5d   : > { %3971 = vmatprep.subr.bf16.mxu0 %v4172_v18  ;;  %3866 = vmatmul.mubr.msk.bf16.vlgmr.msra.gmra.mxu1 %vm398_vm1, %v4552_v19 }
  0x5e   : > { %3934 = vmatpush3.bf16.msra.mxu1 %v4473_v10  ;;  %3869 = vmatprep.mubr.msk.bf16.mxu1 %vm398_vm1, %v4556_v20  ;;  %v4586_v10 = vpack.c.bf16 %v494_v30, %v493_v28  ;;  %v1054_v28 = vld [vmem:[#allocation2 + $0xf2] sm:$0xff]  ;;  %v1055_v30 = vld [vmem:[#allocation2 + $0xfa] sm:$0xff] }
  0x5f   : > { %3935 = vmatprep.subr.bf16.mxu1 %v4171_v27  ;;  %v4639_v39 = vpack.c.bf16 %v1055_v30, %v1054_v28  ;;  %v516_v28 = vld [vmem:[#allocation2 + $0x158] sm:$0xff] }
  0x60   : > { %3972 = vmatpush3.bf16.msra.mxu0 %v4172_v18  ;;  %v504_v18 = vld [vmem:[#allocation2 + $0xc8] sm:$0xff] }
  0x61   : > { %4041 = vmatprep.subr.bf16.mxu0 %v4569_v29  ;;  %v4629_v22 = vpack.c.bf16 %v504_v18, %v503_v17  ;;  %v513_v17 = vld [vmem:[#allocation2 + $0x138] sm:$0xff]  ;;  %v514_v18 = vld [vmem:[#allocation2 + $0x140] sm:$0xff] }
  0x62   : > { %3936 = vmatpush3.bf16.msra.mxu1 %v4171_v27  ;;  %v1053_v27 = vld [vmem:[#allocation2 + $0xe2] sm:$0xff]  ;;  %v4673_v30 = vpack.c.bf16 %v514_v18, %v513_v17  ;;  %v2566_v17 = vld [vmem:[#allocation2 + $0x39] sm:$0xff] }
  0x63   : > { %3906 = vmatmul.mubr.msk.bf16.gmra.mxu0 %vm398_vm1, %v4574_v34  ;;  %4005 = vmatprep.subr.bf16.mxu1 %v4581_v38  ;;  %v4637_v32 = vpack.c.bf16 %v1053_v27, %v1052_v26  ;;  %v4671_v26 = vpack.c.bf16 %v1063_v12, %v1062_v5  ;;  %v515_v27 = vld [vmem:[#allocation2 + $0x150] sm:$0xff] }
  0x64   : > { %3909 = vmatprep.mubr.msk.bf16.mxu0 %vm398_vm1, %v4576_v37  ;;  %v4677_v33 = vpack.c.bf16 %v516_v28, %v515_v27  ;;  %v2565_v12 = vld [vmem:[#allocation2 + $0x31] sm:$0xff]  ;;  %v4883_v28 = vpack.c.bf16 %v1983_v4, %v1982_v3 }
  0x65   : > { %3870 = vmatmul.mubr.msk.bf16.gmra.mxu1 %vm398_vm1, %v4586_v10  ;;  %v2573_v3 = vld [vmem:[#allocation2 + $0x91] sm:$0xff] }
  0x66   : > { %3873 = vmatprep.mubr.msk.bf16.mxu1 %vm398_vm1, %v4592_v47 }
  0x6b   : > { %3910 = vmatmul.mubr.msk.bf16.gmra.mxu0 %vm398_vm1, %v4603_v55 }
  0x6c   : > { %3913 = vmatprep.mubr.msk.bf16.mxu0 %vm398_vm1, %v4605_v60 }
  0x6d   : > { %3874 = vmatmul.mubr.msk.bf16.gmra.mxu1 %vm398_vm1, %v4609_v9 }
  0x6e   : > { %3877 = vmatprep.mubr.msk.bf16.mxu1 %vm398_vm1, %v4613_v0 }
  0x73   : > { %3914 = vmatmul.mubr.msk.bf16.gmra.mxu0 %vm398_vm1, %v4621_v14 }
  0x74   : > { %3917 = vmatprep.mubr.msk.bf16.mxu0 %vm398_vm1, %v4623_v16 }
  0x75   : > { %3878 = vmatmul.mubr.msk.bf16.gmra.mxu1 %vm398_vm1, %v4625_v21 }
  0x76   : > { %3881 = vmatprep.mubr.msk.bf16.mxu1 %vm398_vm1, %v4629_v22 }
  0x7b   : > { %3918 = vmatmul.mubr.msk.bf16.gmra.mxu0 %vm398_vm1, %v4637_v32 }
  0x7c   : > { %3921 = vmatprep.mubr.msk.bf16.mxu0 %vm398_vm1, %v4639_v39 }
  0x7d   : > { %3882 = vmatmul.mubr.msk.bf16.gmra.mxu1 %vm398_vm1, %v4641_v42 }
  0x7e   : > { %3885 = vmatprep.mubr.msk.bf16.mxu1 %vm398_vm1, %v4645_v46 }
  0x83   : > { %3922 = vmatmul.mubr.msk.bf16.gmra.mxu0 %vm398_vm1, %v4653_v54 }
  0x84   : > { %3925 = vmatprep.mubr.msk.bf16.mxu0 %vm398_vm1, %v4655_v56 }
  0x85   : > { %3886 = vmatmul.mubr.msk.bf16.gmra.mxu1 %vm398_vm1, %v4657_v62 }
  0x86   : > { %3889 = vmatprep.mubr.msk.bf16.mxu1 %vm398_vm1, %v4661_v2 }
  0x8b   : > { %3926 = vmatmul.mubr.msk.bf16.gmra.mxu0 %vm398_vm1, %v4669_v13 }
  0x8c   : > { %3929 = vmatprep.mubr.msk.bf16.mxu0 %vm398_vm1, %v4671_v26 }
  0x8d   : > { %3890 = vmatmul.mubr.msk.bf16.gmra.mxu1 %vm398_vm1, %v4673_v30 }
  0x8e   : > { %3893 = vmatprep.mubr.msk.bf16.mxu1 %vm398_vm1, %v4677_v33 }
  0x93   : > { %3930 = vmatmul.mubr.msk.bf16.gmra.mxu0 %vm398_vm1, %v4685_v41 }
  0x94   : > { %3973 = vmatprep.mubr.msk.bf16.mxu0 %vm398_vm1, %v4413_v24  ;;  %v4175_v24 = vld [vmem:[%s5547_s3 + $0x50] sm:$0xff]  }
  0x95   : > { %3894 = vmatmul.mubr.msk.bf16.gmra.mxu1 %vm398_vm1, %v4687_v52 }
  0x96   : > { %3937 = vmatprep.mubr.msk.bf16.mxu1 %vm398_vm1, %v4552_v19  ;;  %v4178_v19 = vld [vmem:[%s5547_s3 + $0x88] sm:$0xff]  }
  0x9b   : > { %3974 = vmatmul.mubr.msk.bf16.vlgmr.msra.gmra.mxu0 %vm398_vm1, %v4460_v63  ;;  %v4177_v63 = vld [vmem:[%s5547_s3 + $0x78] sm:$0xff]  }
  0x9c   : > { %4042 = vmatpush3.bf16.msra.mxu0 %v4569_v29  ;;  %3977 = vmatprep.mubr.msk.bf16.mxu0 %vm398_vm1, %v4464_v7 }
  0x9d   : > { %4043 = vmatprep.subr.bf16.mxu0 %v4176_v53  ;;  %3938 = vmatmul.mubr.msk.bf16.vlgmr.msra.gmra.mxu1 %vm398_vm1, %v4556_v20 }
  0x9e   : > { %4006 = vmatpush3.bf16.msra.mxu1 %v4581_v38  ;;  %3941 = vmatprep.mubr.msk.bf16.mxu1 %vm398_vm1, %v4586_v10 }
  0x9f   : > { %4007 = vmatprep.subr.bf16.mxu1 %v4175_v24 }
  0xa0   : > { %4044 = vmatpush3.bf16.msra.mxu0 %v4176_v53  ;;  %v2569_v53 = vld [vmem:[#allocation2 + $0x61] sm:$0xff] }
  0xa1   : > { %4113 = vmatprep.subr.bf16.mxu0 %v4178_v19 }
  0xa2   : > { %4008 = vmatpush3.bf16.msra.mxu1 %v4175_v24  ;;  %v2570_v24 = vld [vmem:[#allocation2 + $0x69] sm:$0xff] }
  0xa3   : > { %3978 = vmatmul.mubr.msk.bf16.gmra.mxu0 %vm398_vm1, %v4502_v35  ;;  %4077 = vmatprep.subr.bf16.mxu1 %v4177_v63 }
  0xa4   : > { %3981 = vmatprep.mubr.msk.bf16.mxu0 %vm398_vm1, %v4512_v43  ;;  %v4180_v43 = vld [vmem:[%s5547_s3 + $0x80] sm:$0xff]  }
  0xa5   : > { %3942 = vmatmul.mubr.msk.bf16.gmra.mxu1 %vm398_vm1, %v4592_v47 }
  0xa6   : > { %3945 = vmatprep.mubr.msk.bf16.mxu1 %vm398_vm1, %v4609_v9 }
  0xab   : > { %3982 = vmatmul.mubr.msk.bf16.gmra.mxu0 %vm398_vm1, %v4525_v51 }
  0xac   : > { %3985 = vmatprep.mubr.msk.bf16.mxu0 %vm398_vm1, %v4531_v57 }
  0xad   : > { %3946 = vmatmul.mubr.msk.bf16.gmra.mxu1 %vm398_vm1, %v4613_v0 }
  0xae   : > { %3949 = vmatprep.mubr.msk.bf16.mxu1 %vm398_vm1, %v4625_v21 }
  0xb3   : > { %3986 = vmatmul.mubr.msk.bf16.gmra.mxu0 %vm398_vm1, %v4417_v31  ;;  %v1676_v31 = vld [vmem:[#allocation2 + $0x181] sm:$0xff] }
  0xb4   : > { %3989 = vmatprep.mubr.msk.bf16.mxu0 %vm398_vm1, %v4436_v45  ;;  %v1677_v45 = vld [vmem:[#allocation2 + $0x189] sm:$0xff] }
  0xb5   : > { %3950 = vmatmul.mubr.msk.bf16.gmra.mxu1 %vm398_vm1, %v4629_v22  ;;  %v4767_v7 = vpack.c.bf16 %v1677_v45, %v1676_v31  ;;  %v2599_v45 = vpack.c.bf16 %v2570_v24, %v2569_v53 }
  0xb6   : > { %3953 = vmatprep.mubr.msk.bf16.mxu1 %vm398_vm1, %v4641_v42 }
  0xbb   : > { %3990 = vmatmul.mubr.msk.bf16.gmra.mxu0 %vm398_vm1, %v4466_v8  ;;  %v1370_v8 = vld [vmem:[#allocation2 + $0x180] sm:$0xff] }
  0xbc   : > { %3993 = vmatprep.mubr.msk.bf16.mxu0 %vm398_vm1, %v4489_v25  ;;  %v1371_v25 = vld [vmem:[#allocation2 + $0x188] sm:$0xff] }
  0xbd   : > { %3954 = vmatmul.mubr.msk.bf16.gmra.mxu1 %vm398_vm1, %v4645_v46  ;;  %v1387_v35 = vpack.c.bf16 %v1371_v25, %v1370_v8 }
  0xbe   : > { %3957 = vmatprep.mubr.msk.bf16.mxu1 %vm398_vm1, %v4657_v62 }
  0xc3   : > { %3994 = vmatmul.mubr.msk.bf16.gmra.mxu0 %vm398_vm1, %v4514_v44  ;;  %v4179_v44 = vld [vmem:[%s5547_s3 + $0x70] sm:$0xff]  }
  0xc4   : > { %3997 = vmatprep.mubr.msk.bf16.mxu0 %vm398_vm1, %v4521_v48 }
  0xc5   : > { %3958 = vmatmul.mubr.msk.bf16.gmra.mxu1 %vm398_vm1, %v4661_v2 }
  0xc6   : > { %3961 = vmatprep.mubr.msk.bf16.mxu1 %vm398_vm1, %v4673_v30 }
  0xcb   : > { %3998 = vmatmul.mubr.msk.bf16.gmra.mxu0 %vm398_vm1, %v4533_v58 }
  0xcc   : > { %4001 = vmatprep.mubr.msk.bf16.mxu0 %vm398_vm1, %v4537_v1 }
  0xcd   : > { %3962 = vmatmul.mubr.msk.bf16.gmra.mxu1 %vm398_vm1, %v4677_v33 }
  0xce   : > { %3965 = vmatprep.mubr.msk.bf16.mxu1 %vm398_vm1, %v4687_v52 }
  0xd3   : > { %4002 = vmatmul.mubr.msk.bf16.gmra.mxu0 %vm398_vm1, %v4767_v7 }
  0xd4   : > { %4045 = vmatprep.mubr.msk.bf16.mxu0 %vm398_vm1, %v4556_v20 }
  0xd5   : > { %3966 = vmatmul.mubr.msk.bf16.gmra.mxu1 %vm398_vm1, %v1387_v35 }
  0xd6   : > { %4009 = vmatprep.mubr.msk.bf16.mxu1 %vm398_vm1, %v4545_v11 }
  0xdb   : > { %4046 = vmatmul.mubr.msk.bf16.vlgmr.msra.gmra.mxu0 %vm398_vm1, %v4586_v10 }
  0xdc   : > { %4114 = vmatpush3.bf16.msra.mxu0 %v4178_v19  ;;  %4049 = vmatprep.mubr.msk.bf16.mxu0 %vm398_vm1, %v4592_v47 }
  0xdd   : > { %4115 = vmatprep.subr.bf16.mxu0 %v4180_v43  ;;  %4010 = vmatmul.mubr.msk.bf16.vlgmr.msra.gmra.mxu1 %vm398_vm1, %v4547_v15 }
  0xde   : > { %4078 = vmatpush3.bf16.msra.mxu1 %v4177_v63  ;;  %4013 = vmatprep.mubr.msk.bf16.mxu1 %vm398_vm1, %v4574_v34  ;;  %v2598_v63 = vpack.c.bf16 %v2568_v50, %v2567_v49 }
  0xdf   : > { %4079 = vmatprep.subr.bf16.mxu1 %v4179_v44 }
  0xe0   : > { %4116 = vmatpush3.bf16.msra.mxu0 %v4180_v43 }
  0xe2   : > { %4080 = vmatpush3.bf16.msra.mxu1 %v4179_v44 }
  0xe3   : > { %4050 = vmatmul.mubr.msk.bf16.gmra.mxu0 %vm398_vm1, %v4609_v9 }
  0xe4   : > { %4053 = vmatprep.mubr.msk.bf16.mxu0 %vm398_vm1, %v4613_v0 }
  0xe5   : > { %4014 = vmatmul.mubr.msk.bf16.gmra.mxu1 %vm398_vm1, %v4576_v37 }
  0xe6   : > { %4017 = vmatprep.mubr.msk.bf16.mxu1 %vm398_vm1, %v4603_v55 }
  0xeb   : > { %4054 = vmatmul.mubr.msk.bf16.gmra.mxu0 %vm398_vm1, %v4625_v21 }
  0xec   : > { %4057 = vmatprep.mubr.msk.bf16.mxu0 %vm398_vm1, %v4629_v22 }
  0xed   : > { %4018 = vmatmul.mubr.msk.bf16.gmra.mxu1 %vm398_vm1, %v4605_v60 }
  0xee   : > { %4021 = vmatprep.mubr.msk.bf16.mxu1 %vm398_vm1, %v4621_v14 }
  0xf3   : > { %4058 = vmatmul.mubr.msk.bf16.gmra.mxu0 %vm398_vm1, %v4641_v42 }
  0xf4   : > { %4061 = vmatprep.mubr.msk.bf16.mxu0 %vm398_vm1, %v4645_v46 }
  0xf5   : > { %4022 = vmatmul.mubr.msk.bf16.gmra.mxu1 %vm398_vm1, %v4623_v16 }
  0xf6   : > { %4025 = vmatprep.mubr.msk.bf16.mxu1 %vm398_vm1, %v4637_v32 }
  0xfb   : > { %v4814_v48 = vpop.f32.mrf.mxu0  ;;  %4062 = vmatmul.mubr.msk.bf16.gmra.mxu0 %vm398_vm1, %v4657_v62 }
  0xfc   : > { %4065 = vmatprep.mubr.msk.bf16.mxu0 %vm398_vm1, %v4661_v2  ;;  %v2306_v2 = vpack.c.bf16 %v2290_v23, %v2289_v6  ;;  %v2571_v6 = vld [vmem:[#allocation2 + $0x79] sm:$0xff]  ;;  %v2572_v23 = vld [vmem:[#allocation2 + $0x81] sm:$0xff] }
  0xfd   : > { %v4820_v51 = vpop.f32.mrf.mxu0  ;;  %v4822_v57 = vpop.f32.mrf.mxu1  ;;  %4026 = vmatmul.mubr.msk.bf16.gmra.mxu1 %vm398_vm1, %v4639_v39 }
  0xfe   : > { %4029 = vmatprep.mubr.msk.bf16.mxu1 %vm398_vm1, %v4653_v54 }
  0xff   : > { %v4826_v58 = vpop.f32.mrf.mxu0  ;;  %v4830_v1 = vpop.f32.mrf.mxu1 }
 0x101   : > { %v4832_v11 = vpop.f32.mrf.mxu0  ;;  %v4834_v20 = vpop.f32.mrf.mxu1 }
 0x103   : > { %v4836_v29 = vpop.f32.mrf.mxu0  ;;  %4066 = vmatmul.mubr.msk.bf16.gmra.mxu0 %vm398_vm1, %v4673_v30  ;;  %v4840_v38 = vpop.f32.mrf.mxu1 }
 0x104   : > { %4069 = vmatprep.mubr.msk.bf16.mxu0 %vm398_vm1, %v4677_v33 }
 0x105   : > { %v4844_v10 = vpop.f32.mrf.mxu0  ;;  %v4846_v47 = vpop.f32.mrf.mxu1  ;;  %4030 = vmatmul.mubr.msk.bf16.gmra.mxu1 %vm398_vm1, %v4655_v56 }
 0x106   : > { %4033 = vmatprep.mubr.msk.bf16.mxu1 %vm398_vm1, %v4669_v13 }
 0x107   : > { %v4850_v9 = vpop.f32.mrf.mxu0  ;;  %v4854_v0 = vpop.f32.mrf.mxu1 }
 0x109   : > { %v4856_v21 = vpop.f32.mrf.mxu0  ;;  %v4858_v22 = vpop.f32.mrf.mxu1 }
 0x10b   : > { %v4860_v42 = vpop.f32.mrf.mxu0  ;;  %4070 = vmatmul.mubr.msk.bf16.gmra.mxu0 %vm398_vm1, %v4687_v52  ;;  %v4864_v46 = vpop.f32.mrf.mxu1 }
 0x10c   : > { %4073 = vmatprep.mubr.msk.bf16.mxu0 %vm398_vm1, %v1387_v35 }
 0x10d   : > { %v4867_v59 = vpop.f32.mrf.mxu0  ;;  %v4869_v61 = vpop.f32.mrf.mxu1  ;;  %4034 = vmatmul.mubr.msk.bf16.gmra.mxu1 %vm398_vm1, %v4671_v26  ;;  %v2597_v26 = vpack.c.bf16 %v2566_v17, %v2565_v12 }
 0x10e   : > { %4037 = vmatprep.mubr.msk.bf16.mxu1 %vm398_vm1, %v4685_v41 }
 0x10f   : > { %v4873_v62 = vpop.f32.mrf.mxu0  ;;  %v4877_v5 = vpop.f32.mrf.mxu1 }
 0x111   : > { %v4879_v18 = vpop.f32.mrf.mxu0  ;;  %v4881_v27 = vpop.f32.mrf.mxu1 }
 0x113   : > { %v4885_v30 = vpop.f32.mrf.mxu0  ;;  %4074 = vmatmul.mubr.msk.bf16.gmra.mxu0 %vm398_vm1, %v2306_v2  ;;  %v4888_v33 = vpop.f32.mrf.mxu1 }
 0x114   : > { %4117 = vmatprep.mubr.msk.bf16.mxu0 %vm398_vm1, %v4547_v15 }
 0x115   : > { %v4892_v36 = vpop.f32.mrf.mxu0  ;;  %v4894_v40 = vpop.f32.mrf.mxu1  ;;  %4038 = vmatmul.mubr.msk.bf16.gmra.mxu1 %vm398_vm1, %v4883_v28 }
 0x116   : > { %4081 = vmatprep.mubr.msk.bf16.mxu1 %vm398_vm1, %v2597_v26  ;;  %v2600_v26 = vpack.c.bf16 %v2572_v23, %v2571_v6  ;;  %v2577_v23 = vld [vmem:[#allocation2 + $0xc1] sm:$0xff] }
 0x117   : > { %v4898_v41 = vpop.f32.mrf.mxu0  ;;  %v4901_v52 = vpop.f32.mrf.mxu1 }
 0x119   : > { %v4903_v19 = vpop.f32.mrf.mxu0  ;;  %v4905_v15 = vpop.f32.mrf.mxu1 }
 0x11b   : > { %v3903_v31 = vpop.f32.mrf.mxu0  ;;  %4118 = vmatmul.mubr.msk.bf16.vlgmr.msra.gmra.mxu0 %vm398_vm1, %v4574_v34  ;;  %v4909_v8 = vpop.f32.mrf.mxu1  ;;  %v2574_v34 = vld [vmem:[#allocation2 + $0x99] sm:$0xff] }
 0x11c   : > { %4121 = vmatprep.mubr.msk.bf16.mxu0 %vm398_vm1, %v4576_v37 }
 0x11d   : > { %v1181_v25 = vpop.f32.mrf.mxu0  ;;  %v3867_v35 = vpop.f32.mrf.mxu1  ;;  %4082 = vmatmul.mubr.msk.bf16.vlgmr.msra.gmra.mxu1 %vm398_vm1, %v2598_v63 }
 0x11e   : > { %v916_v43 = vadd.f32 %v3867_v35, %v4814_v48  ;;  %4085 = vmatprep.mubr.msk.bf16.mxu1 %vm398_vm1, %v2599_v45  ;;  %v2601_v48 = vpack.c.bf16 %v2574_v34, %v2573_v3 }
 0x11f   : > { %v3904_v44 = vpop.f32.mrf.mxu0  ;;  %v907_v2 = vpop.f32.mrf.mxu1 }
 0x120   : > { %v908_v4 = vadd.f32 %v907_v2, %v4820_v51  ;;  %v4917_v17 = vadd.f32 %v3903_v31, %v916_v43 }
 0x121   : > { %v1184_v12 = vpop.f32.mrf.mxu0  ;;  %v3868_v37 = vpop.f32.mrf.mxu1 }
 0x122   : > { %v919_v49 = vadd.f32 %v3868_v37, %v4826_v58  ;;  %v4922_v53 = vadd.f32 %v1181_v25, %v908_v4  ;;  %v2576_v25 = vld [vmem:[#allocation2 + $0xb1] sm:$0xff] }
 0x123   : > { %v3907_v50 = vpop.f32.mrf.mxu0  ;;  %4122 = vmatmul.mubr.msk.bf16.gmra.mxu0 %vm398_vm1, %v4603_v55  ;;  %v910_v24 = vpop.f32.mrf.mxu1  ;;  %v2575_v55 = vld [vmem:[#allocation2 + $0xa9] sm:$0xff] }
 0x124   : > { %4125 = vmatprep.mubr.msk.bf16.mxu0 %vm398_vm1, %v4605_v60  ;;  %v911_v51 = vadd.f32 %v910_v24, %v4832_v11  ;;  %v4927_v31 = vadd.f32 %v3904_v44, %v919_v49  ;;  %v2578_v60 = vld [vmem:[#allocation2 + $0xc9] sm:$0xff]  ;;  %v2602_v34 = vpack.c.bf16 %v2576_v25, %v2575_v55 }
 0x125   : > { %v1197_v63 = vpop.f32.mrf.mxu0  ;;  %v3871_v45 = vpop.f32.mrf.mxu1  ;;  %4086 = vmatmul.mubr.msk.bf16.gmra.mxu1 %vm398_vm1, %v2600_v26  ;;  %v2603_v37 = vpack.c.bf16 %v2578_v60, %v2577_v23 }
 0x126   : > { %v932_v58 = vadd.f32 %v3871_v45, %v4836_v29  ;;  %4089 = vmatprep.mubr.msk.bf16.mxu1 %vm398_vm1, %v2601_v48  ;;  %v4932_v43 = vadd.f32 %v1184_v12, %v911_v51  ;;  %v2580_v51 = vld [vmem:[#allocation2 + $0xe1] sm:$0xff] }
 0x127   : > { %v3908_v35 = vpop.f32.mrf.mxu0  ;;  %v923_v6 = vpop.f32.mrf.mxu1 }
 0x128   : > { %v924_v11 = vadd.f32 %v923_v6, %v4844_v10  ;;  %v4935_v44 = vadd.f32 %v3907_v50, %v932_v58  ;;  %v2581_v58 = vld [vmem:[#allocation2 + $0xf1] sm:$0xff] }
 0x129   : > { %v1200_v2 = vpop.f32.mrf.mxu0  ;;  %v3872_v3 = vpop.f32.mrf.mxu1 }
 0x12a   : > { %v935_v4 = vadd.f32 %v3872_v3, %v4850_v9  ;;  %v4940_v26 = vadd.f32 %v1197_v63, %v924_v11 }
 0x12b   : > { %v3911_v29 = vpop.f32.mrf.mxu0  ;;  %4126 = vmatmul.mubr.msk.bf16.gmra.mxu0 %vm398_vm1, %v4621_v14  ;;  %v926_v12 = vpop.f32.mrf.mxu1  ;;  %v2579_v14 = vld [vmem:[#allocation2 + $0xd9] sm:$0xff] }
 0x12c   : > { %4129 = vmatprep.mubr.msk.bf16.mxu0 %vm398_vm1, %v4623_v16  ;;  %v927_v10 = vadd.f32 %v926_v12, %v4856_v21  ;;  %v4945_v50 = vadd.f32 %v3908_v35, %v935_v4  ;;  %v2582_v16 = vld [vmem:[#allocation2 + $0xf9] sm:$0xff]  ;;  %v2604_v6 = vpack.c.bf16 %v2580_v51, %v2579_v14 }
 0x12d   : > { %v1213_v49 = vpop.f32.mrf.mxu0  ;;  %v3875_v48 = vpop.f32.mrf.mxu1  ;;  %4090 = vmatmul.mubr.msk.bf16.gmra.mxu1 %vm398_vm1, %v2602_v34  ;;  %v2605_v60 = vpack.c.bf16 %v2582_v16, %v2581_v58 }
 0x12e   : > { %v948_v9 = vadd.f32 %v3875_v48, %v4860_v42  ;;  %4093 = vmatprep.mubr.msk.bf16.mxu1 %vm398_vm1, %v2603_v37  ;;  %v4950_v63 = vadd.f32 %v1200_v2, %v927_v10  ;;  %v2584_v37 = vld [vmem:[#allocation2 + $0x111] sm:$0xff] }
 0x12f   : > { %v3912_v24 = vpop.f32.mrf.mxu0  ;;  %v939_v45 = vpop.f32.mrf.mxu1 }
 0x130   : > { %v940_v21 = vadd.f32 %v939_v45, %v4867_v59  ;;  %v4953_v35 = vadd.f32 %v3911_v29, %v948_v9 }
 0x131   : > { %v1216_v55 = vpop.f32.mrf.mxu0  ;;  %v3876_v25 = vpop.f32.mrf.mxu1 }
 0x132   : > { %v951_v23 = vadd.f32 %v3876_v25, %v4873_v62  ;;  %v4958_v11 = vadd.f32 %v1213_v49, %v940_v21  ;;  %v2585_v49 = vld [vmem:[#allocation2 + $0x121] sm:$0xff] }
 0x133   : > { %v3915_v42 = vpop.f32.mrf.mxu0  ;;  %4130 = vmatmul.mubr.msk.bf16.gmra.mxu0 %vm398_vm1, %v4637_v32  ;;  %v942_v2 = vpop.f32.mrf.mxu1  ;;  %v2583_v32 = vld [vmem:[#allocation2 + $0x109] sm:$0xff]  ;;  %v2896_v25 = vld [vmem:[#allocation2 + $0x15a] sm:$0xff] }
 0x134   : > { %4133 = vmatprep.mubr.msk.bf16.mxu0 %vm398_vm1, %v4639_v39  ;;  %v943_v59 = vadd.f32 %v942_v2, %v4879_v18  ;;  %v4963_v34 = vadd.f32 %v3912_v24, %v951_v23  ;;  %v2586_v39 = vld [vmem:[#allocation2 + $0x129] sm:$0xff]  ;;  %v2606_v14 = vpack.c.bf16 %v2584_v37, %v2583_v32 }
 0x135   : > { %v1229_v3 = vpop.f32.mrf.mxu0  ;;  %v3879_v4 = vpop.f32.mrf.mxu1  ;;  %4094 = vmatmul.mubr.msk.bf16.gmra.mxu1 %vm398_vm1, %v2604_v6  ;;  %v2607_v45 = vpack.c.bf16 %v2586_v39, %v2585_v49 }
 0x136   : > { %v964_v62 = vadd.f32 %v3879_v4, %v4885_v30  ;;  %4097 = vmatprep.mubr.msk.bf16.mxu1 %vm398_vm1, %v2605_v60  ;;  %v4968_v12 = vadd.f32 %v1216_v55, %v943_v59  ;;  %v2895_v55 = vld [vmem:[#allocation2 + $0x152] sm:$0xff]  ;;  %v2588_v60 = vld [vmem:[#allocation2 + $0x141] sm:$0xff] }
 0x137   : > { %v3916_v29 = vpop.f32.mrf.mxu0  ;;  %v955_v10 = vpop.f32.mrf.mxu1  ;;  %v2915_v59 = vpack.c.bf16 %v2896_v25, %v2895_v55 }
 0x138   : > { %v956_v18 = vadd.f32 %v955_v10, %v4892_v36  ;;  %v4971_v9 = vadd.f32 %v3915_v42, %v964_v62  ;;  %v2587_v42 = vld [vmem:[#allocation2 + $0x139] sm:$0xff] }
 0x139   : > { %v1232_v48 = vpop.f32.mrf.mxu0  ;;  %v3880_v24 = vpop.f32.mrf.mxu1  ;;  %v2608_v37 = vpack.c.bf16 %v2588_v60, %v2587_v42 }
 0x13a   : > { %v967_v51 = vadd.f32 %v3880_v24, %v4898_v41  ;;  %v4976_v58 = vadd.f32 %v1229_v3, %v956_v18  ;;  %v2590_v3 = vld [vmem:[#allocation2 + $0x159] sm:$0xff] }
 0x13b   : > { %v3919_v30 = vpop.f32.mrf.mxu0  ;;  %4134 = vmatmul.mubr.msk.bf16.gmra.mxu0 %vm398_vm1, %v4653_v54  ;;  %v958_v16 = vpop.f32.mrf.mxu1  ;;  %v2898_v24 = vld [vmem:[#allocation2 + $0x172] sm:$0xff] }
 0x13c   : > { %4137 = vmatprep.mubr.msk.bf16.mxu0 %vm398_vm1, %v4655_v56  ;;  %v959_v36 = vadd.f32 %v958_v16, %v4903_v19  ;;  %v4981_v6 = vadd.f32 %v3916_v29, %v967_v51  ;;  %v2589_v19 = vld [vmem:[#allocation2 + $0x151] sm:$0xff]  ;;  %v2591_v16 = vld [vmem:[#allocation2 + $0x169] sm:$0xff] }
 0x13d   : > { %v1245_v21 = vpop.f32.mrf.mxu0  ;;  %v3883_v23 = vpop.f32.mrf.mxu1  ;;  %4098 = vmatmul.mubr.msk.bf16.gmra.mxu1 %vm398_vm1, %v2606_v14  ;;  %v2609_v49 = vpack.c.bf16 %v2590_v3, %v2589_v19  ;;  %v2902_v19 = vld [vmem:[#allocation2 + $0x1a2] sm:$0xff] }
 0x13e   : > { %v980_v41 = vadd.f32 %v3883_v23, %v4822_v57  ;;  %4101 = vmatprep.mubr.msk.bf16.mxu1 %vm398_vm1, %v2607_v45  ;;  %v4986_v2 = vadd.f32 %v1232_v48, %v959_v36  ;;  %v2897_v48 = vld [vmem:[#allocation2 + $0x16a] sm:$0xff] }
 0x13f   : > { %v3920_v54 = vpop.f32.mrf.mxu0  ;;  %v971_v56 = vpop.f32.mrf.mxu1  ;;  %v2592_v36 = vld [vmem:[#allocation2 + $0x171] sm:$0xff] }
 0x140   : > { %v972_v4 = vadd.f32 %v971_v56, %v4830_v1  ;;  %v4989_v29 = vadd.f32 %v3919_v30, %v980_v41 }
 0x141   : > { %v1248_v62 = vpop.f32.mrf.mxu0  ;;  %v3884_v32 = vpop.f32.mrf.mxu1 }
 0x142   : > { %v983_v57 = vadd.f32 %v3884_v32, %v4834_v20  ;;  %v4994_v39 = vadd.f32 %v1245_v21, %v972_v4 }
 0x143   : > { %v3923_v10 = vpop.f32.mrf.mxu0  ;;  %4138 = vmatmul.mubr.msk.bf16.gmra.mxu0 %vm398_vm1, %v4669_v13  ;;  %v974_v18 = vpop.f32.mrf.mxu1  ;;  %v2916_v13 = vpack.c.bf16 %v2898_v24, %v2897_v48 }
 0x144   : > { %4141 = vmatprep.mubr.msk.bf16.mxu0 %vm398_vm1, %v2915_v59  ;;  %v975_v1 = vadd.f32 %v974_v18, %v4840_v38  ;;  %v4998_v51 = vadd.f32 %v3920_v54, %v983_v57  ;;  %v2610_v54 = vpack.c.bf16 %v2592_v36, %v2591_v16  ;;  %v2901_v59 = vld [vmem:[#allocation2 + $0x19a] sm:$0xff] }
 0x145   : > { %v1261_v14 = vpop.f32.mrf.mxu0  ;;  %v3887_v30 = vpop.f32.mrf.mxu1  ;;  %4102 = vmatmul.mubr.msk.bf16.gmra.mxu1 %vm398_vm1, %v2608_v37  ;;  %v2918_v37 = vpack.c.bf16 %v2902_v19, %v2901_v59  ;;  %v2595_v57 = vld [vmem:[#allocation2 + $0x199] sm:$0xff] }
 0x146   : > { %v996_v20 = vadd.f32 %v3887_v30, %v4846_v47  ;;  %4105 = vmatprep.mubr.msk.bf16.mxu1 %vm398_vm1, %v2609_v49  ;;  %v5003_v21 = vadd.f32 %v1248_v62, %v975_v1 }
 0x147   : > { %v3924_v45 = vpop.f32.mrf.mxu0  ;;  %v987_v55 = vpop.f32.mrf.mxu1 }
 0x148   : > { %v988_v25 = vadd.f32 %v987_v55, %v4854_v0  ;;  %v5006_v23 = vadd.f32 %v3923_v10, %v996_v20  ;;  %v2596_v10 = vld [vmem:[#allocation2 + $0x1a1] sm:$0xff] }
 0x149   : > { %v1264_v38 = vpop.f32.mrf.mxu0  ;;  %v3888_v41 = vpop.f32.mrf.mxu1  ;;  %v2612_v1 = vpack.c.bf16 %v2596_v10, %v2595_v57 }
 0x14a   : > { %v999_v42 = vadd.f32 %v3888_v41, %v4858_v22  ;;  %v5010_v47 = vadd.f32 %v1261_v14, %v988_v25 }
 0x14b   : > { %v3927_v60 = vpop.f32.mrf.mxu0  ;;  %4142 = vmatmul.mubr.msk.bf16.gmra.mxu0 %vm398_vm1, %v2916_v13  ;;  %v990_v56 = vpop.f32.mrf.mxu1 }
 0x14c   : > { %4145 = vmatprep.mubr.msk.bf16.mxu0 %vm398_vm1, %v4883_v28  ;;  %v991_v0 = vadd.f32 %v990_v56, %v4864_v46  ;;  %v5015_v4 = vadd.f32 %v3924_v45, %v999_v42 }
 0x14d   : > { %v1277_v3 = vpop.f32.mrf.mxu0  ;;  %v3891_v62 = vpop.f32.mrf.mxu1  ;;  %4106 = vmatmul.mubr.msk.bf16.gmra.mxu1 %vm398_vm1, %v2610_v54 }
 0x14e   : > { %v1012_v22 = vadd.f32 %v3891_v62, %v4869_v61  ;;  %4109 = vmatprep.mubr.msk.bf16.mxu1 %vm398_vm1, %v4767_v7  ;;  %v5021_v28 = vadd.f32 %v1264_v38, %v991_v0 }
 0x14f   : > { %v3928_v32 = vpop.f32.mrf.mxu0  ;;  %v1003_v49 = vpop.f32.mrf.mxu1 }
 0x150   : > { %v1004_v46 = vadd.f32 %v1003_v49, %v4877_v5  ;;  %v5024_v48 = vadd.f32 %v3927_v60, %v1012_v22 }
 0x151   : > { %v1280_v18 = vpop.f32.mrf.mxu0  ;;  %v3892_v24 = vpop.f32.mrf.mxu1 }
 0x152   : > { %v1015_v14 = vadd.f32 %v3892_v24, %v4881_v27  ;;  %v5028_v30 = vadd.f32 %v1277_v3, %v1004_v46 }
 0x153   : > { %v3931_v61 = vpop.f32.mrf.mxu0  ;;  %4146 = vmatmul.mubr.msk.bf16.gmra.mxu0 %vm398_vm1, %v2918_v37  ;;  %v1006_v7 = vpop.f32.mrf.mxu1 }
 0x154   : > { %v1007_v20 = vadd.f32 %v1006_v7, %v4888_v33  ;;  %v5031_v13 = vadd.f32 %v3928_v32, %v1015_v14 }
 0x155   : > { %v1293_v45 = vpop.f32.mrf.mxu0  ;;  %v3895_v16 = vpop.f32.mrf.mxu1  ;;  %4110 = vmatmul.mubr.msk.bf16.gmra.mxu1 %vm398_vm1, %v2612_v1 }
 0x156   : > { %v1028_v5 = vadd.f32 %v3895_v16, %v4894_v40  ;;  %v5035_v55 = vadd.f32 %v1280_v18, %v1007_v20 }
 0x157   : > { %v3932_v36 = vpop.f32.mrf.mxu0  ;;  %v1019_v27 = vpop.f32.mrf.mxu1 }
 0x158   : > { %v1020_v25 = vadd.f32 %v1019_v27, %v4901_v52  ;;  %v5038_v41 = vadd.f32 %v3931_v61, %v1028_v5 }
 0x159   : > { %v1296_v38 = vpop.f32.mrf.mxu0  ;;  %v3896_v54 = vpop.f32.mrf.mxu1 }
 0x15a   : > { %v1031_v33 = vadd.f32 %v3896_v54, %v4905_v15  ;;  %v5041_v60 = vadd.f32 %v1293_v45, %v1020_v25 }
 0x15b   : > { %v3975_v42 = vpop.f32.mrf.mxu0  ;;  %v1022_v56 = vpop.f32.mrf.mxu1 }
 0x15c   : > { %v1023_v59 = vadd.f32 %v1022_v56, %v4909_v8  ;;  %v5044_v40 = vadd.f32 %v3932_v36, %v1031_v33 }
 0x15d   : > { %v1793_v19 = vpop.f32.mrf.mxu0  ;;  %v3939_v0 = vpop.f32.mrf.mxu1 }
 0x15e   : > { %v1616_v3 = vadd.f32 %v3939_v0, %v4917_v17  ;;  %v5047_v52 = vadd.f32 %v1296_v38, %v1023_v59 }
 0x15f   : > { %v3976_v62 = vpop.f32.mrf.mxu0  ;;  %v1487_v22 = vpop.f32.mrf.mxu1 }
 0x160   : > { %v1614_v32 = vadd.f32 %v1487_v22, %v4922_v53  ;;  %v5050_v15 = vadd.f32 %v3975_v42, %v1616_v3 }
 0x161   : > { %v1796_v37 = vpop.f32.mrf.mxu0  ;;  %v3940_v57 = vpop.f32.mrf.mxu1 }
 0x162   : > { %v1617_v10 = vadd.f32 %v3940_v57, %v4927_v31  ;;  %v5053_v8 = vadd.f32 %v1793_v19, %v1614_v32 }
 0x163   : > { %v3979_v49 = vpop.f32.mrf.mxu0  ;;  %v1490_v46 = vpop.f32.mrf.mxu1 }
 0x164   : > { %v1615_v18 = vadd.f32 %v1490_v46, %v4932_v43  ;;  %v5056_v17 = vadd.f32 %v3976_v62, %v1617_v10 }
 0x165   : > { %v1809_v24 = vpop.f32.mrf.mxu0  ;;  %v3943_v1 = vpop.f32.mrf.mxu1 }
 0x166   : > { %v1620_v14 = vadd.f32 %v3943_v1, %v4935_v44  ;;  %v5059_v53 = vadd.f32 %v1796_v37, %v1615_v18 }
 0x167   : > { %v3980_v61 = vpop.f32.mrf.mxu0  ;;  %v1503_v7 = vpop.f32.mrf.mxu1 }
 0x168   : > { %v1618_v20 = vadd.f32 %v1503_v7, %v4940_v26  ;;  %v5062_v31 = vadd.f32 %v3979_v49, %v1620_v14 }
 0x169   : > { %v1812_v45 = vpop.f32.mrf.mxu0  ;;  %v3944_v16 = vpop.f32.mrf.mxu1 }
 0x16a   : > { %v1621_v5 = vadd.f32 %v3944_v16, %v4945_v50  ;;  %v5065_v43 = vadd.f32 %v1809_v24, %v1618_v20 }
 0x16b   : > { %v3983_v36 = vpop.f32.mrf.mxu0  ;;  %v1506_v27 = vpop.f32.mrf.mxu1 }
 0x16c   : > { %v1619_v25 = vadd.f32 %v1506_v27, %v4950_v63  ;;  %v5068_v44 = vadd.f32 %v3980_v61, %v1621_v5 }
 0x16d   : > { %v1825_v38 = vpop.f32.mrf.mxu0  ;;  %v3947_v54 = vpop.f32.mrf.mxu1 }
 0x16e   : > { %v1624_v33 = vadd.f32 %v3947_v54, %v4953_v35  ;;  %v5071_v26 = vadd.f32 %v1812_v45, %v1619_v25 }
 0x16f   : > { %v3984_v42 = vpop.f32.mrf.mxu0  ;;  %v1519_v56 = vpop.f32.mrf.mxu1 }
 0x170   : > { %v1622_v59 = vadd.f32 %v1519_v56, %v4958_v11  ;;  %v5074_v50 = vadd.f32 %v3983_v36, %v1624_v33 }
 0x171   : > { %v1828_v19 = vpop.f32.mrf.mxu0  ;;  %v3948_v0 = vpop.f32.mrf.mxu1 }
 0x172   : > { %v1625_v3 = vadd.f32 %v3948_v0, %v4963_v34  ;;  %v5077_v63 = vadd.f32 %v1825_v38, %v1622_v59 }
 0x173   : > { %v3987_v62 = vpop.f32.mrf.mxu0  ;;  %v1522_v22 = vpop.f32.mrf.mxu1 }
 0x174   : > { %v1623_v32 = vadd.f32 %v1522_v22, %v4968_v12  ;;  %v5080_v35 = vadd.f32 %v3984_v42, %v1625_v3 }
 0x175   : > { %v1841_v37 = vpop.f32.mrf.mxu0  ;;  %v3951_v57 = vpop.f32.mrf.mxu1 }
 0x176   : > { %v1628_v10 = vadd.f32 %v3951_v57, %v4971_v9  ;;  %v5083_v11 = vadd.f32 %v1828_v19, %v1623_v32 }
 0x177   : > { %v3988_v49 = vpop.f32.mrf.mxu0  ;;  %v1535_v46 = vpop.f32.mrf.mxu1 }
 0x178   : > { %v1626_v18 = vadd.f32 %v1535_v46, %v4976_v58  ;;  %v5086_v34 = vadd.f32 %v3987_v62, %v1628_v10 }
 0x179   : > { %v1844_v24 = vpop.f32.mrf.mxu0  ;;  %v3952_v1 = vpop.f32.mrf.mxu1 }
 0x17a   : > { %v1629_v14 = vadd.f32 %v3952_v1, %v4981_v6  ;;  %v5089_v12 = vadd.f32 %v1841_v37, %v1626_v18 }
 0x17b   : > { %v3991_v61 = vpop.f32.mrf.mxu0  ;;  %v1538_v7 = vpop.f32.mrf.mxu1 }
 0x17c   : > { %v1627_v20 = vadd.f32 %v1538_v7, %v4986_v2  ;;  %v5092_v9 = vadd.f32 %v3988_v49, %v1629_v14 }
 0x17d   : > { %v1857_v45 = vpop.f32.mrf.mxu0  ;;  %v3955_v16 = vpop.f32.mrf.mxu1 }
 0x17e   : > { %v1632_v5 = vadd.f32 %v3955_v16, %v4989_v29  ;;  %v5095_v58 = vadd.f32 %v1844_v24, %v1627_v20 }
 0x17f   : > { %v3992_v36 = vpop.f32.mrf.mxu0  ;;  %v1551_v27 = vpop.f32.mrf.mxu1 }
 0x180   : > { %v1630_v25 = vadd.f32 %v1551_v27, %v4994_v39  ;;  %v5098_v6 = vadd.f32 %v3991_v61, %v1632_v5 }
 0x181   : > { %v1860_v38 = vpop.f32.mrf.mxu0  ;;  %v3956_v54 = vpop.f32.mrf.mxu1 }
 0x182   : > { %v1633_v33 = vadd.f32 %v3956_v54, %v4998_v51  ;;  %v5101_v2 = vadd.f32 %v1857_v45, %v1630_v25 }
 0x183   : > { %v3995_v42 = vpop.f32.mrf.mxu0  ;;  %v1554_v56 = vpop.f32.mrf.mxu1 }
 0x184   : > { %v1631_v59 = vadd.f32 %v1554_v56, %v5003_v21  ;;  %v5104_v29 = vadd.f32 %v3992_v36, %v1633_v33 }
 0x185   : > { %v1873_v19 = vpop.f32.mrf.mxu0  ;;  %v3959_v0 = vpop.f32.mrf.mxu1 }
 0x186   : > { %v1636_v3 = vadd.f32 %v3959_v0, %v5006_v23  ;;  %v5107_v39 = vadd.f32 %v1860_v38, %v1631_v59 }
 0x187   : > { %v3996_v62 = vpop.f32.mrf.mxu0  ;;  %v1567_v22 = vpop.f32.mrf.mxu1 }
 0x188   : > { %5551 = vst [vmem:[#allocation3_spill] sm:$0xff] %v5107_v39  ;;  %v1634_v32 = vadd.f32 %v1567_v22, %v5010_v47  ;;  %v5110_v51 = vadd.f32 %v3995_v42, %v1636_v3 }
 0x189   : > { %v1876_v37 = vpop.f32.mrf.mxu0  ;;  %v3960_v57 = vpop.f32.mrf.mxu1 }
 0x18a   : > { %5552 = vst [vmem:[#allocation4_spill] sm:$0xff] %v5110_v51  ;;  %v1637_v10 = vadd.f32 %v3960_v57, %v5015_v4  ;;  %v5113_v21 = vadd.f32 %v1873_v19, %v1634_v32 }
 0x18b   : > { %v3999_v49 = vpop.f32.mrf.mxu0  ;;  %v1570_v46 = vpop.f32.mrf.mxu1 }
 0x18c   : > { %5553 = vst [vmem:[#allocation5_spill] sm:$0xff] %v5113_v21  ;;  %v1635_v18 = vadd.f32 %v1570_v46, %v5021_v28  ;;  %v5116_v23 = vadd.f32 %v3996_v62, %v1637_v10 }
 0x18d   : > { %v1889_v24 = vpop.f32.mrf.mxu0  ;;  %v3963_v1 = vpop.f32.mrf.mxu1 }
 0x18e   : > { %5554 = vst [vmem:[#allocation6_spill] sm:$0xff] %v5116_v23  ;;  %v1640_v14 = vadd.f32 %v3963_v1, %v5024_v48  ;;  %v5119_v47 = vadd.f32 %v1876_v37, %v1635_v18 }
 0x18f   : > { %v4000_v61 = vpop.f32.mrf.mxu0  ;;  %v1583_v7 = vpop.f32.mrf.mxu1 }
 0x190   : > { %5555 = vst [vmem:[#allocation7_spill] sm:$0xff] %v5119_v47  ;;  %v1638_v20 = vadd.f32 %v1583_v7, %v5028_v30  ;;  %v5122_v4 = vadd.f32 %v3999_v49, %v1640_v14 }
 0x191   : > { %v1892_v45 = vpop.f32.mrf.mxu0  ;;  %v3964_v16 = vpop.f32.mrf.mxu1 }
 0x192   : > { %5556 = vst [vmem:[#allocation8_spill] sm:$0xff] %v5122_v4  ;;  %v1641_v5 = vadd.f32 %v3964_v16, %v5031_v13  ;;  %v5125_v28 = vadd.f32 %v1889_v24, %v1638_v20 }
 0x193   : > { %v4003_v36 = vpop.f32.mrf.mxu0  ;;  %v1586_v27 = vpop.f32.mrf.mxu1 }
 0x194   : > { %5557 = vst [vmem:[#allocation9_spill] sm:$0xff] %v5125_v28  ;;  %v1639_v25 = vadd.f32 %v1586_v27, %v5035_v55  ;;  %v5128_v48 = vadd.f32 %v4000_v61, %v1641_v5 }
 0x195   : > { %v1905_v38 = vpop.f32.mrf.mxu0  ;;  %v3967_v54 = vpop.f32.mrf.mxu1 }
 0x196   : > { %5558 = vst [vmem:[#allocation10_spill] sm:$0xff] %v5128_v48  ;;  %v1644_v33 = vadd.f32 %v3967_v54, %v5038_v41  ;;  %v5131_v30 = vadd.f32 %v1892_v45, %v1639_v25 }
 0x197   : > { %v4004_v42 = vpop.f32.mrf.mxu0  ;;  %v1599_v56 = vpop.f32.mrf.mxu1 }
 0x198   : > { %5559 = vst [vmem:[#allocation11_spill] sm:$0xff] %v5131_v30  ;;  %v1642_v59 = vadd.f32 %v1599_v56, %v5041_v60  ;;  %v5134_v13 = vadd.f32 %v4003_v36, %v1644_v33 }
 0x199   : > { %v1908_v19 = vpop.f32.mrf.mxu0  ;;  %v3968_v0 = vpop.f32.mrf.mxu1 }
 0x19a   : > { %5560 = vst [vmem:[#allocation12_spill] sm:$0xff] %v5134_v13  ;;  %v1645_v3 = vadd.f32 %v3968_v0, %v5044_v40  ;;  %v5139_v55 = vadd.f32 %v1905_v38, %v1642_v59 }
 0x19b   : > { %v5137_v62 = vpop.f32.mrf.mxu0  ;;  %v1602_v22 = vpop.f32.mrf.mxu1 }
 0x19c   : > { %5561 = vst [vmem:[#allocation13_spill] sm:$0xff] %v5139_v55  ;;  %v1643_v32 = vadd.f32 %v1602_v22, %v5047_v52  ;;  %v5144_v37 = vadd.f32 %v4004_v42, %v1645_v3 }
 0x19d   : > { %v5142_v41 = vpop.f32.mrf.mxu0  ;;  %v4011_v57 = vpop.f32.mrf.mxu1 }
 0x19e   : > { %5562 = vst [vmem:[#allocation14_spill] sm:$0xff] %v5144_v37  ;;  %v5148_v60 = vadd.f32 %v1908_v19, %v1643_v32 }
 0x19f   : > { %v5146_v10 = vpop.f32.mrf.mxu0  ;;  %v2099_v49 = vpop.f32.mrf.mxu1 }
 0x1a0   : > { %5563 = vst [vmem:[#allocation15_spill] sm:$0xff] %v5148_v60 }
 0x1a1   : > { %v5150_v46 = vpop.f32.mrf.mxu0  ;;  %v4012_v40 = vpop.f32.mrf.mxu1 }
 0x1a3   : > { %v5152_v18 = vpop.f32.mrf.mxu0  ;;  %v2102_v24 = vpop.f32.mrf.mxu1 }
 0x1a5   : > { %v5154_v1 = vpop.f32.mrf.mxu0  ;;  %v4015_v14 = vpop.f32.mrf.mxu1 }
 0x1a7   : > { %v5156_v52 = vpop.f32.mrf.mxu0  ;;  %v2115_v61 = vpop.f32.mrf.mxu1 }
 0x1a9   : > { %v5158_v7 = vpop.f32.mrf.mxu0  ;;  %v5160_v20 = vpop.f32.mrf.mxu1 }
 0x1ab   : > { %v5162_v45 = vpop.f32.mrf.mxu0  ;;  %v5164_v16 = vpop.f32.mrf.mxu1 }
 0x1ad   : > { %v5166_v5 = vpop.f32.mrf.mxu0  ;;  %v5168_v36 = vpop.f32.mrf.mxu1 }
 0x1af   : > { %v5170_v27 = vpop.f32.mrf.mxu0  ;;  %v5172_v25 = vpop.f32.mrf.mxu1 }
 0x1b1   : > { %v5174_v38 = vpop.f32.mrf.mxu0  ;;  %v5176_v54 = vpop.f32.mrf.mxu1 }
 0x1b3   : > { %v5178_v33 = vpop.f32.mrf.mxu0  ;;  %v5180_v42 = vpop.f32.mrf.mxu1 }
 0x1b5   : > { %v5182_v56 = vpop.f32.mrf.mxu0  ;;  %v5184_v59 = vpop.f32.mrf.mxu1 }
 0x1b7   : > { %v5186_v19 = vpop.f32.mrf.mxu0  ;;  %v5188_v0 = vpop.f32.mrf.mxu1 }
 0x1b8   : > { %5564 = vst [vmem:[#allocation16_spill] sm:$0xff] %v5186_v19 }
 0x1b9   : > { %v5190_v3 = vpop.f32.mrf.mxu0  ;;  %v5192_v22 = vpop.f32.mrf.mxu1 }
 0x1ba   : > { %5565 = vst [vmem:[#allocation17_spill] sm:$0xff] %v5190_v3 }
 0x1bb   : > { %v5194_v32 = vpop.f32.mrf.mxu0  ;;  %v5196_v60 = vpop.f32.mrf.mxu1 }
 0x1bc   : > { %5566 = vst [vmem:[#allocation18_spill] sm:$0xff] %v5194_v32 }
 0x1bd   : > { %v5198_v37 = vpop.f32.mrf.mxu0  ;;  %v5200_v55 = vpop.f32.mrf.mxu1 }
 0x1be   : > { %5567 = vst [vmem:[#allocation19_spill] sm:$0xff] %v5198_v37 }
 0x1bf   : > { %v5202_v13 = vpop.f32.mrf.mxu0  ;;  %v5204_v30 = vpop.f32.mrf.mxu1 }
 0x1c0   : > { %5568 = vst [vmem:[#allocation20_spill] sm:$0xff] %v5202_v13 }
 0x1c1   : > { %v5206_v48 = vpop.f32.mrf.mxu0  ;;  %v5208_v28 = vpop.f32.mrf.mxu1 }
 0x1c2   : > { %5569 = vst [vmem:[#allocation21_spill] sm:$0xff] %v5206_v48 }
 0x1c3   : > { %v5210_v4 = vpop.f32.mrf.mxu0  ;;  %v5212_v47 = vpop.f32.mrf.mxu1 }
 0x1c4   : > { %5570 = vst [vmem:[#allocation22_spill] sm:$0xff] %v5210_v4  ;;  %5571 = vst [vmem:[#allocation23_spill] sm:$0xff] %v5212_v47 }
 0x1c5   : > { %v5214_v23 = vpop.f32.mrf.mxu0  ;;  %v5216_v21 = vpop.f32.mrf.mxu1 }
 0x1c6   : > { %5572 = vst [vmem:[#allocation24_spill] sm:$0xff] %v5214_v23  ;;  %5573 = vst [vmem:[#allocation25_spill] sm:$0xff] %v5216_v21 }
 0x1c7   : > { %v5218_v51 = vpop.f32.mrf.mxu0  ;;  %v5220_v39 = vpop.f32.mrf.mxu1 }
 0x1c8   : > { %5574 = vst [vmem:[#allocation26_spill] sm:$0xff] %v5218_v51  ;;  %5575 = vst [vmem:[#allocation27_spill] sm:$0xff] %v5220_v39 }
 0x1c9   : > { %v5222_v37 = vpop.f32.mrf.mxu0  ;;  %v5224_v13 = vpop.f32.mrf.mxu1 }
 0x1ca   : > { %5576 = vst [vmem:[#allocation28_spill] sm:$0xff] %v5222_v37  ;;  %5577 = vst [vmem:[#allocation29_spill] sm:$0xff] %v5224_v13 }
 0x1cb   : > { %v5226_v32 = vpop.f32.mrf.mxu0  ;;  %v5228_v48 = vpop.f32.mrf.mxu1 }
 0x1cc   : > { %5578 = vst [vmem:[#allocation30_spill] sm:$0xff] %v5226_v32  ;;  %5579 = vst [vmem:[#allocation31_spill] sm:$0xff] %v5228_v48 }
 0x1cd   : > { %v5230_v3 = vpop.f32.mrf.mxu0  ;;  %v5232_v4 = vpop.f32.mrf.mxu1 }
 0x1ce   : > { %5580 = vst [vmem:[#allocation32_spill] sm:$0xff] %v5230_v3  ;;  %5581 = vst [vmem:[#allocation33_spill] sm:$0xff] %v5232_v4 }
 0x1cf   : > { %v5234_v47 = vpop.f32.mrf.mxu0  ;;  %v5236_v23 = vpop.f32.mrf.mxu1 }
 0x1d0   : > { %5582 = vst [vmem:[#allocation34_spill] sm:$0xff] %v5234_v47  ;;  %5583 = vst [vmem:[#allocation35_spill] sm:$0xff] %v5236_v23  ;;  %v2228_v47 = vadd.f32 %v4011_v57, %v5050_v15  ;;  %v2230_v15 = vadd.f32 %v2115_v61, %v5065_v43  ;;  %v5594_v61 = vld [vmem:[#allocation16_spill] sm:$0xff] }
 0x1d1   : > { %v5238_v21 = vpop.f32.mrf.mxu0  ;;  %v5240_v51 = vpop.f32.mrf.mxu1 }
 0x1d2   : > { %5584 = vst [vmem:[#allocation36_spill] sm:$0xff] %v5238_v21  ;;  %5585 = vst [vmem:[#allocation37_spill] sm:$0xff] %v5240_v51  ;;  %v2226_v21 = vadd.f32 %v2099_v49, %v5053_v8 }
 0x1d3   : > { %v5242_v39 = vpop.f32.mrf.mxu0  ;;  %v5244_v37 = vpop.f32.mrf.mxu1 }
 0x1d4   : > { %5586 = vst [vmem:[#allocation38_spill] sm:$0xff] %v5242_v39  ;;  %5587 = vst [vmem:[#allocation39_spill] sm:$0xff] %v5244_v37  ;;  %v2229_v39 = vadd.f32 %v4012_v40, %v5056_v17  ;;  %v2227_v37 = vadd.f32 %v2102_v24, %v5059_v53  ;;  %v2233_v53 = vadd.f32 %v5160_v20, %v5068_v44 }
 0x1d5   : > { %v5246_v13 = vpop.f32.mrf.mxu0  ;;  %v5248_v32 = vpop.f32.mrf.mxu1  ;;  %v2235_v44 = vadd.f32 %v5180_v42, %v5083_v11 }
 0x1d6   : > { %5588 = vst [vmem:[#allocation40_spill] sm:$0xff] %v5246_v13  ;;  %5589 = vst [vmem:[#allocation41_spill] sm:$0xff] %v5248_v32  ;;  %v2232_v13 = vadd.f32 %v4015_v14, %v5062_v31  ;;  %v2536_v8 = vadd.f32 %v5146_v10, %v2229_v39  ;;  %v2534_v17 = vadd.f32 %v5150_v46, %v2227_v37 }
 0x1d7   : > { %v5250_v48 = vpop.f32.mrf.mxu0  ;;  %v5252_v3 = vpop.f32.mrf.mxu1  ;;  %v2231_v31 = vadd.f32 %v5164_v16, %v5071_v26  ;;  %v2237_v39 = vadd.f32 %v5176_v54, %v5080_v35  ;;  %v2240_v26 = vadd.f32 %v5184_v59, %v5086_v34  ;;  %v2537_v10 = vadd.f32 %v5154_v1, %v2230_v15  ;;  %v5599_v54 = vld [vmem:[#allocation23_spill] sm:$0xff] }
 0x1d8   : > { %5590 = vst [vmem:[#allocation42_spill] sm:$0xff] %v5250_v48  ;;  %5591 = vst [vmem:[#allocation43_spill] sm:$0xff] %v5252_v3  ;;  %v2535_v48 = vadd.f32 %v5137_v62, %v2228_v47  ;;  %v2236_v47 = vadd.f32 %v5168_v36, %v5074_v50  ;;  %v2238_v50 = vadd.f32 %v5188_v0, %v5089_v12 }
 0x1d9   : > { %v5255_v4 = vpop.f32.mrf.mxu0  ;;  %v5257_v23 = vpop.f32.mrf.mxu1  ;;  %v2239_v35 = vadd.f32 %v5196_v60, %v5095_v58  ;;  %v2244_v34 = vadd.f32 %v5200_v55, %v5098_v6  ;;  %v2242_v12 = vadd.f32 %v5204_v30, %v5101_v2  ;;  %v2540_v49 = vadd.f32 %v5156_v52, %v2233_v53  ;;  %v5602_v53 = vld [vmem:[#allocation25_spill] sm:$0xff] }
 0x1da   : > { %5592 = vst [vmem:[#allocation44_spill] sm:$0xff] %v5255_v4  ;;  %5593 = vst [vmem:[#allocation45_spill] sm:$0xff] %v5257_v23  ;;  %v2533_v23 = vadd.f32 %v5142_v41, %v2226_v21  ;;  %v2234_v21 = vadd.f32 %v5172_v25, %v5077_v63  ;;  %v2241_v63 = vadd.f32 %v5192_v22, %v5092_v9 }
 0x1db   : > { %v4119_v51 = vpop.f32.mrf.mxu0  ;;  %v5263_v32 = vpop.f32.mrf.mxu1  ;;  %v2538_v9 = vadd.f32 %v5158_v7, %v2231_v31  ;;  %v2543_v46 = vadd.f32 %v5162_v45, %v2236_v47  ;;  %v5307_v6 = vadd.f32 %v5170_v27, %v2237_v39  ;;  %v2245_v2 = vadd.f32 %v5208_v28, %v5104_v29  ;;  %v5595_v29 = vld [vmem:[#allocation17_spill] sm:$0xff]  ;;  %v5597_v27 = vld [vmem:[#allocation19_spill] sm:$0xff] }
 0x1dc   : > { %v5304_v40 = vadd.f32 %v5166_v5, %v2234_v21  ;;  %v5315_v24 = vadd.f32 %v5178_v33, %v2240_v26  ;;  %v5320_v52 = vadd.f32 %v5182_v56, %v2238_v50  ;;  %v5323_v7 = vadd.f32 %v5594_v61, %v2241_v63  ;;  %v5596_v5 = vld [vmem:[#allocation18_spill] sm:$0xff]  ;;  %v5603_v63 = vld [vmem:[#allocation21_spill] sm:$0xff] }
 0x1dd   : > { %v3018_v3 = vpop.f32.mrf.mxu0  ;;  %v4083_v57 = vpop.f32.mrf.mxu1  ;;  %v5326_v28 = vadd.f32 %v5595_v29, %v2239_v35  ;;  %v5329_v36 = vadd.f32 %v5596_v5, %v2244_v34  ;;  %v5332_v25 = vadd.f32 %v5597_v27, %v2242_v12 }
 0x1de   : > { %v2841_v4 = vadd.f32 %v4083_v57, %v2535_v48  ;;  %v2539_v48 = vadd.f32 %v5152_v18, %v2232_v13  ;;  %v5312_v18 = vadd.f32 %v5174_v38, %v2235_v44  ;;  %v5598_v38 = vld [vmem:[#allocation3_spill] sm:$0xff]  ;;  %v5600_v57 = vld [vmem:[#allocation20_spill] sm:$0xff] }
 0x1df   : > { %v4120_v19 = vpop.f32.mrf.mxu0  ;;  %v2712_v43 = vpop.f32.mrf.mxu1  ;;  %v2243_v33 = vadd.f32 %v5599_v54, %v5598_v38 }
 0x1e0   : > { %v3147_v62 = vadd.f32 %v4119_v51, %v2841_v4  ;;  %v2839_v41 = vadd.f32 %v2712_v43, %v2533_v23 }
 0x1e1   : > { %v3021_v37 = vpop.f32.mrf.mxu0  ;;  %v4084_v13 = vpop.f32.mrf.mxu1  ;;  %v5354_v35 = vadd.f32 %v5603_v63, %v2243_v33 }
 0x1e2   : > { %3179 = vst.msk [vmem:[%s4242_s8 + $0x10] sm:$0xff] %vm398_vm1, %v3147_v62  ;;  %v3145_v51 = vadd.f32 %v3018_v3, %v2839_v41  ;;  %v2842_v11 = vadd.f32 %v4084_v13, %v2536_v8  ;;  %v3285_v42 = vmul.f32 %v3147_v62, %v3147_v62  ;;  %v5341_v8 = vadd.f32 %v5600_v57, %v2245_v2 }
 0x1e3   : > { %v4123_v23 = vpop.f32.mrf.mxu0  ;;  %v2715_v4 = vpop.f32.mrf.mxu1  ;;  %v3213_v47 = vsel %vm398_vm1, %v3147_v62, 0.0 }
 0x1e4   : > { %3177 = vst.msk [vmem:[%s4242_s8] sm:$0xff] %vm398_vm1, %v3145_v51  ;;  %v3148_v58 = vadd.f32 %v4120_v19, %v2842_v11  ;;  %v2840_v30 = vadd.f32 %v2715_v4, %v2534_v17  ;;  %v3283_v20 = vmul.f32 %v3145_v51, %v3145_v51  ;;  %v3210_v0 = vsel %vm398_vm1, %v3145_v51, 0.0  ;;  %v5601_v17 = vld [vmem:[#allocation4_spill] sm:$0xff]  ;;  %v5604_v4 = vld [vmem:[#allocation5_spill] sm:$0xff] }
 0x1e5   : > { %v3034_v60 = vpop.f32.mrf.mxu0  ;;  %v4087_v55 = vpop.f32.mrf.mxu1  ;;  %v2248_v31 = vadd.f32 %v5602_v53, %v5601_v17  ;;  %v3318_v50 = vsel %vm398_vm1, %v3285_v42, 0.0 }
 0x1e6   : > { %3180 = vst.msk [vmem:[%s4242_s8 + $0x18] sm:$0xff] %vm398_vm1, %v3148_v58  ;;  %v2845_v1 = vadd.f32 %v4087_v55, %v2539_v48  ;;  %v3146_v45 = vadd.f32 %v3021_v37, %v2840_v30  ;;  %v3315_v39 = vsel %vm398_vm1, %v3283_v20, 0.0  ;;  %v3286_v41 = vmul.f32 %v3148_v58, %v3148_v58 }
 0x1e7   : > { %v4124_v14 = vpop.f32.mrf.mxu0  ;;  %v2728_v16 = vpop.f32.mrf.mxu1  ;;  %v3215_v51 = vsel %vm398_vm1, %v3148_v58, 0.0 }
 0x1e8   : > { %v3151_v56 = vadd.f32 %v4123_v23, %v2845_v1  ;;  %v2843_v59 = vadd.f32 %v2728_v16, %v2537_v10  ;;  %3178 = vst.msk [vmem:[%s4242_s8 + $0x8] sm:$0xff] %vm398_vm1, %v3146_v45  ;;  %v3211_v3 = vsel %vm398_vm1, %v3146_v45, 0.0  ;;  %v3284_v22 = vmul.f32 %v3146_v45, %v3146_v45  ;;  %v5606_v45 = vld [vmem:[#allocation22_spill] sm:$0xff] }
 0x1e9   : > { %v3037_v19 = vpop.f32.mrf.mxu0  ;;  %v4088_v15 = vpop.f32.mrf.mxu1  ;;  %v3212_v43 = vadd.f32 %v3211_v3, %v3210_v0  ;;  %v3320_v61 = vsel %vm398_vm1, %v3286_v41, 0.0  ;;  %v5608_v0 = vld [vmem:[#allocation29_spill] sm:$0xff] }
 0x1ea   : > { %3183 = vst.msk [vmem:[%s4242_s8 + $0x30] sm:$0xff] %vm398_vm1, %v3151_v56  ;;  %v3149_v48 = vadd.f32 %v3034_v60, %v2843_v59  ;;  %v3316_v37 = vsel %vm398_vm1, %v3284_v22, 0.0  ;;  %v2846_v44 = vadd.f32 %v4088_v15, %v2540_v49  ;;  %v5605_v49 = vld [vmem:[#allocation27_spill] sm:$0xff]  ;;  %v3221_v22 = vsel %vm398_vm1, %v3151_v56, 0.0 }
 0x1eb   : > { %v4127_v21 = vpop.f32.mrf.mxu0  ;;  %v2731_v26 = vpop.f32.mrf.mxu1  ;;  %v3214_v13 = vadd.f32 %v3213_v47, %v3212_v43  ;;  %v3317_v10 = vadd.f32 %v3316_v37, %v3315_v39  ;;  %v2246_v60 = vadd.f32 %v5605_v49, %v5604_v4  ;;  %v5609_v37 = vld [vmem:[#allocation24_spill] sm:$0xff]  ;;  %v5613_v49 = vld [vmem:[#allocation33_spill] sm:$0xff] }
 0x1ec   : > { %3181 = vst.msk [vmem:[%s4242_s8 + $0x20] sm:$0xff] %vm398_vm1, %v3149_v48  ;;  %v3287_v11 = vmul.f32 %v3149_v48, %v3149_v48  ;;  %v3152_v23 = vadd.f32 %v4124_v14, %v2846_v44  ;;  %v2844_v34 = vadd.f32 %v2731_v26, %v2538_v9  ;;  %v3217_v29 = vsel %vm398_vm1, %v3149_v48, 0.0  ;;  %v5612_v4 = vld [vmem:[#allocation8_spill] sm:$0xff] }
 0x1ed   : > { %v3050_v62 = vpop.f32.mrf.mxu0  ;;  %v4091_v12 = vpop.f32.mrf.mxu1  ;;  %v3319_v2 = vadd.f32 %v3318_v50, %v3317_v10  ;;  %v3216_v30 = vadd.f32 %v3215_v51, %v3214_v13  ;;  %v5364_v14 = vadd.f32 %v5606_v45, %v2248_v31 }
 0x1ee   : > { %v2849_v55 = vadd.f32 %v4091_v12, %v2543_v46  ;;  %3184 = vst.msk [vmem:[%s4242_s8 + $0x38] sm:$0xff] %vm398_vm1, %v3152_v23  ;;  %v3150_v20 = vadd.f32 %v3037_v19, %v2844_v34  ;;  %v3289_v46 = vmul.f32 %v3151_v56, %v3151_v56  ;;  %v3322_v54 = vsel %vm398_vm1, %v3287_v11, 0.0  ;;  %v5607_v19 = vld [vmem:[#allocation6_spill] sm:$0xff]  ;;  %v5610_v11 = vld [vmem:[#allocation7_spill] sm:$0xff] }
 0x1ef   : > { %v4128_v1 = vpop.f32.mrf.mxu0  ;;  %v2744_v58 = vpop.f32.mrf.mxu1  ;;  %v3218_v9 = vadd.f32 %v3217_v29, %v3216_v30  ;;  %v3321_v16 = vadd.f32 %v3320_v61, %v3319_v2  ;;  %v2249_v3 = vadd.f32 %v5608_v0, %v5607_v19  ;;  %v3290_v17 = vmul.f32 %v3152_v23, %v3152_v23  ;;  %v5611_v34 = vld [vmem:[#allocation31_spill] sm:$0xff] }
 0x1f0   : > { %v3155_v5 = vadd.f32 %v4127_v21, %v2849_v55  ;;  %v2847_v27 = vadd.f32 %v2744_v58, %v5304_v40  ;;  %3182 = vst.msk [vmem:[%s4242_s8 + $0x28] sm:$0xff] %vm398_vm1, %v3150_v20  ;;  %v3219_v33 = vsel %vm398_vm1, %v3150_v20, 0.0  ;;  %v3288_v42 = vmul.f32 %v3150_v20, %v3150_v20 }
 0x1f1   : > { %v3053_v38 = vpop.f32.mrf.mxu0  ;;  %v4092_v59 = vpop.f32.mrf.mxu1  ;;  %v3323_v15 = vadd.f32 %v3322_v54, %v3321_v16  ;;  %v3220_v57 = vadd.f32 %v3219_v33, %v3218_v9  ;;  %v5380_v56 = vadd.f32 %v5609_v37, %v2246_v60  ;;  %v3326_v44 = vsel %vm398_vm1, %v3289_v46, 0.0 }
 0x1f2   : > { %3187 = vst.msk [vmem:[%s4242_s8 + $0x50] sm:$0xff] %vm398_vm1, %v3155_v5  ;;  %v3324_v53 = vsel %vm398_vm1, %v3288_v42, 0.0  ;;  %v3153_v31 = vadd.f32 %v3050_v62, %v2847_v27  ;;  %v2850_v47 = vadd.f32 %v4092_v59, %v5307_v6  ;;  %v3223_v26 = vsel %vm398_vm1, %v3152_v23, 0.0 }
 0x1f3   : > { %v4131_v40 = vpop.f32.mrf.mxu0  ;;  %v2747_v43 = vpop.f32.mrf.mxu1  ;;  %v3222_v48 = vadd.f32 %v3221_v22, %v3220_v57  ;;  %v3325_v21 = vadd.f32 %v3324_v53, %v3323_v15  ;;  %v2247_v12 = vadd.f32 %v5611_v34, %v5610_v11  ;;  %v2252_v60 = vadd.f32 %v5613_v49, %v5612_v4  ;;  %v5614_v22 = vld [vmem:[#allocation26_spill] sm:$0xff] }
 0x1f4   : > { %v2848_v39 = vadd.f32 %v2747_v43, %v5312_v18  ;;  %3185 = vst.msk [vmem:[%s4242_s8 + $0x40] sm:$0xff] %vm398_vm1, %v3153_v31  ;;  %v3291_v50 = vmul.f32 %v3153_v31, %v3153_v31  ;;  %v3156_v13 = vadd.f32 %v4128_v1, %v2850_v47  ;;  %v3328_v23 = vsel %vm398_vm1, %v3290_v17, 0.0  ;;  %v5615_v43 = vld [vmem:[#allocation28_spill] sm:$0xff] }
 0x1f5   : > { %v3066_v41 = vpop.f32.mrf.mxu0  ;;  %v4095_v6 = vpop.f32.mrf.mxu1  ;;  %v3327_v10 = vadd.f32 %v3326_v44, %v3325_v21  ;;  %v3224_v62 = vadd.f32 %v3223_v26, %v3222_v48  ;;  %v3225_v2 = vsel %vm398_vm1, %v3153_v31, 0.0  ;;  %v3293_v20 = vmul.f32 %v3155_v5, %v3155_v5  ;;  %v5616_v21 = vld [vmem:[#allocation9_spill] sm:$0xff]  ;;  %v5618_v44 = vld [vmem:[#allocation30_spill] sm:$0xff] }
 0x1f6   : > { %v3154_v63 = vadd.f32 %v3053_v38, %v2848_v39  ;;  %v2853_v18 = vadd.f32 %v4095_v6, %v5315_v24  ;;  %3188 = vst.msk [vmem:[%s4242_s8 + $0x58] sm:$0xff] %vm398_vm1, %v3156_v13  ;;  %v3330_v58 = vsel %vm398_vm1, %v3291_v50, 0.0  ;;  %v3229_v42 = vsel %vm398_vm1, %v3155_v5, 0.0 }
 0x1f7   : > { %v4132_v51 = vpop.f32.mrf.mxu0  ;;  %v2760_v30 = vpop.f32.mrf.mxu1  ;;  %v3226_v55 = vadd.f32 %v3225_v2, %v3224_v62  ;;  %v3329_v1 = vadd.f32 %v3328_v23, %v3327_v10  ;;  %v3294_v59 = vmul.f32 %v3156_v13, %v3156_v13  ;;  %v5406_v15 = vadd.f32 %v5614_v22, %v2249_v3  ;;  %v5617_v3 = vld [vmem:[#allocation35_spill] sm:$0xff] }
 0x1f8   : > { %3186 = vst.msk [vmem:[%s4242_s8 + $0x48] sm:$0xff] %vm398_vm1, %v3154_v63  ;;  %v3227_v24 = vsel %vm398_vm1, %v3154_v63, 0.0  ;;  %v3292_v61 = vmul.f32 %v3154_v63, %v3154_v63  ;;  %v3159_v45 = vadd.f32 %v4131_v40, %v2853_v18  ;;  %v2851_v9 = vadd.f32 %v2760_v30, %v5320_v52  ;;  %v5623_v22 = vld [vmem:[#allocation39_spill] sm:$0xff] }
 0x1f9   : > { %v3069_v29 = vpop.f32.mrf.mxu0  ;;  %v4096_v16 = vpop.f32.mrf.mxu1  ;;  %v3331_v27 = vadd.f32 %v3330_v58, %v3329_v1  ;;  %v3228_v38 = vadd.f32 %v3227_v24, %v3226_v55  ;;  %v3231_v31 = vsel %vm398_vm1, %v3156_v13, 0.0  ;;  %v5414_v48 = vadd.f32 %v5615_v43, %v2247_v12  ;;  %v5619_v24 = vld [vmem:[#allocation10_spill] sm:$0xff] }
 0x1fa   : > { %v3332_v46 = vsel %vm398_vm1, %v3292_v61, 0.0  ;;  %v2854_v54 = vadd.f32 %v4096_v16, %v5323_v7  ;;  %3191 = vst.msk [vmem:[%s4242_s8 + $0x70] sm:$0xff] %vm398_vm1, %v3159_v45  ;;  %v3157_v19 = vadd.f32 %v3066_v41, %v2851_v9  ;;  %v3334_v7 = vsel %vm398_vm1, %v3293_v20, 0.0  ;;  %v5624_v43 = vld [vmem:[#allocation34_spill] sm:$0xff] }
 0x1fb   : > { %v4135_v33 = vpop.f32.mrf.mxu0  ;;  %v2763_v0 = vpop.f32.mrf.mxu1  ;;  %v3230_v52 = vadd.f32 %v3229_v42, %v3228_v38  ;;  %v3333_v57 = vadd.f32 %v3332_v46, %v3331_v27  ;;  %v2250_v39 = vadd.f32 %v5617_v3, %v5616_v21  ;;  %v5421_v26 = vadd.f32 %v5618_v44, %v2252_v60  ;;  %v5621_v46 = vld [vmem:[#allocation32_spill] sm:$0xff] }
 0x1fc   : > { %v3160_v40 = vadd.f32 %v4132_v51, %v2854_v54  ;;  %v2852_v17 = vadd.f32 %v2763_v0, %v5326_v28  ;;  %3189 = vst.msk [vmem:[%s4242_s8 + $0x60] sm:$0xff] %vm398_vm1, %v3157_v19  ;;  %v3295_v5 = vmul.f32 %v3157_v19, %v3157_v19  ;;  %v3336_v50 = vsel %vm398_vm1, %v3294_v59, 0.0  ;;  %v5622_v0 = vld [vmem:[#allocation11_spill] sm:$0xff] }
 0x1fd   : > { %v3082_v53 = vpop.f32.mrf.mxu0  ;;  %v4099_v47 = vpop.f32.mrf.mxu1  ;;  %v3335_v41 = vadd.f32 %v3334_v7, %v3333_v57  ;;  %v3232_v37 = vadd.f32 %v3231_v31, %v3230_v52  ;;  %v3233_v13 = vsel %vm398_vm1, %v3157_v19, 0.0  ;;  %v3297_v63 = vmul.f32 %v3159_v45, %v3159_v45 }
 0x1fe   : > { %3192 = vst.msk [vmem:[%s4242_s8 + $0x78] sm:$0xff] %vm398_vm1, %v3160_v40  ;;  %v3158_v6 = vadd.f32 %v3069_v29, %v2852_v17  ;;  %v2857_v10 = vadd.f32 %v4099_v47, %v5329_v36  ;;  %v3338_v12 = vsel %vm398_vm1, %v3295_v5, 0.0  ;;  %v3237_v29 = vsel %vm398_vm1, %v3159_v45, 0.0 }
 0x1ff   : > { %v4136_v28 = vpop.f32.mrf.mxu0  ;;  %v2776_v62 = vpop.f32.mrf.mxu1  ;;  %v3234_v18 = vadd.f32 %v3233_v13, %v3232_v37  ;;  %v3337_v51 = vadd.f32 %v3336_v50, %v3335_v41  ;;  %v3298_v20 = vmul.f32 %v3160_v40, %v3160_v40  ;;  %v3342_v16 = vsel %vm398_vm1, %v3297_v63, 0.0 }
 0x200   : > { %v2855_v11 = vadd.f32 %v2776_v62, %v5332_v25  ;;  %3190 = vst.msk [vmem:[%s4242_s8 + $0x68] sm:$0xff] %vm398_vm1, %v3158_v6  ;;  %v3235_v4 = vsel %vm398_vm1, %v3158_v6, 0.0  ;;  %v3296_v49 = vmul.f32 %v3158_v6, %v3158_v6  ;;  %v3163_v60 = vadd.f32 %v4135_v33, %v2857_v10  ;;  %v5620_v25 = vld [vmem:[#allocation37_spill] sm:$0xff]  ;;  %v5625_v6 = vld [vmem:[#allocation12_spill] sm:$0xff] }
 0x201   : > { %v3085_v34 = vpop.f32.mrf.mxu0  ;;  %v4100_v23 = vpop.f32.mrf.mxu1  ;;  %v3339_v2 = vadd.f32 %v3338_v12, %v3337_v51  ;;  %v3236_v36 = vadd.f32 %v3235_v4, %v3234_v18  ;;  %v2253_v61 = vadd.f32 %v5620_v25, %v5619_v24  ;;  %v5442_v54 = vadd.f32 %v5621_v46, %v2250_v39  ;;  %v5626_v10 = vld [vmem:[#allocation41_spill] sm:$0xff] }
 0x202   : > { %v3161_v30 = vadd.f32 %v3082_v53, %v2855_v11  ;;  %v2858_v55 = vadd.f32 %v4100_v23, %v5341_v8  ;;  %v3340_v58 = vsel %vm398_vm1, %v3296_v49, 0.0  ;;  %3195 = vst.msk [vmem:[%s4242_s8 + $0x90] sm:$0xff] %vm398_vm1, %v3163_v60  ;;  %v3239_v33 = vsel %vm398_vm1, %v3160_v40, 0.0  ;;  %v5631_v46 = vld [vmem:[#allocation45_spill] sm:$0xff] }
 0x203   : > { %v4139_v1 = vpop.f32.mrf.mxu0  ;;  %v2779_v9 = vpop.f32.mrf.mxu1  ;;  %v3238_v27 = vadd.f32 %v3237_v29, %v3236_v36  ;;  %v3341_v38 = vadd.f32 %v3340_v58, %v3339_v2  ;;  %v2251_v52 = vadd.f32 %v5623_v22, %v5622_v0  ;;  %v3344_v31 = vsel %vm398_vm1, %v3298_v20, 0.0 }
 0x204   : > { %3193 = vst.msk [vmem:[%s4242_s8 + $0x80] sm:$0xff] %vm398_vm1, %v3161_v30  ;;  %v3299_v45 = vmul.f32 %v3161_v30, %v3161_v30  ;;  %v3164_v42 = vadd.f32 %v4136_v28, %v2858_v55  ;;  %v2856_v59 = vadd.f32 %v2779_v9, %v5354_v35  ;;  %v3241_v5 = vsel %vm398_vm1, %v3161_v30, 0.0  ;;  %v5627_v55 = vld [vmem:[#allocation36_spill] sm:$0xff] }
 0x205   : > { %v3098_v8 = vpop.f32.mrf.mxu0  ;;  %v4103_v19 = vpop.f32.mrf.mxu1  ;;  %v3343_v57 = vadd.f32 %v3342_v16, %v3341_v38  ;;  %v3240_v17 = vadd.f32 %v3239_v33, %v3238_v27  ;;  %v2560_v35 = vadd.f32 %v5624_v43, %v2253_v61  ;;  %v3301_v28 = vmul.f32 %v3163_v60, %v3163_v60  ;;  %v5628_v16 = vld [vmem:[#allocation13_spill] sm:$0xff]  ;;  %v5629_v27 = vld [vmem:[#allocation43_spill] sm:$0xff] }
 0x206   : > { %v2861_v53 = vadd.f32 %v4103_v19, %v5364_v14  ;;  %3196 = vst.msk [vmem:[%s4242_s8 + $0x98] sm:$0xff] %vm398_vm1, %v3164_v42  ;;  %v3162_v40 = vadd.f32 %v3085_v34, %v2856_v59  ;;  %v3346_v14 = vsel %vm398_vm1, %v3299_v45, 0.0  ;;  %v2256_v62 = vadd.f32 %v5626_v10, %v5625_v6 }
 0x207   : > { %v4140_v7 = vpop.f32.mrf.mxu0  ;;  %v2792_v47 = vpop.f32.mrf.mxu1  ;;  %v3242_v21 = vadd.f32 %v3241_v5, %v3240_v17  ;;  %v3345_v3 = vadd.f32 %v3344_v31, %v3343_v57  ;;  %v3245_v63 = vsel %vm398_vm1, %v3163_v60, 0.0  ;;  %v3302_v11 = vmul.f32 %v3164_v42, %v3164_v42 }
 0x208   : > { %v3167_v39 = vadd.f32 %v4139_v1, %v2861_v53  ;;  %v2859_v41 = vadd.f32 %v2792_v47, %v5380_v56  ;;  %3194 = vst.msk [vmem:[%s4242_s8 + $0x88] sm:$0xff] %vm398_vm1, %v3162_v40  ;;  %v3243_v44 = vsel %vm398_vm1, %v3162_v40, 0.0  ;;  %v3300_v50 = vmul.f32 %v3162_v40, %v3162_v40 }
 0x209   : > { %v3101_v37 = vpop.f32.mrf.mxu0  ;;  %v4104_v13 = vpop.f32.mrf.mxu1  ;;  %v3347_v18 = vadd.f32 %v3346_v14, %v3345_v3  ;;  %v3244_v51 = vadd.f32 %v3243_v44, %v3242_v21  ;;  %v2558_v60 = vadd.f32 %v5627_v55, %v2251_v52  ;;  %v3350_v1 = vsel %vm398_vm1, %v3301_v28, 0.0  ;;  %v5632_v14 = vld [vmem:[#allocation38_spill] sm:$0xff] }
 0x20a   : > { %3199 = vst.msk [vmem:[%s4242_s8 + $0xb0] sm:$0xff] %vm398_vm1, %v3167_v39  ;;  %v3348_v34 = vsel %vm398_vm1, %v3300_v50, 0.0  ;;  %v3165_v12 = vadd.f32 %v3098_v8, %v2859_v41  ;;  %v2862_v4 = vadd.f32 %v4104_v13, %v5406_v15  ;;  %v3247_v24 = vsel %vm398_vm1, %v3164_v42, 0.0  ;;  %v5630_v8 = vld [vmem:[#allocation14_spill] sm:$0xff] }
 0x20b   : > { %v4143_v56 = vpop.f32.mrf.mxu0  ;;  %v2795_v49 = vpop.f32.mrf.mxu1  ;;  %v3246_v23 = vadd.f32 %v3245_v63, %v3244_v51  ;;  %v3349_v2 = vadd.f32 %v3348_v34, %v3347_v18  ;;  %v2254_v38 = vadd.f32 %v5629_v27, %v5628_v16  ;;  %v2257_v33 = vadd.f32 %v5631_v46, %v5630_v8  ;;  %v5633_v18 = vld [vmem:[#allocation40_spill] sm:$0xff] }
 0x20c   : > { %v2860_v36 = vadd.f32 %v2795_v49, %v5414_v48  ;;  %3197 = vst.msk [vmem:[%s4242_s8 + $0xa0] sm:$0xff] %vm398_vm1, %v3165_v12  ;;  %v3303_v25 = vmul.f32 %v3165_v12, %v3165_v12  ;;  %v3168_v61 = vadd.f32 %v4140_v7, %v2862_v4  ;;  %v3352_v45 = vsel %vm398_vm1, %v3302_v11, 0.0  ;;  %v5635_v4 = vld [vmem:[#allocation42_spill] sm:$0xff] }
 0x20d   : > { %v3114_v30 = vpop.f32.mrf.mxu0  ;;  %v4107_v29 = vpop.f32.mrf.mxu1  ;;  %v3351_v15 = vadd.f32 %v3350_v1, %v3349_v2  ;;  %v3248_v20 = vadd.f32 %v3247_v24, %v3246_v23  ;;  %v3249_v42 = vsel %vm398_vm1, %v3165_v12, 0.0  ;;  %v3305_v57 = vmul.f32 %v3167_v39, %v3167_v39 }
 0x20e   : > { %v3166_v58 = vadd.f32 %v3101_v37, %v2860_v36  ;;  %v2865_v9 = vadd.f32 %v4107_v29, %v5421_v26  ;;  %3200 = vst.msk [vmem:[%s4242_s8 + $0xb8] sm:$0xff] %vm398_vm1, %v3168_v61  ;;  %v3354_v17 = vsel %vm398_vm1, %v3303_v25, 0.0  ;;  %v3253_v3 = vsel %vm398_vm1, %v3167_v39, 0.0 }
 0x20f   : > { %v4144_v48 = vpop.f32.mrf.mxu0  ;;  %v2808_v59 = vpop.f32.mrf.mxu1  ;;  %v3250_v19 = vadd.f32 %v3249_v42, %v3248_v20  ;;  %v3353_v0 = vadd.f32 %v3352_v45, %v3351_v15  ;;  %v3306_v41 = vmul.f32 %v3168_v61, %v3168_v61  ;;  %v2563_v44 = vadd.f32 %v5632_v14, %v2256_v62 }
 0x210   : > { %3198 = vst.msk [vmem:[%s4242_s8 + $0xa8] sm:$0xff] %vm398_vm1, %v3166_v58  ;;  %v3251_v26 = vsel %vm398_vm1, %v3166_v58, 0.0  ;;  %v3304_v22 = vmul.f32 %v3166_v58, %v3166_v58  ;;  %v3171_v53 = vadd.f32 %v4143_v56, %v2865_v9  ;;  %v2863_v7 = vadd.f32 %v2808_v59, %v5442_v54  ;;  %v5634_v56 = vld [vmem:[#allocation15_spill] sm:$0xff] }
 0x211   : > { %v3117_v52 = vpop.f32.mrf.mxu0  ;;  %v4108_v31 = vpop.f32.mrf.mxu1  ;;  %v3355_v5 = vadd.f32 %v3354_v17, %v3353_v0  ;;  %v3252_v40 = vadd.f32 %v3251_v26, %v3250_v19  ;;  %v3358_v10 = vsel %vm398_vm1, %v3305_v57, 0.0  ;;  %v3255_v63 = vsel %vm398_vm1, %v3168_v61, 0.0 }
 0x212   : > { %v3356_v47 = vsel %vm398_vm1, %v3304_v22, 0.0  ;;  %v2866_v43 = vadd.f32 %v4108_v31, %v2560_v35  ;;  %3203 = vst.msk [vmem:[%s4242_s8 + $0xd0] sm:$0xff] %vm398_vm1, %v3171_v53  ;;  %v3169_v37 = vadd.f32 %v3114_v30, %v2863_v7  ;;  %v2561_v51 = vadd.f32 %v5633_v18, %v2254_v38 }
 0x213   : > { %v4147_v21 = vpop.f32.mrf.mxu0  ;;  %v2811_v28 = vpop.f32.mrf.mxu1  ;;  %v3254_v50 = vadd.f32 %v3253_v3, %v3252_v40  ;;  %v3357_v54 = vadd.f32 %v3356_v47, %v3355_v5  ;;  %v2255_v11 = vadd.f32 %v5263_v32, %v5634_v56  ;;  %v2564_v49 = vadd.f32 %v5635_v4, %v2257_v33  ;;  %v5636_v33 = vld [vmem:[#allocation44_spill] sm:$0xff] }
 0x214   : > { %v3172_v13 = vadd.f32 %v4144_v48, %v2866_v43  ;;  %v2864_v6 = vadd.f32 %v2811_v28, %v2558_v60  ;;  %3201 = vst.msk [vmem:[%s4242_s8 + $0xc0] sm:$0xff] %vm398_vm1, %v3169_v37  ;;  %v3307_v35 = vmul.f32 %v3169_v37, %v3169_v37  ;;  %v3360_v23 = vsel %vm398_vm1, %v3306_v41, 0.0 }
 0x215   : > { %v4111_v39 = vpop.f32.mrf.mxu1  ;;  %v3359_v34 = vadd.f32 %v3358_v10, %v3357_v54  ;;  %v3256_v62 = vadd.f32 %v3255_v63, %v3254_v50  ;;  %v3130_v12 = vpop.f32.mrf.mxu0  ;;  %v3257_v2 = vsel %vm398_vm1, %v3169_v37, 0.0  ;;  %v3309_v60 = vmul.f32 %v3171_v53, %v3171_v53 }
 0x216   : > { %3204 = vst.msk [vmem:[%s4242_s8 + $0xd8] sm:$0xff] %vm398_vm1, %v3172_v13  ;;  %v3170_v36 = vadd.f32 %v3117_v52, %v2864_v6  ;;  %v2869_v30 = vadd.f32 %v4111_v39, %v2563_v44  ;;  %v3362_v25 = vsel %vm398_vm1, %v3307_v35, 0.0  ;;  %v3261_v38 = vsel %vm398_vm1, %v3171_v53, 0.0 }
 0x217   : > { %v2824_v55 = vpop.f32.mrf.mxu1  ;;  %v3258_v1 = vadd.f32 %v3257_v2, %v3256_v62  ;;  %v3361_v24 = vadd.f32 %v3360_v23, %v3359_v34  ;;  %v4148_v16 = vpop.f32.mrf.mxu0  ;;  %v3310_v8 = vmul.f32 %v3172_v13, %v3172_v13  ;;  %v2562_v45 = vadd.f32 %v5636_v33, %v2255_v11 }
 0x218   : > { %v2867_v32 = vadd.f32 %v2824_v55, %v2561_v51  ;;  %3202 = vst.msk [vmem:[%s4242_s8 + $0xc8] sm:$0xff] %vm398_vm1, %v3170_v36  ;;  %v3259_v61 = vsel %vm398_vm1, %v3170_v36, 0.0  ;;  %v3308_v29 = vmul.f32 %v3170_v36, %v3170_v36  ;;  %v3175_v15 = vadd.f32 %v4147_v21, %v2869_v30  ;;  %v3209_v36 = vld [vmem:[%s5549_s5] sm:$0x1] }
 0x219   : > { %v4112_v20 = vpop.f32.mrf.mxu1  ;;  %v3363_v58 = vadd.f32 %v3362_v25, %v3361_v24  ;;  %v3260_v9 = vadd.f32 %v3259_v61, %v3258_v1  ;;  %v3366_v59 = vsel %vm398_vm1, %v3309_v60, 0.0  ;;  %v3263_v26 = vsel %vm398_vm1, %v3172_v13, 0.0  ;;  %v3133_v7 = vpop.f32.mrf.mxu0  ;;  %v3282_v60 = vld [vmem:[%s5550_s6] sm:$0x1] }
 0x21a   : > { %v3173_v48 = vadd.f32 %v3130_v12, %v2867_v32  ;;  %v2870_v27 = vadd.f32 %v4112_v20, %v2564_v49  ;;  %v3364_v46 = vsel %vm398_vm1, %v3308_v29, 0.0  ;;  %3207 = vst.msk [vmem:[%s4242_s8 + $0xf0] sm:$0xff] %vm398_vm1, %v3175_v15  ;;  %v3368_v31 = vsel %vm398_vm1, %v3310_v8, 0.0 }
 0x21b   : > { %v2827_v42 = vpop.f32.mrf.mxu1  ;;  %v3262_v19 = vadd.f32 %v3261_v38, %v3260_v9  ;;  %v3365_v0 = vadd.f32 %v3364_v46, %v3363_v58  ;;  %v3313_v21 = vmul.f32 %v3175_v15, %v3175_v15  ;;  %v3269_v44 = vsel %vm398_vm1, %v3175_v15, 0.0 }
 0x21c   : > { %3205 = vst.msk [vmem:[%s4242_s8 + $0xe0] sm:$0xff] %vm398_vm1, %v3173_v48  ;;  %v3311_v22 = vmul.f32 %v3173_v48, %v3173_v48  ;;  %v3176_v52 = vadd.f32 %v4148_v16, %v2870_v27  ;;  %v2868_v57 = vadd.f32 %v2827_v42, %v2562_v45  ;;  %v3265_v5 = vsel %vm398_vm1, %v3173_v48, 0.0 }
 0x21d   : > { %v3367_v17 = vadd.f32 %v3366_v59, %v3365_v0  ;;  %v3264_v53 = vadd.f32 %v3263_v26, %v3262_v19  ;;  %v3374_v10 = vsel %vm398_vm1, %v3313_v21, 0.0 }
 0x21e   : > { %3208 = vst.msk [vmem:[%s4242_s8 + $0xf8] sm:$0xff] %vm398_vm1, %v3176_v52  ;;  %v3174_v40 = vadd.f32 %v3133_v7, %v2868_v57  ;;  %v3370_v3 = vsel %vm398_vm1, %v3311_v22, 0.0  ;;  %v3314_v50 = vmul.f32 %v3176_v52, %v3176_v52  ;;  %v3271_v63 = vsel %vm398_vm1, %v3176_v52, 0.0 }
 0x21f   : > { %v3266_v47 = vadd.f32 %v3265_v5, %v3264_v53  ;;  %v3369_v43 = vadd.f32 %v3368_v31, %v3367_v17 }
 0x220   : > { %3206 = vst.msk [vmem:[%s4242_s8 + $0xe8] sm:$0xff] %vm398_vm1, %v3174_v40  ;;  %v3267_v41 = vsel %vm398_vm1, %v3174_v40, 0.0  ;;  %v3312_v37 = vmul.f32 %v3174_v40, %v3174_v40  ;;  %v3376_v18 = vsel %vm398_vm1, %v3314_v50, 0.0 }
 0x221   : > { %v3371_v28 = vadd.f32 %v3370_v3, %v3369_v43  ;;  %v3268_v14 = vadd.f32 %v3267_v41, %v3266_v47 }
 0x222   : > { %v3372_v54 = vsel %vm398_vm1, %v3312_v37, 0.0 }
 0x223   : > { %v3270_v13 = vadd.f32 %v3269_v44, %v3268_v14  ;;  %v3373_v6 = vadd.f32 %v3372_v54, %v3371_v28 }
 0x225   : > { %v3272_v35 = vadd.f32 %v3271_v63, %v3270_v13  ;;  %v3375_v39 = vadd.f32 %v3374_v10, %v3373_v6 }
 0x227   : > { %v3273_v51 = vrot.slane %v3272_v35, 4  ;;  %v3377_v56 = vadd.f32 %v3376_v18, %v3375_v39 }
 0x229   : > { %v3274_v11 = vadd.f32 %v3273_v51, %v3272_v35  ;;  %v3378_v34 = vrot.slane %v3377_v56, 4 }
 0x22b   : > { %v3275_v62 = vrot.slane %v3274_v11, 2  ;;  %v3379_v12 = vadd.f32 %v3378_v34, %v3377_v56 }
 0x22d   : > { %v3276_v4 = vadd.f32 %v3275_v62, %v3274_v11  ;;  %v3380_v49 = vrot.slane %v3379_v12, 2 }
 0x22f   : > { %v3277_v23 = vrot.slane %v3276_v4, 1  ;;  %v3381_v2 = vadd.f32 %v3380_v49, %v3379_v12 }
 0x231   : > { %v3278_v30 = vadd.f32 %v3277_v23, %v3276_v4  ;;  %v3382_v55 = vrot.slane %v3381_v2, 1 }
 0x233   : > { %v3279_v1 = vadd.f32 %v3278_v30, %v3209_v36  ;;  %v3383_v24 = vadd.f32 %v3382_v55, %v3381_v2 }
 0x235   : > { %3281 = vst.msk [vmem:[%s5549_s5] sm:$0x1] %vm3280_vm3, %v3279_v1  ;;  %v3384_v32 = vadd.f32 %v3383_v24, %v3282_v60 }
 0x237   : > { %3385 = vst.msk [vmem:[%s5550_s6] sm:$0x1] %vm3280_vm3, %v3384_v32 }
 0x238 PF: > { %s17_s21 = sadd.s32 1, %s4187_s21  }
 0x239   : > { %p14_p6 = scmp.ge.s32.totalorder %s17_s21, 4  }
 0x23b   :  { %16 = sbr.rel (!%p14_p6) target bundleno = 1 (0x1), region = 96 }

</bundles_post_ra>
